<compile_context>
chip_gen: v5e
topology: v5e:2x2
jax: 0.10.0
libtpu: 0.0.40
codegen_flags: <defaults>
</compile_context>

<pallas_src>
import jax
import jax.numpy as jnp
from jax.experimental import pallas as pl
from jax.experimental.pallas import tpu as pltpu


# ---------------------------------------------------------------------------
# Helpers: block-size / VMEM heuristics
# ---------------------------------------------------------------------------
def _device_kind():
  try:
    return jax.devices()[0].device_kind.lower()
  except Exception:
    return ""


def _pick_block_b(B, T, target_rows):
  """Largest divisor of B with block_b*T <= target_rows, preferring a grid of
  >= 2 steps so both v7x TensorCores get work."""
  divs = [d for d in range(1, B + 1) if B % d == 0]
  multi = [d for d in divs if B // d >= 2]     # keep >= 2 grid steps if possible
  pool = multi if multi else divs
  fit = [d for d in pool if d * T <= target_rows]
  return max(fit) if fit else min(pool)


def _ceil(n, m):
  return -(-n // m) * m


def _estimate_vmem_bytes(block_b, T, D, H, C2, itemsize):
  """Rough per-step VMEM live set: (8,128)-padded, double-buffered I/O plus
  a few full-size f32 activation temporaries."""
  rows = block_b * T
  p_buf = block_b * _ceil(T, 8) * _ceil(D, 128) * itemsize * 2
  w_elems = (_ceil(D, 8) * _ceil(2 * H, 128)
             + 4 * _ceil(2 * H, 8) * _ceil(H, 128)
             + _ceil(H, 8) * _ceil(C2, 128))
  w_buf = w_elems * itemsize * 2
  b_buf = 8 * (_ceil(2 * H, 128) + 4 * _ceil(H, 128) + _ceil(C2, 128)) * 4 * 2
  out_buf = block_b * _ceil(C2, 128) * 4 * 2
  act = 3 * rows * _ceil(2 * H, 128) * 4
  return p_buf + w_buf + b_buf + out_buf + act


# ---------------------------------------------------------------------------
# Kernel
# ---------------------------------------------------------------------------
def simple_pointnet_kernel(p_ref, wpos_ref, bpos_ref, wstk_ref, bstk_ref,
                           whead_ref, bhead_ref, out_ref):
  """One batch block of the SimplePointnet forward.

  Per grid step:
    p_ref     : (block_b, T, D)    points (bf16 or f32)
    wpos_ref  : (D, 2H)            fc_pos weight
    bpos_ref  : (1, 2H)            fc_pos bias (f32)
    wstk_ref  : (4, 2H, H)         fc_0..fc_3 weights, stacked
    bstk_ref  : (4, H)             fc_0..fc_3 biases, stacked (f32)
    whead_ref : (H, 2C)            [fc_mean | fc_std] weights, fused
    bhead_ref : (1, 2C)            [fc_mean | fc_std] biases, fused (f32)
    out_ref   : (1, block_b, 2C)   fused (mean, std) output slab (f32)
  """
  block_b, T, D = p_ref.shape
  H = wstk_ref.shape[2]
  rows = block_b * T
  cdt = wpos_ref.dtype                     # matmul operand dtype (bf16 or f32)

  bstk = bstk_ref[...]                                          # (4, H) f32

  # fc_pos: flatten batch*points so the MXU sees a tall M (K=D=3 is tiny but
  # unavoidable).  Accumulate in f32.
  p2 = p_ref[...].reshape(rows, D)
  net = jnp.dot(p2, wpos_ref[...],
                preferred_element_type=jnp.float32) + bpos_ref[...]   # (rows, 2H)

  # fc_0(relu(net)); keep `net` in (block_b, T, H) from here on
  # (reshape is free: T % 8 == 0, so sublane grouping is unchanged).
  net = jnp.dot(jnp.maximum(net, 0.0).astype(cdt), wstk_ref[0],
                preferred_element_type=jnp.float32) + bstk[0]
  net = net.reshape(block_b, T, H)

  # Three (pool -> concat -> fc_k(relu(.))) stages.  The concat is folded into
  # a weight split:
  #   relu(cat([net, pooled], -1)) @ W == relu(net) @ W[:H] + relu(pooled) @ W[H:]
  # Valid because the reference concatenates in [net, pooled] order and relu is
  # monotone (relu(max(net)) == max(relu(net))).  If the model ever changes the
  # cat order or uses a non-monotone activation, this folding must change too.
  for i in (1, 2, 3):
    r = jnp.maximum(net, 0.0)                                   # (b, T, H) f32
    pooled = jnp.max(r, axis=1)                                 # (b, H)    f32
    w = wstk_ref[i]                                             # (2H, H)
    per_cloud = (jnp.dot(pooled.astype(cdt), w[H:, :],
                         preferred_element_type=jnp.float32)
                 + bstk[i])                                     # (b, H) f32
    net = (jnp.dot(r.reshape(rows, H).astype(cdt), w[:H, :],
                   preferred_element_type=jnp.float32).reshape(block_b, T, H)
           + per_cloud[:, None, :])                             # (b, T, H) f32

  # Final pool + fused mean/std head.  Pool before relu (they commute) so the
  # relu runs on (b, H) instead of (b, T, H).
  act = jnp.maximum(jnp.max(net, axis=1), 0.0)                  # (b, H) f32
  out = jnp.dot(act.astype(cdt), whead_ref[...],
                preferred_element_type=jnp.float32) + bhead_ref[...]
  out_ref[0] = out.astype(out_ref.dtype)                        # (b, 2C) store


# ---------------------------------------------------------------------------
# Wrapper
# ---------------------------------------------------------------------------
def simple_pointnet_forward(p, params, *, block_b=None, target_rows=None,
                            use_bf16=True):
  B, T, D = p.shape
  H = params["w_stack"].shape[2]
  C2 = params["w_heads"].shape[1]            # = 2 * c_dim (fused heads)

  assert T % 8 == 0, "T must be a multiple of 8 for tile-aligned reshapes"
  assert params["w_stack"].shape[1] == 2 * H

  kind = _device_kind()
  if target_rows is None:
    # v5e's 4x128^2 MXU saturates around 128-512 rows; v6e/v7x amortize the
    # ~0.35us per-grid-step overhead better with 1k-2k rows per step.
    target_rows = 512 if "v5" in kind else 2048
  if block_b is None:
    block_b = _pick_block_b(B, T, target_rows)
  assert B % block_b == 0
  n_blocks = B // block_b

  cdt = jnp.bfloat16 if use_bf16 else jnp.float32
  p_in = p.astype(cdt)                                    # halves HBM traffic
  w_pos = params["w_pos"].astype(cdt)
  w_stack = params["w_stack"].astype(cdt)
  w_heads = params["w_heads"].astype(cdt)
  b_pos = params["b_pos"].astype(jnp.float32)
  b_stack = params["b_stack"].astype(jnp.float32)
  b_heads = params["b_heads"].astype(jnp.float32)

  # Explicit, generation-aware VMEM budget (v7x has 64 MiB/TC vs 128 MiB).
  est = _estimate_vmem_bytes(block_b, T, D, H, C2, jnp.dtype(cdt).itemsize)
  vmem_cap = (64 << 20) if "v7" in kind else (128 << 20)
  vmem_limit = int(min(max(2 * est, 16 << 20), vmem_cap))

  in_specs = [
      pl.BlockSpec((block_b, T, D), lambda b: (b, 0, 0)),
      pl.BlockSpec(w_pos.shape, lambda b: (0, 0)),
      pl.BlockSpec(b_pos.shape, lambda b: (0, 0)),
      pl.BlockSpec(w_stack.shape, lambda b: (0, 0, 0)),
      pl.BlockSpec(b_stack.shape, lambda b: (0, 0)),
      pl.BlockSpec(w_heads.shape, lambda b: (0, 0)),
      pl.BlockSpec(b_heads.shape, lambda b: (0, 0)),
  ]
  # 3D output (n_blocks, block_b, 2C): last two dims are the full block, so no
  # sublane-alignment constraint on block_b, and for 2C >= 128 (module default
  # c_dim=128 -> 2C=256) the per-step store is a full, unmasked lane-dense row.
  out_specs = pl.BlockSpec((1, block_b, C2), lambda b: (b, 0, 0))
  out_shape = jax.ShapeDtypeStruct((n_blocks, block_b, C2), jnp.float32)

  out = pl.pallas_call(
      simple_pointnet_kernel,
      out_shape=out_shape,
      grid_spec=pltpu.PrefetchScalarGridSpec(
          num_scalar_prefetch=0,
          grid=(n_blocks,),
          in_specs=in_specs,
          out_specs=out_specs),
      compiler_params=pltpu.CompilerParams(
          dimension_semantics=("parallel",),
          vmem_limit_bytes=vmem_limit),
  )(p_in, w_pos, b_pos, w_stack, b_stack, w_heads, b_heads)

  out = out.reshape(B, C2)
  C = C2 // 2
  return out[:, :C], out[:, C:]


# ---------------------------------------------------------------------------
# Parameters / reference
# ---------------------------------------------------------------------------
def init_params(key, dim=3, hidden_dim=128, c_dim=128):
  """Deterministic synthetic init matching SimplePointnet.__init__ shapes
  (fc_mean / fc_std use the module's constant init)."""
  H, C, D = hidden_dim, c_dim, dim
  ks = jax.random.split(key, 8)

  def lin(k, fan_in, fan_out, scale=0.1):
    return scale * jax.random.normal(k, (fan_in, fan_out), jnp.float32)

  w_pos = lin(ks[0], D, 2 * H)                                        # fc_pos
  b_pos = 0.05 * jax.random.normal(ks[1], (1, 2 * H), jnp.float32)
  w_stack = jnp.stack([lin(ks[2 + j], 2 * H, H) for j in range(4)])   # (4, 2H, H)
  b_stack = 0.05 * jax.random.normal(ks[6], (4, H), jnp.float32)      # (4, H)
  # fc_mean / fc_std: constant-initialized exactly as in the module, fused.
  w_heads = jnp.zeros((H, 2 * C), jnp.float32)
  b_heads = jnp.concatenate([jnp.zeros((1, C), jnp.float32),
                             jnp.full((1, C), -10.0, jnp.float32)], axis=1)
  return dict(w_pos=w_pos, b_pos=b_pos, w_stack=w_stack, b_stack=b_stack,
              w_heads=w_heads, b_heads=b_heads)


def ref_forward(p, params):
  """Pure-JAX reference mirroring the PyTorch forward (explicit concat)."""
  net = p @ params["w_pos"] + params["b_pos"]
  net = jax.nn.relu(net) @ params["w_stack"][0] + params["b_stack"][0]
  for i in (1, 2, 3):
    pooled = jnp.max(net, axis=1, keepdims=True)
    netc = jnp.concatenate([net, jnp.broadcast_to(pooled, net.shape)], axis=2)
    net = jax.nn.relu(netc) @ params["w_stack"][i] + params["b_stack"][i]
  net = jnp.max(net, axis=1)
  act = jax.nn.relu(net)
  out = act @ params["w_heads"] + params["b_heads"]
  C = out.shape[1] // 2
  return out[:, :C], out[:, C:]


# ---------------------------------------------------------------------------
# Demo / correctness harness (small shapes; real tuning needs T >= 1024)
# ---------------------------------------------------------------------------
if __name__ == "__main__":
  key = jax.random.PRNGKey(0)
  k_p, k_w, k_h1, k_h2 = jax.random.split(key, 4)

  # Small batch / point count; hidden_dim and c_dim use the module defaults
  # (128) so activations and the output store are naturally lane-dense.
  B, T, D = 16, 64, 3
  H, C = 128, 128

  p = jax.random.normal(k_p, (B, T, D), jnp.float32)
  params = init_params(k_w, dim=D, hidden_dim=H, c_dim=C)

  # Random head weights for the numerical checks: the module's constant init
  # (zeros) would make any bug in the fused mean/std head invisible.
  params_rnd = dict(params)
  params_rnd["w_heads"] = 0.1 * jax.random.normal(k_h1, (H, 2 * C), jnp.float32)
  params_rnd["b_heads"] = 0.05 * jax.random.normal(k_h2, (1, 2 * C), jnp.float32)

  # (1) strict f32 check of all fusions (weight-split concat, fused head, split)
  m32, s32 = simple_pointnet_forward(p, params_rnd, use_bf16=False)
  jax.block_until_ready((m32, s32))
  rm, rs = ref_forward(p, params_rnd)
  assert m32.shape == (B, C) and s32.shape == (B, C)
  assert jnp.allclose(m32, rm, rtol=1e-4, atol=1e-5)
  assert jnp.allclose(s32, rs, rtol=1e-4, atol=1e-5)

  # (2) default bf16-MXU path against the f32 reference (loose tolerance)
  mbf, sbf = simple_pointnet_forward(p, params_rnd, use_bf16=True)
  jax.block_until_ready((mbf, sbf))
  assert jnp.allclose(mbf, rm, rtol=5e-2, atol=3e-2)
  assert jnp.allclose(sbf, rs, rtol=5e-2, atol=3e-2)

  # (3) module-faithful constant-initialized heads (mean == 0, std == -10)
  m0, s0 = simple_pointnet_forward(p, params, use_bf16=True)
  jax.block_until_ready((m0, s0))
  rm0, rs0 = ref_forward(p, params)
  assert jnp.allclose(m0, rm0, atol=1e-6)
  assert jnp.allclose(s0, rs0, atol=1e-6)

  print("KERNEL_OK")
</pallas_src>

<mosaic_0001>
module attributes {stable_mosaic.version = 11 : i64} {
  func.func @simple_pointnet_kernel(%arg0: i32, %arg1: memref<8x64x3xf32, #tpu.memory_space<vmem>>, %arg2: memref<3x256xf32, #tpu.memory_space<vmem>>, %arg3: memref<1x256xf32, #tpu.memory_space<vmem>>, %arg4: memref<4x256x128xf32, #tpu.memory_space<vmem>>, %arg5: memref<4x128xf32, #tpu.memory_space<vmem>>, %arg6: memref<128x256xf32, #tpu.memory_space<vmem>>, %arg7: memref<1x256xf32, #tpu.memory_space<vmem>>, %arg8: memref<1x8x256xf32, #tpu.memory_space<vmem>>) attributes {dimension_semantics = [#tpu.dimension_semantics<parallel>], iteration_bounds = array<i64: 2>, scalar_prefetch = 0 : i64, scratch_operands = 0 : i64, tpu.core_type = #tpu.core_type<tc>, window_params = [{transform_indices = @transform_0, window_bounds = array<i64: 8, 64, 3>}, {pipeline_mode = #tpu.pipeline_mode<synchronous>, transform_indices = @transform_1, window_bounds = array<i64: 3, 256>}, {pipeline_mode = #tpu.pipeline_mode<synchronous>, transform_indices = @transform_2, window_bounds = array<i64: 1, 256>}, {pipeline_mode = #tpu.pipeline_mode<synchronous>, transform_indices = @transform_3, window_bounds = array<i64: 4, 256, 128>}, {pipeline_mode = #tpu.pipeline_mode<synchronous>, transform_indices = @transform_4, window_bounds = array<i64: 4, 128>}, {pipeline_mode = #tpu.pipeline_mode<synchronous>, transform_indices = @transform_5, window_bounds = array<i64: 128, 256>}, {pipeline_mode = #tpu.pipeline_mode<synchronous>, transform_indices = @transform_6, window_bounds = array<i64: 1, 256>}, {transform_indices = @transform_7, window_bounds = array<i64: 1, 8, 256>}]} {
    %c0 = arith.constant 0 : index
    %c0_0 = arith.constant 0 : index
    %0 = vector.load %arg5[%c0, %c0_0] : memref<4x128xf32, #tpu.memory_space<vmem>>, vector<4x128xf32>
    %c0_1 = arith.constant 0 : index
    %c0_2 = arith.constant 0 : index
    %c0_3 = arith.constant 0 : index
    %1 = vector.load %arg1[%c0_1, %c0_2, %c0_3] : memref<8x64x3xf32, #tpu.memory_space<vmem>>, vector<8x64x3xf32>
    %2 = vector.shape_cast %1 : vector<8x64x3xf32> to vector<512x3xf32>
    %c0_4 = arith.constant 0 : index
    %c0_5 = arith.constant 0 : index
    %3 = vector.load %arg2[%c0_4, %c0_5] : memref<3x256xf32, #tpu.memory_space<vmem>>, vector<3x256xf32>
    %cst = arith.constant dense<0.000000e+00> : vector<512x256xf32>
    %4 = tpu.matmul %2, %3, %cst {dimension_numbers = #tpu.dot_dimension_numbers<[1], [0], [0], [1], [0, 0, 1, 1], [], []>} : vector<512x3xf32>, vector<3x256xf32>, vector<512x256xf32> -> vector<512x256xf32>
    %c0_6 = arith.constant 0 : index
    %c0_7 = arith.constant 0 : index
    %5 = vector.load %arg3[%c0_6, %c0_7] : memref<1x256xf32, #tpu.memory_space<vmem>>, vector<1x256xf32>
    %6 = vector.broadcast %5 : vector<1x256xf32> to vector<512x256xf32>
    %7 = arith.addf %4, %6 : vector<512x256xf32>
    %cst_8 = arith.constant 0.000000e+00 : f32
    %8 = vector.broadcast %cst_8 : f32 to vector<512x256xf32>
    %9 = arith.maximumf %7, %8 : vector<512x256xf32>
    %c0_9 = arith.constant 0 : index
    %c0_10 = arith.constant 0 : index
    %c0_11 = arith.constant 0 : index
    %10 = vector.load %arg4[%c0_9, %c0_10, %c0_11] : memref<4x256x128xf32, #tpu.memory_space<vmem>>, vector<1x256x128xf32>
    %11 = vector.shape_cast %10 : vector<1x256x128xf32> to vector<256x128xf32>
    %cst_12 = arith.constant dense<0.000000e+00> : vector<512x128xf32>
    %12 = tpu.matmul %9, %11, %cst_12 {dimension_numbers = #tpu.dot_dimension_numbers<[1], [0], [0], [1], [0, 0, 1, 1], [], []>} : vector<512x256xf32>, vector<256x128xf32>, vector<512x128xf32> -> vector<512x128xf32>
    %13 = vector.extract_strided_slice %0 {offsets = [0, 0], sizes = [1, 128], strides = [1, 1]} : vector<4x128xf32> to vector<1x128xf32>
    %14 = vector.shape_cast %13 : vector<1x128xf32> to vector<128xf32>
    %15 = vector.shape_cast %14 : vector<128xf32> to vector<1x128xf32>
    %16 = vector.broadcast %15 : vector<1x128xf32> to vector<512x128xf32>
    %17 = arith.addf %12, %16 : vector<512x128xf32>
    %18 = vector.shape_cast %17 : vector<512x128xf32> to vector<8x64x128xf32>
    %cst_13 = arith.constant 0.000000e+00 : f32
    %19 = vector.broadcast %cst_13 : f32 to vector<8x64x128xf32>
    %20 = arith.maximumf %18, %19 : vector<8x64x128xf32>
    %cst_14 = arith.constant dense<0xFF800000> : vector<8x128xf32>
    %21 = vector.multi_reduction <maximumf>, %20, %cst_14 [1] : vector<8x64x128xf32> to vector<8x128xf32>
    %c1 = arith.constant 1 : index
    %c0_15 = arith.constant 0 : index
    %c0_16 = arith.constant 0 : index
    %22 = vector.load %arg4[%c1, %c0_15, %c0_16] : memref<4x256x128xf32, #tpu.memory_space<vmem>>, vector<1x256x128xf32>
    %23 = vector.shape_cast %22 : vector<1x256x128xf32> to vector<256x128xf32>
    %24 = vector.extract_strided_slice %23 {offsets = [128, 0], sizes = [128, 128], strides = [1, 1]} : vector<256x128xf32> to vector<128x128xf32>
    %cst_17 = arith.constant dense<0.000000e+00> : vector<8x128xf32>
    %25 = tpu.matmul %21, %24, %cst_17 {dimension_numbers = #tpu.dot_dimension_numbers<[1], [0], [0], [1], [0, 0, 1, 1], [], []>} : vector<8x128xf32>, vector<128x128xf32>, vector<8x128xf32> -> vector<8x128xf32>
    %26 = vector.extract_strided_slice %0 {offsets = [1, 0], sizes = [1, 128], strides = [1, 1]} : vector<4x128xf32> to vector<1x128xf32>
    %27 = vector.shape_cast %26 : vector<1x128xf32> to vector<128xf32>
    %28 = vector.shape_cast %27 : vector<128xf32> to vector<1x128xf32>
    %29 = vector.broadcast %28 : vector<1x128xf32> to vector<8x128xf32>
    %30 = arith.addf %25, %29 : vector<8x128xf32>
    %31 = vector.shape_cast %20 : vector<8x64x128xf32> to vector<512x128xf32>
    %32 = vector.extract_strided_slice %23 {offsets = [0, 0], sizes = [128, 128], strides = [1, 1]} : vector<256x128xf32> to vector<128x128xf32>
    %cst_18 = arith.constant dense<0.000000e+00> : vector<512x128xf32>
    %33 = tpu.matmul %31, %32, %cst_18 {dimension_numbers = #tpu.dot_dimension_numbers<[1], [0], [0], [1], [0, 0, 1, 1], [], []>} : vector<512x128xf32>, vector<128x128xf32>, vector<512x128xf32> -> vector<512x128xf32>
    %34 = vector.shape_cast %33 : vector<512x128xf32> to vector<8x64x128xf32>
    %35 = vector.shape_cast %30 : vector<8x128xf32> to vector<8x1x128xf32>
    %36 = vector.broadcast %35 : vector<8x1x128xf32> to vector<8x64x128xf32>
    %37 = arith.addf %34, %36 : vector<8x64x128xf32>
    %cst_19 = arith.constant 0.000000e+00 : f32
    %38 = vector.broadcast %cst_19 : f32 to vector<8x64x128xf32>
    %39 = arith.maximumf %37, %38 : vector<8x64x128xf32>
    %cst_20 = arith.constant dense<0xFF800000> : vector<8x128xf32>
    %40 = vector.multi_reduction <maximumf>, %39, %cst_20 [1] : vector<8x64x128xf32> to vector<8x128xf32>
    %c2 = arith.constant 2 : index
    %c0_21 = arith.constant 0 : index
    %c0_22 = arith.constant 0 : index
    %41 = vector.load %arg4[%c2, %c0_21, %c0_22] : memref<4x256x128xf32, #tpu.memory_space<vmem>>, vector<1x256x128xf32>
    %42 = vector.shape_cast %41 : vector<1x256x128xf32> to vector<256x128xf32>
    %43 = vector.extract_strided_slice %42 {offsets = [128, 0], sizes = [128, 128], strides = [1, 1]} : vector<256x128xf32> to vector<128x128xf32>
    %cst_23 = arith.constant dense<0.000000e+00> : vector<8x128xf32>
    %44 = tpu.matmul %40, %43, %cst_23 {dimension_numbers = #tpu.dot_dimension_numbers<[1], [0], [0], [1], [0, 0, 1, 1], [], []>} : vector<8x128xf32>, vector<128x128xf32>, vector<8x128xf32> -> vector<8x128xf32>
    %45 = vector.extract_strided_slice %0 {offsets = [2, 0], sizes = [1, 128], strides = [1, 1]} : vector<4x128xf32> to vector<1x128xf32>
    %46 = vector.shape_cast %45 : vector<1x128xf32> to vector<128xf32>
    %47 = vector.shape_cast %46 : vector<128xf32> to vector<1x128xf32>
    %48 = vector.broadcast %47 : vector<1x128xf32> to vector<8x128xf32>
    %49 = arith.addf %44, %48 : vector<8x128xf32>
    %50 = vector.shape_cast %39 : vector<8x64x128xf32> to vector<512x128xf32>
    %51 = vector.extract_strided_slice %42 {offsets = [0, 0], sizes = [128, 128], strides = [1, 1]} : vector<256x128xf32> to vector<128x128xf32>
    %cst_24 = arith.constant dense<0.000000e+00> : vector<512x128xf32>
    %52 = tpu.matmul %50, %51, %cst_24 {dimension_numbers = #tpu.dot_dimension_numbers<[1], [0], [0], [1], [0, 0, 1, 1], [], []>} : vector<512x128xf32>, vector<128x128xf32>, vector<512x128xf32> -> vector<512x128xf32>
    %53 = vector.shape_cast %52 : vector<512x128xf32> to vector<8x64x128xf32>
    %54 = vector.shape_cast %49 : vector<8x128xf32> to vector<8x1x128xf32>
    %55 = vector.broadcast %54 : vector<8x1x128xf32> to vector<8x64x128xf32>
    %56 = arith.addf %53, %55 : vector<8x64x128xf32>
    %cst_25 = arith.constant 0.000000e+00 : f32
    %57 = vector.broadcast %cst_25 : f32 to vector<8x64x128xf32>
    %58 = arith.maximumf %56, %57 : vector<8x64x128xf32>
    %cst_26 = arith.constant dense<0xFF800000> : vector<8x128xf32>
    %59 = vector.multi_reduction <maximumf>, %58, %cst_26 [1] : vector<8x64x128xf32> to vector<8x128xf32>
    %c3 = arith.constant 3 : index
    %c0_27 = arith.constant 0 : index
    %c0_28 = arith.constant 0 : index
    %60 = vector.load %arg4[%c3, %c0_27, %c0_28] : memref<4x256x128xf32, #tpu.memory_space<vmem>>, vector<1x256x128xf32>
    %61 = vector.shape_cast %60 : vector<1x256x128xf32> to vector<256x128xf32>
    %62 = vector.extract_strided_slice %61 {offsets = [128, 0], sizes = [128, 128], strides = [1, 1]} : vector<256x128xf32> to vector<128x128xf32>
    %cst_29 = arith.constant dense<0.000000e+00> : vector<8x128xf32>
    %63 = tpu.matmul %59, %62, %cst_29 {dimension_numbers = #tpu.dot_dimension_numbers<[1], [0], [0], [1], [0, 0, 1, 1], [], []>} : vector<8x128xf32>, vector<128x128xf32>, vector<8x128xf32> -> vector<8x128xf32>
    %64 = vector.extract_strided_slice %0 {offsets = [3, 0], sizes = [1, 128], strides = [1, 1]} : vector<4x128xf32> to vector<1x128xf32>
    %65 = vector.shape_cast %64 : vector<1x128xf32> to vector<128xf32>
    %66 = vector.shape_cast %65 : vector<128xf32> to vector<1x128xf32>
    %67 = vector.broadcast %66 : vector<1x128xf32> to vector<8x128xf32>
    %68 = arith.addf %63, %67 : vector<8x128xf32>
    %69 = vector.shape_cast %58 : vector<8x64x128xf32> to vector<512x128xf32>
    %70 = vector.extract_strided_slice %61 {offsets = [0, 0], sizes = [128, 128], strides = [1, 1]} : vector<256x128xf32> to vector<128x128xf32>
    %cst_30 = arith.constant dense<0.000000e+00> : vector<512x128xf32>
    %71 = tpu.matmul %69, %70, %cst_30 {dimension_numbers = #tpu.dot_dimension_numbers<[1], [0], [0], [1], [0, 0, 1, 1], [], []>} : vector<512x128xf32>, vector<128x128xf32>, vector<512x128xf32> -> vector<512x128xf32>
    %72 = vector.shape_cast %71 : vector<512x128xf32> to vector<8x64x128xf32>
    %73 = vector.shape_cast %68 : vector<8x128xf32> to vector<8x1x128xf32>
    %74 = vector.broadcast %73 : vector<8x1x128xf32> to vector<8x64x128xf32>
    %75 = arith.addf %72, %74 : vector<8x64x128xf32>
    %cst_31 = arith.constant dense<0xFF800000> : vector<8x128xf32>
    %76 = vector.multi_reduction <maximumf>, %75, %cst_31 [1] : vector<8x64x128xf32> to vector<8x128xf32>
    %cst_32 = arith.constant 0.000000e+00 : f32
    %77 = vector.broadcast %cst_32 : f32 to vector<8x128xf32>
    %78 = arith.maximumf %76, %77 : vector<8x128xf32>
    %c0_33 = arith.constant 0 : index
    %c0_34 = arith.constant 0 : index
    %79 = vector.load %arg6[%c0_33, %c0_34] : memref<128x256xf32, #tpu.memory_space<vmem>>, vector<128x256xf32>
    %cst_35 = arith.constant dense<0.000000e+00> : vector<8x256xf32>
    %80 = tpu.matmul %78, %79, %cst_35 {dimension_numbers = #tpu.dot_dimension_numbers<[1], [0], [0], [1], [0, 0, 1, 1], [], []>} : vector<8x128xf32>, vector<128x256xf32>, vector<8x256xf32> -> vector<8x256xf32>
    %c0_36 = arith.constant 0 : index
    %c0_37 = arith.constant 0 : index
    %81 = vector.load %arg7[%c0_36, %c0_37] : memref<1x256xf32, #tpu.memory_space<vmem>>, vector<1x256xf32>
    %82 = vector.broadcast %81 : vector<1x256xf32> to vector<8x256xf32>
    %83 = arith.addf %80, %82 : vector<8x256xf32>
    %c0_38 = arith.constant 0 : index
    %c0_39 = arith.constant 0 : index
    %c0_40 = arith.constant 0 : index
    %84 = vector.load %arg8[%c0_38, %c0_39, %c0_40] : memref<1x8x256xf32, #tpu.memory_space<vmem>>, vector<1x8x256xf32>
    %85 = vector.shape_cast %84 : vector<1x8x256xf32> to vector<8x256xf32>
    %86 = vector.shape_cast %83 : vector<8x256xf32> to vector<1x8x256xf32>
    tpu.vector_store %arg8[%c0_38, %c0_39, %c0_40], %86 {strides = array<i32>} : memref<1x8x256xf32, #tpu.memory_space<vmem>>, vector<1x8x256xf32>,
    return
  }
  func.func @transform_0(%arg0: i32) -> (i32, i32, i32) {
    %c0_i32 = arith.constant 0 : i32
    %c0_i32_0 = arith.constant 0 : i32
    %c0_i32_1 = arith.constant 0 : i32
    return %arg0, %c0_i32, %c0_i32_0 : i32, i32, i32
  }
  func.func @transform_1(%arg0: i32) -> (i32, i32) {
    %c0_i32 = arith.constant 0 : i32
    %c0_i32_0 = arith.constant 0 : i32
    %c0_i32_1 = arith.constant 0 : i32
    return %c0_i32, %c0_i32_0 : i32, i32
  }
  func.func @transform_2(%arg0: i32) -> (i32, i32) {
    %c0_i32 = arith.constant 0 : i32
    %c0_i32_0 = arith.constant 0 : i32
    %c0_i32_1 = arith.constant 0 : i32
    return %c0_i32, %c0_i32_0 : i32, i32
  }
  func.func @transform_3(%arg0: i32) -> (i32, i32, i32) {
    %c0_i32 = arith.constant 0 : i32
    %c0_i32_0 = arith.constant 0 : i32
    %c0_i32_1 = arith.constant 0 : i32
    %c0_i32_2 = arith.constant 0 : i32
    return %c0_i32, %c0_i32_0, %c0_i32_1 : i32, i32, i32
  }
  func.func @transform_4(%arg0: i32) -> (i32, i32) {
    %c0_i32 = arith.constant 0 : i32
    %c0_i32_0 = arith.constant 0 : i32
    %c0_i32_1 = arith.constant 0 : i32
    return %c0_i32, %c0_i32_0 : i32, i32
  }
  func.func @transform_5(%arg0: i32) -> (i32, i32) {
    %c0_i32 = arith.constant 0 : i32
    %c0_i32_0 = arith.constant 0 : i32
    %c0_i32_1 = arith.constant 0 : i32
    return %c0_i32, %c0_i32_0 : i32, i32
  }
  func.func @transform_6(%arg0: i32) -> (i32, i32) {
    %c0_i32 = arith.constant 0 : i32
    %c0_i32_0 = arith.constant 0 : i32
    %c0_i32_1 = arith.constant 0 : i32
    return %c0_i32, %c0_i32_0 : i32, i32
  }
  func.func @transform_7(%arg0: i32) -> (i32, i32, i32) {
    %c0_i32 = arith.constant 0 : i32
    %c0_i32_0 = arith.constant 0 : i32
    %c0_i32_1 = arith.constant 0 : i32
    return %arg0, %c0_i32, %c0_i32_0 : i32, i32, i32
  }
}

</mosaic_0001>

<bundles_post_ra>
// kernel: tpu_custom_call.1
= control target key start
LH: loop header
LB: loop body
LE: loop exit
PB: predicated region body
PF: predicated region fallthrough
CT: control target
= control target key end

     0   :  { %12 = vsyncpa [#allocation3], 0  ;;  %s6693_s0 = inlined_call_operand.vmem [shape: f32[16,64,3], index: 0, kind: input, shape index: {}]   ;;  %s6694_s1 = inlined_call_operand.vmem [shape: f32[3,256], index: 1, kind: input, shape index: {}]   ;;  %s6695_s2 = inlined_call_operand.vmem [shape: f32[1,256], index: 2, kind: input, shape index: {}]   ;;  %s6696_s3 = inlined_call_operand.vmem [shape: f32[4,256,128], index: 3, kind: input, shape index: {}]   ;;  %s6697_s4 = inlined_call_operand.vmem [shape: f32[4,128], index: 4, kind: input, shape index: {}]   ;;  %s6698_s5 = inlined_call_operand.hbm [shape: f32[128,256], index: 5, kind: input, shape index: {}]   ;;  %s6699_s6 = inlined_call_operand.vmem [shape: f32[1,256], index: 6, kind: input, shape index: {}]   ;;  %s6700_s7 = inlined_call_operand.hbm [shape: f32[2,8,256], index: 7, kind: output, shape index: {}]  }
   0x1   :  { %13 = vsyncpa [#allocation4], 0 }
   0x2   :  { %15 = vsyncpa [#allocation4 + $0x1], 0  ;;  %s3974_s24 = smov 0   ;;  %s3976_s25 = smov 0  }
   0x3   :  { %s3978_s26 = smov 0   ;;  %s3980_s27 = smov 0  }
   0x4 LB: > { %s3995_s28 = sadd.s32 4294967295, %s3929_s27   ;;  %s3478_s29 = sadd.s32 4294967294, %s3929_s27   ;;  %s3929_s27 = sphi %s3980_s27, %s7096_s27   ;;  %s3925_s26 = sphi %s3978_s26, %s7095_s26   ;;  %s3921_s25 = sphi %s3976_s25, %s7094_s25   ;;  %s3917_s24 = sphi %s3974_s24, %s7093_s24  }
   0x5   : > { %s3999_s30 = sadd.s32 1, %s3929_s27   ;;  %s180_s8 = sadd.s32 1, %s3925_s26 }
   0x6   : > { %s177_s9 = ssub.s32 %s3929_s27, %s3999_s30  ;;  %p190_p0 = scmp.ne.s32.totalorder %s3925_s26, %s3921_s25 }
   0x7   : > { %p178_p1 = scmp.eq.s32.totalorder %s177_s9, 0  ;;  %p191_p2 = scmp.eq.s32.totalorder %s3995_s28, 1 }
   0x8   : > { %p196_p3 = scmp.ne.s32.totalorder %s3921_s25, %s3917_s24  ;;  %p197_p4 = scmp.eq.s32.totalorder %s3478_s29, 1 }
   0x9   : > { %s4010_s10 = scalar_select %p178_p1, %s3925_s26, %s180_s8  }
   0xa   : > { %p4012_p5 = por %p191_p2, %p190_p0  ;;  %p4016_p6 = por %p197_p4, %p196_p3 }
   0xb   : > { %p3479_p7 = scmp.ge.s32.totalorder %s3929_s27, 1  ;;  %p204_p8 = scmp.lt.s32.totalorder %s3929_s27, 3 }
   0xc   : > { %p3768_p9 = scmp.eq.s32.totalorder %s3995_s28, 0  ;;  %s227_s15 = sshll.u32 %s6698_s5, 4  ;;  %s228_s15 = int_to_ptr.hbm [resolvable:$true] %s227_s15 }
   0xd   : > { %p205_p10 = pnand %p3479_p7, %p204_p8  ;;  %s3931_s16 = smov [#allocation2]  }
   0xe   : > { %s229_s17 = sshll.u32 %s3931_s16, 4  ;;  %s3932_s18 = smov 256   ;;  %s230_s17 = int_to_ptr.vmem [resolvable:$true] %s229_s17 }
   0xf   : > { %p3760_p11 = pneg %p205_p10  ;;  %s3933_s19 = smov 16  }
  0x10   : > { %258 = sbr.rel (%p205_p10) target bundleno = 2466 (0x9a2), region = 48 }
  0x11   : > { %p3761_p12 = pnand %p3768_p9, %p3760_p11 }
  0x13   : > { %3763 = dma.hbm_to_vmem [thread:$0]  (!%p3761_p12), %s228_s15, 4096, %s230_s17, [#allocation3], %s3932_s18, %s3932_s18, %s3933_s19  }
  0x15   : > { %3908 = dma.done.wait (%p3768_p9), [#allocation3], 4096  }
  0x16   : > { %3910 = vsyncadd (%p3768_p9), [#allocation3], 4294963200  ;;  %s3485_s20 = sshll.u32 %s3995_s28, 3  ;;  %v364_v0 = vld [vmem:[%s6694_s1] sm:$0x77]  ;;  %vm568_vm0 = vcmask 1042432  }
  0x17   : > { %p293_p13 = scmp.lt.s32.totalorder %s3485_s20, 15  ;;  %372 = vst [vmem:[#allocation1] ss:$2 sm:$0xff] %v364_v0  ;;  %vm375_vm1 = vcmask 23552   ;;  %v1150_v36 = vld [vmem:[%s6696_s3 + $0xf8] sm:$0xff]  ;;  %v1149_v38 = vld [vmem:[%s6696_s3 + $0xf0] sm:$0xff] }
  0x18   : > { %3738 = vmatpush.msra.mxu3 %v1150_v36  ;;  %v1148_v41 = vld [vmem:[%s6696_s3 + $0xe8] sm:$0xff]  ;;  %v1147_v42 = vld [vmem:[%s6696_s3 + $0xe0] sm:$0xff]  ;;  %v1146_v43 = vld [vmem:[%s6696_s3 + $0xd8] sm:$0xff]  ;;  %vm1780_vm2 = vcmask 1041409   ;;  %vm1782_vm3 = vcmask 1042434   ;;  %vm1784_vm4 = vcmask 1043459  }
  0x19   : > { %s7098_s20 = smov (!%p293_p13, %s3485_s20), 15  ;;  %v1145_v45 = vld [vmem:[%s6696_s3 + $0xd0] sm:$0xff]  ;;  %v1144_v48 = vld [vmem:[%s6696_s3 + $0xc8] sm:$0xff]  ;;  %v1143_v49 = vld [vmem:[%s6696_s3 + $0xc0] sm:$0xff]  ;;  %vm1786_vm5 = vcmask 1044484   ;;  %vm1788_vm6 = vcmask 1045509  }
  0x1a   : > { %s3719_s23 = sshll.u32 %s7098_s20, 6  ;;  %3739 = vmatpush.msra.mxu3 %v1149_v38  ;;  %v1142_v50 = vld [vmem:[%s6696_s3 + $0xb8] sm:$0xff]  ;;  %v1141_v52 = vld [vmem:[%s6696_s3 + $0xb0] sm:$0xff]  ;;  %v1140_v55 = vld [vmem:[%s6696_s3 + $0xa8] sm:$0xff]  ;;  %vm1790_vm7 = vcmask 1046534   ;;  %vm1792_vm8 = vcmask 1047559  }
  0x1b   : > { %s4039_s9 = scalar_lea.vmem %s6693_s0, %s3719_s23  ;;  %v1139_v56 = vld [vmem:[%s6696_s3 + $0xa0] sm:$0xff]  ;;  %v1138_v59 = vld [vmem:[%s6696_s3 + $0x98] sm:$0xff]  ;;  %v1137_v61 = vld [vmem:[%s6696_s3 + $0x90] sm:$0xff]  ;;  %s289_s23 = sand.u32 1, %s3921_s25  }
  0x1c   : > { %v300_v1 = vld [vmem:[%s4039_s9] sm:$0xff]  ;;  %v301_v4 = vld [vmem:[%s4039_s9 + $0x8] sm:$0xff]  ;;  %v302_v5 = vld [vmem:[%s4039_s9 + $0x10] sm:$0xff]  ;;  %3740 = vmatpush.msra.mxu3 %v1148_v41  ;;  %s3484_s8 = sshll.u32 %s289_s23, 4  ;;  %s3720_s13 = sshll.u32 %s3995_s28, 4 }
  0x1d   : > { %v303_v6 = vld [vmem:[%s4039_s9 + $0x18] sm:$0xff]  ;;  %v304_v7 = vld [vmem:[%s4039_s9 + $0x20] sm:$0xff]  ;;  %v309_v8 = vld [vmem:[%s4039_s9 + $0x48] sm:$0xff]  ;;  %s291_s14 = scalar_lea.vmem [#allocation5], %s3484_s8  ;;  %s3402_s17 = scalar_lea.hbm %s6700_s7, %s3720_s13 }
  0x1e   : > { %v373_v2 = vld.sshfl [vmem:[#allocation1] sm:$0xff pattern:$0x75316420]  ;;  %v374_v3 = vld.sshfl [vmem:[#allocation1 + $0x8] sm:$0xff pattern:$0x75316420]  ;;  %3741 = vmatpush.msra.mxu3 %v1147_v42 }
  0x1f   : > { %3488 = vmatpush.msk.msra.mxu0 %vm568_vm0, %v373_v2  ;;  %3721 = vmatpush.msk.msra.mxu1 %vm568_vm0, %v374_v3  ;;  %v305_v9 = vld [vmem:[%s4039_s9 + $0x28] sm:$0xff]  ;;  %v310_v10 = vld [vmem:[%s4039_s9 + $0x50] sm:$0xff]  ;;  %v311_v12 = vld [vmem:[%s4039_s9 + $0x58] sm:$0xff]  ;;  %s3404_s18 = sshll.u32 %s291_s14, 4  ;;  %s3406_s19 = sshll.u32 %s3402_s17, 4  ;;  %s3405_s18 = int_to_ptr.vmem [resolvable:$true] %s3404_s18  ;;  %s3407_s19 = int_to_ptr.hbm [resolvable:$true] %s3406_s19 }
  0x20   : > { %3489 = vmatmul.msk.f32.vlgmr.msra.gmra.mxu0 %vm375_vm1, %v300_v1  ;;  %3563 = vmatmul.msk.f32.vlgmr.msra.gmra.mxu1 %vm375_vm1, %v309_v8  ;;  %v306_v11 = vld [vmem:[%s4039_s9 + $0x30] sm:$0xff]  ;;  %v307_v13 = vld [vmem:[%s4039_s9 + $0x38] sm:$0xff]  ;;  %v312_v14 = vld [vmem:[%s4039_s9 + $0x60] sm:$0xff]  ;;  %s3391_s20 = scalar_lea.sflag [#allocation4], %s289_s23  ;;  %s3877_s21 = sshra.s32 %s3407_s19, 4  ;;  %s3878_s21 = int_to_ptr.hbm [resolvable:$true] %s3877_s21 }
  0x21   : > { %3553 = vmatpush.msk.msrb.mxu0 %vm568_vm0, %v374_v3  ;;  %v308_v15 = vld [vmem:[%s4039_s9 + $0x40] sm:$0xff]  ;;  %v313_v16 = vld [vmem:[%s4039_s9 + $0x68] sm:$0xff]  ;;  %v314_v17 = vld [vmem:[%s4039_s9 + $0x70] sm:$0xff]  ;;  %3742 = vmatpush.msra.mxu3 %v1146_v43  ;;  %s3879_s28 = scalar_lea.hbm %s3878_s21, 16  ;;  %p3884_p3 = scmp.lt.s32.totalorder %s3878_s21, %s6700_s7 }
  0x22   : > { %v315_v18 = vld [vmem:[%s4039_s9 + $0x78] sm:$0xff]  ;;  %v316_v19 = vld [vmem:[%s4039_s9 + $0x80] sm:$0xff]  ;;  %v317_v20 = vld [vmem:[%s4039_s9 + $0x88] sm:$0xff]  ;;  %p3880_p0 = scmp.ne.s32.totalorder %s3878_s21, %s3879_s28 }
  0x23   : > { %v318_v21 = vld [vmem:[%s4039_s9 + $0x90] sm:$0xff]  ;;  %v319_v22 = vld [vmem:[%s4039_s9 + $0x98] sm:$0xff]  ;;  %v320_v24 = vld [vmem:[%s4039_s9 + $0xa0] sm:$0xff]  ;;  %3743 = vmatpush.msra.mxu3 %v1145_v45 }
  0x24   : > { %v321_v26 = vld [vmem:[%s4039_s9 + $0xa8] sm:$0xff]  ;;  %v322_v28 = vld [vmem:[%s4039_s9 + $0xb0] sm:$0xff]  ;;  %v323_v30 = vld [vmem:[%s4039_s9 + $0xb8] sm:$0xff]  ;;  %p3881_p1 = pnand %p3880_p0, %p4012_p5 }
  0x25   : > { %v324_v32 = vld [vmem:[%s4039_s9 + $0xc0] sm:$0xff]  ;;  %v325_v35 = vld [vmem:[%s4039_s9 + $0xc8] sm:$0xff]  ;;  %v4131_v40 = vld [vmem:[%s4039_s9 + $0xd0] sm:$0xff]  ;;  %3744 = vmatpush.msra.mxu3 %v1144_v48 }
  0x26   : > { %v4153_v47 = vld [vmem:[%s4039_s9 + $0xd8] sm:$0xff]  ;;  %v4175_v54 = vld [vmem:[%s4039_s9 + $0xe0] sm:$0xff]  ;;  %v4203_v63 = vld [vmem:[%s4039_s9 + $0xe8] sm:$0xff]  ;;  %p3882_p2 = pneg %p3881_p1 }
  0x27   : > { %3745 = vmatpush.msra.mxu3 %v1143_v49  ;;  %v4189_v57 = vld [vmem:[%s6695_s2] sm:$0x3]  ;;  %v1136_v1 = vld [vmem:[%s6696_s3 + $0x88] sm:$0xff]  ;;  %v1134_v2 = vld [vmem:[%s6696_s3 + $0x78] sm:$0xff] }
  0x28   : > { %3490 = vmatmul.msk.f32.gmra.mxu0 %vm375_vm1, %v301_v4  ;;  %3564 = vmatmul.msk.f32.gmra.mxu1 %vm375_vm1, %v310_v10  ;;  %v4192_v58 = vperm.slane %v4189_v57, 1  ;;  %v1135_v3 = vld [vmem:[%s6696_s3 + $0x80] sm:$0xff]  ;;  %v1122_v38 = vld [vmem:[%s6696_s3 + $0x18] sm:$0xff]  ;;  %v1121_v41 = vld [vmem:[%s6696_s3 + $0x10] sm:$0xff] }
  0x29   : > { %3746 = vmatpush.msra.mxu3 %v1142_v50  ;;  %3722 = vmatpush.msra.mxu2 %v1134_v2  ;;  %v1123_v36 = vld [vmem:[%s6696_s3 + $0x20] sm:$0xff]  ;;  %v1120_v43 = vld [vmem:[%s6696_s3 + $0x8] sm:$0xff] }
  0x2a   : > { %1152 = vmatpush.msra.mxu0 %v1134_v2  ;;  %v1119_v49 = vld [vmem:[%s6696_s3] sm:$0xff] }
  0x2b   : > { %3747 = vmatpush.msra.mxu3 %v1141_v52 }
  0x2d   : > { %3748 = vmatpush.msra.mxu3 %v1140_v55  ;;  %v334_v55 = vld [vmem:[%s4039_s9 + $0x110] sm:$0xff] }
  0x2f   : > { %3749 = vmatpush.msra.mxu3 %v1139_v56 }
  0x30   : > { %3491 = vmatmul.msk.f32.gmra.mxu0 %vm375_vm1, %v302_v5  ;;  %3565 = vmatmul.msk.f32.gmra.mxu1 %vm375_vm1, %v311_v12  ;;  %v1133_v5 = vld [vmem:[%s6696_s3 + $0x70] sm:$0xff] }
  0x31   : > { %3750 = vmatpush.msra.mxu3 %v1138_v59  ;;  %3723 = vmatpush.msra.mxu2 %v1133_v5 }
  0x32   : > { %1153 = vmatpush.msra.mxu0 %v1133_v5 }
  0x33   : > { %3751 = vmatpush.msra.mxu3 %v1137_v61 }
  0x35   : > { %3752 = vmatpush.msra.mxu3 %v1136_v1 }
  0x37   : > { %3753 = vmatpush.msra.mxu3 %v1135_v3 }
  0x38   : > { %3492 = vmatmul.msk.f32.gmra.mxu0 %vm375_vm1, %v303_v6  ;;  %3566 = vmatmul.msk.f32.gmra.mxu1 %vm375_vm1, %v312_v14 }
  0x40   : > { %3493 = vmatmul.msk.f32.gmra.mxu0 %vm375_vm1, %v304_v7  ;;  %3567 = vmatmul.msk.f32.gmra.mxu1 %vm375_vm1, %v313_v16  ;;  %v1132_v7 = vld [vmem:[%s6696_s3 + $0x68] sm:$0xff] }
  0x41   : > { %3724 = vmatpush.msra.mxu2 %v1132_v7  ;;  %1154 = vmatpush.msra.mxu0 %v1132_v7 }
  0x48   : > { %3494 = vmatmul.msk.f32.gmra.mxu0 %vm375_vm1, %v305_v9  ;;  %3568 = vmatmul.msk.f32.gmra.mxu1 %vm375_vm1, %v314_v17  ;;  %v4227_v9 = vld [vmem:[%s4039_s9 + $0xf0] sm:$0xff] }
  0x50   : > { %3495 = vmatmul.msk.f32.gmra.mxu0 %vm375_vm1, %v306_v11  ;;  %3569 = vmatmul.msk.f32.gmra.mxu1 %vm375_vm1, %v315_v18  ;;  %v1131_v11 = vld [vmem:[%s6696_s3 + $0x60] sm:$0xff] }
  0x51   : > { %3725 = vmatpush.msra.mxu2 %v1131_v11  ;;  %1155 = vmatpush.msra.mxu0 %v1131_v11 }
  0x58   : > { %3496 = vmatmul.msk.f32.gmra.mxu0 %vm375_vm1, %v307_v13  ;;  %3570 = vmatmul.msk.f32.gmra.mxu1 %vm375_vm1, %v316_v19 }
  0x60   : > { %3497 = vmatmul.msk.f32.gmra.mxu0 %vm375_vm1, %v308_v15  ;;  %3571 = vmatmul.msk.f32.gmra.mxu1 %vm375_vm1, %v317_v20 }
  0x68   : > { %3498 = vmatmul.msk.f32.gmra.mxu0 %vm375_vm1, %v309_v8  ;;  %3572 = vmatmul.msk.f32.gmra.mxu1 %vm375_vm1, %v318_v21 }
  0x70   : > { %3499 = vmatmul.msk.f32.gmra.mxu0 %vm375_vm1, %v310_v10  ;;  %3573 = vmatmul.msk.f32.gmra.mxu1 %vm375_vm1, %v319_v22 }
  0x78   : > { %3500 = vmatmul.msk.f32.gmra.mxu0 %vm375_vm1, %v311_v12  ;;  %3574 = vmatmul.msk.f32.gmra.mxu1 %vm375_vm1, %v320_v24  ;;  %v1130_v12 = vld [vmem:[%s6696_s3 + $0x58] sm:$0xff] }
  0x79   : > { %3726 = vmatpush.msra.mxu2 %v1130_v12  ;;  %1156 = vmatpush.msra.mxu0 %v1130_v12  ;;  %v337_v12 = vld [vmem:[%s4039_s9 + $0x128] sm:$0xff] }
  0x80   : > { %3501 = vmatmul.msk.f32.gmra.mxu0 %vm375_vm1, %v312_v14  ;;  %3575 = vmatmul.msk.f32.gmra.mxu1 %vm375_vm1, %v321_v26  ;;  %v1129_v14 = vld [vmem:[%s6696_s3 + $0x50] sm:$0xff] }
  0x81   : > { %3727 = vmatpush.msra.mxu2 %v1129_v14  ;;  %1157 = vmatpush.msra.mxu0 %v1129_v14 }
  0x88   : > { %3502 = vmatmul.msk.f32.gmra.mxu0 %vm375_vm1, %v313_v16  ;;  %3576 = vmatmul.msk.f32.gmra.mxu1 %vm375_vm1, %v322_v28  ;;  %v1128_v16 = vld [vmem:[%s6696_s3 + $0x48] sm:$0xff] }
  0x89   : > { %3728 = vmatpush.msra.mxu2 %v1128_v16  ;;  %1158 = vmatpush.msra.mxu0 %v1128_v16 }
  0x90   : > { %3503 = vmatmul.msk.f32.gmra.mxu0 %vm375_vm1, %v314_v17  ;;  %3577 = vmatmul.msk.f32.gmra.mxu1 %vm375_vm1, %v323_v30 }
  0x98   : > { %3504 = vmatmul.msk.f32.gmra.mxu0 %vm375_vm1, %v315_v18  ;;  %3578 = vmatmul.msk.f32.gmra.mxu1 %vm375_vm1, %v324_v32  ;;  %v331_v18 = vld [vmem:[%s4039_s9 + $0xf8] sm:$0xff] }
  0x9d   : > { %v4088_v23 = vpop.f32.mrf.mxu0  ;;  %v4115_v34 = vpop.f32.mrf.mxu1 }
  0xa0   : > { %3505 = vmatmul.msk.f32.gmra.mxu0 %vm375_vm1, %v316_v19  ;;  %3579 = vmatmul.msk.f32.gmra.mxu1 %vm375_vm1, %v325_v35 }
  0xa5   : > { %v4093_v25 = vpop.f32.mrf.mxu0  ;;  %v4128_v39 = vpop.f32.mrf.mxu1 }
  0xa8   : > { %3506 = vmatmul.msk.f32.gmra.mxu0 %vm375_vm1, %v317_v20  ;;  %3580 = vmatmul.msk.f32.gmra.mxu1 %vm375_vm1, %v4131_v40  ;;  %v1127_v20 = vld [vmem:[%s6696_s3 + $0x40] sm:$0xff] }
  0xa9   : > { %3729 = vmatpush.msra.mxu2 %v1127_v20  ;;  %1159 = vmatpush.msra.mxu0 %v1127_v20 }
  0xad   : > { %v4098_v27 = vpop.f32.mrf.mxu0  ;;  %v4150_v46 = vpop.f32.mrf.mxu1 }
  0xb0   : > { %3507 = vmatmul.msk.f32.gmra.mxu0 %vm375_vm1, %v318_v21  ;;  %3581 = vmatmul.msk.f32.gmra.mxu1 %vm375_vm1, %v4153_v47  ;;  %v1126_v21 = vld [vmem:[%s6696_s3 + $0x38] sm:$0xff] }
  0xb1   : > { %3730 = vmatpush.msra.mxu2 %v1126_v21  ;;  %1160 = vmatpush.msra.mxu0 %v1126_v21 }
  0xb5   : > { %v4103_v29 = vpop.f32.mrf.mxu0  ;;  %v4172_v53 = vpop.f32.mrf.mxu1 }
  0xb8   : > { %3508 = vmatmul.msk.f32.gmra.mxu0 %vm375_vm1, %v319_v22  ;;  %3582 = vmatmul.msk.f32.gmra.mxu1 %vm375_vm1, %v4175_v54 }
  0xbd   : > { %v4108_v31 = vpop.f32.mrf.mxu0  ;;  %v838_v62 = vpop.f32.mrf.mxu1 }
  0xbe   : > { %v839_v0 = vadd.f32 %v838_v62, %v4192_v58 }
  0xc0   : > { %3509 = vmatmul.msk.f32.gmra.mxu0 %vm375_vm1, %v320_v24  ;;  %3583 = vmatmul.msk.f32.gmra.mxu1 %vm375_vm1, %v4203_v63  ;;  %v1018_v4 = vmax.f32 %v839_v0, 0.0  ;;  %v1125_v24 = vld [vmem:[%s6696_s3 + $0x30] sm:$0xff] }
  0xc1   : > { %3731 = vmatpush.msra.mxu2 %v1125_v24  ;;  %1161 = vmatpush.msra.mxu0 %v1125_v24 }
  0xc2   : > { %1416 = vmatmul.f32.vlgmr.msra.gmra.mxu3 %v1018_v4  ;;  %v336_v4 = vld [vmem:[%s4039_s9 + $0x120] sm:$0xff] }
  0xc5   : > { %v4113_v33 = vpop.f32.mrf.mxu0  ;;  %v841_v8 = vpop.f32.mrf.mxu1 }
  0xc6   : > { %v842_v10 = vadd.f32 %v841_v8, %v4192_v58  ;;  %v4314_v8 = vperm.slane %v4189_v57, 0 }
  0xc8   : > { %3510 = vmatmul.msk.f32.gmra.mxu0 %vm375_vm1, %v321_v26  ;;  %3584 = vmatmul.msk.f32.gmra.mxu1 %vm375_vm1, %v4227_v9  ;;  %v1020_v13 = vmax.f32 %v842_v10, 0.0 }
  0xca   : > { %1419 = vmatmul.f32.gmra.mxu3 %v1020_v13 }
  0xcd   : > { %v4123_v37 = vpop.f32.mrf.mxu0  ;;  %v844_v17 = vpop.f32.mrf.mxu1 }
  0xce   : > { %v845_v19 = vadd.f32 %v844_v17, %v4192_v58 }
  0xd0   : > { %3511 = vmatmul.msk.f32.gmra.mxu0 %vm375_vm1, %v322_v28  ;;  %3585 = vmatmul.msk.f32.gmra.mxu1 %vm375_vm1, %v331_v18  ;;  %v1022_v22 = vmax.f32 %v845_v19, 0.0  ;;  %v1124_v28 = vld [vmem:[%s6696_s3 + $0x28] sm:$0xff]  ;;  %v338_v19 = vld [vmem:[%s4039_s9 + $0x130] sm:$0xff] }
  0xd1   : > { %3732 = vmatpush.msra.mxu2 %v1124_v28  ;;  %1162 = vmatpush.msra.mxu0 %v1124_v28 }
  0xd2   : > { %1422 = vmatmul.f32.gmra.mxu3 %v1022_v22 }
  0xd3   : > { %3733 = vmatpush.msra.mxu2 %v1123_v36  ;;  %1163 = vmatpush.msra.mxu0 %v1123_v36 }
  0xd5   : > { %v4145_v44 = vpop.f32.mrf.mxu0  ;;  %3734 = vmatpush.msra.mxu2 %v1122_v38  ;;  %1164 = vmatpush.msra.mxu0 %v1122_v38 }
  0xd7   : > { %3735 = vmatpush.msra.mxu2 %v1121_v41  ;;  %1165 = vmatpush.msra.mxu0 %v1121_v41 }
  0xd8   : > { %3512 = vmatmul.msk.f32.gmra.mxu0 %vm375_vm1, %v323_v30  ;;  %v847_v30 = vpop.f32.mrf.mxu1 }
  0xd9   : > { %3736 = vmatpush.msra.mxu2 %v1120_v43  ;;  %1166 = vmatpush.msra.mxu0 %v1120_v43 }
  0xdb   : > { %3737 = vmatpush.msra.mxu2 %v1119_v49  ;;  %1167 = vmatpush.msra.mxu0 %v1119_v49 }
  0xdd   : > { %v4167_v51 = vpop.f32.mrf.mxu0 }
  0xe0   : > { %3513 = vmatmul.msk.f32.gmra.mxu0 %vm375_vm1, %v324_v32  ;;  %v332_v32 = vld [vmem:[%s4039_s9 + $0x100] sm:$0xff]  ;;  %v850_v45 = vpop.f32.mrf.mxu1 }
  0xe1   : > { %3586 = vmatmul.msk.f32.gmra.mxu1 %vm375_vm1, %v332_v32  ;;  %v851_v48 = vadd.f32 %v850_v45, %v4192_v58  ;;  %v340_v45 = vld [vmem:[%s4039_s9 + $0x140] sm:$0xff] }
  0xe3   : > { %v1026_v50 = vmax.f32 %v851_v48, 0.0 }
  0xe5   : > { %v4197_v60 = vpop.f32.mrf.mxu0 }
  0xe8   : > { %3514 = vmatmul.msk.f32.gmra.mxu0 %vm375_vm1, %v325_v35  ;;  %v848_v35 = vadd.f32 %v847_v30, %v4192_v58 }
  0xed   : > { %v4221_v6 = vpop.f32.mrf.mxu0 }
  0xf0   : > { %3515 = vmatmul.msk.f32.gmra.mxu0 %vm375_vm1, %v4131_v40  ;;  %v1024_v40 = vmax.f32 %v848_v35, 0.0 }
  0xf2   : > { %1425 = vmatmul.f32.gmra.mxu3 %v1024_v40 }
  0xf5   : > { %v4243_v15 = vpop.f32.mrf.mxu0 }
  0xf8   : > { %3516 = vmatmul.msk.f32.gmra.mxu0 %vm375_vm1, %v4153_v47  ;;  %v333_v47 = vld [vmem:[%s4039_s9 + $0x108] sm:$0xff] }
  0xf9   : > { %3587 = vmatmul.msk.f32.gmra.mxu1 %vm375_vm1, %v333_v47 }
  0xfa   : > { %1428 = vmatmul.f32.gmra.mxu3 %v1026_v50 }
  0xfd   : > { %v4262_v26 = vpop.f32.mrf.mxu0 }
 0x100   : > { %3517 = vmatmul.msk.f32.gmra.mxu0 %vm375_vm1, %v4175_v54  ;;  %v853_v54 = vpop.f32.mrf.mxu1 }
 0x101   : > { %v854_v56 = vadd.f32 %v853_v54, %v4192_v58  ;;  %3588 = vmatmul.msk.f32.gmra.mxu1 %vm375_vm1, %v334_v55 }
 0x103   : > { %v1028_v59 = vmax.f32 %v854_v56, 0.0  ;;  %v341_v56 = vld [vmem:[%s4039_s9 + $0x148] sm:$0xff] }
 0x105   : > { %v4281_v42 = vpop.f32.mrf.mxu0  ;;  %1431 = vmatmul.f32.gmra.mxu3 %v1028_v59 }
 0x108   : > { %3518 = vmatmul.msk.f32.gmra.mxu0 %vm375_vm1, %v4203_v63  ;;  %v856_v62 = vpop.f32.mrf.mxu1  ;;  %v335_v63 = vld [vmem:[%s4039_s9 + $0x118] sm:$0xff] }
 0x109   : > { %v857_v0 = vadd.f32 %v856_v62, %v4192_v58  ;;  %3589 = vmatmul.msk.f32.gmra.mxu1 %vm375_vm1, %v335_v63 }
 0x10b   : > { %v1030_v1 = vmax.f32 %v857_v0, 0.0 }
 0x10d   : > { %v4294_v52 = vpop.f32.mrf.mxu0  ;;  %1434 = vmatmul.f32.gmra.mxu3 %v1030_v1 }
 0x110   : > { %3519 = vmatmul.msk.f32.gmra.mxu0 %vm375_vm1, %v4227_v9  ;;  %v859_v3 = vpop.f32.mrf.mxu1 }
 0x111   : > { %v860_v5 = vadd.f32 %v859_v3, %v4192_v58  ;;  %3590 = vmatmul.msk.f32.gmra.mxu1 %vm375_vm1, %v336_v4 }
 0x113   : > { %v1032_v7 = vmax.f32 %v860_v5, 0.0 }
 0x115   : > { %v4301_v61 = vpop.f32.mrf.mxu0  ;;  %1437 = vmatmul.f32.gmra.mxu3 %v1032_v7 }
 0x118   : > { %3520 = vmatmul.msk.f32.gmra.mxu0 %vm375_vm1, %v331_v18  ;;  %v862_v11 = vpop.f32.mrf.mxu1 }
 0x119   : > { %v863_v14 = vadd.f32 %v862_v11, %v4192_v58  ;;  %3591 = vmatmul.msk.f32.gmra.mxu1 %vm375_vm1, %v337_v12 }
 0x11b   : > { %v1034_v16 = vmax.f32 %v863_v14, 0.0 }
 0x11d   : > { %v4307_v2 = vpop.f32.mrf.mxu0  ;;  %1440 = vmatmul.f32.gmra.mxu3 %v1034_v16 }
 0x120   : > { %3521 = vmatmul.msk.f32.gmra.mxu0 %vm375_vm1, %v332_v32  ;;  %v865_v18 = vpop.f32.mrf.mxu1  ;;  %v339_v32 = vld [vmem:[%s4039_s9 + $0x138] sm:$0xff] }
 0x121   : > { %v866_v21 = vadd.f32 %v865_v18, %v4192_v58  ;;  %3592 = vmatmul.msk.f32.gmra.mxu1 %vm375_vm1, %v338_v19 }
 0x123   : > { %v1036_v22 = vmax.f32 %v866_v21, 0.0 }
 0x125   : > { %v641_v9 = vpop.f32.mrf.mxu0  ;;  %1443 = vmatmul.f32.gmra.mxu3 %v1036_v22 }
 0x126   : > { %v642_v10 = vadd.f32 %v641_v9, %v4314_v8 }
 0x128   : > { %3522 = vmatmul.msk.f32.gmra.mxu0 %vm375_vm1, %v333_v47  ;;  %v1025_v13 = vmax.f32 %v642_v10, 0.0  ;;  %v868_v30 = vpop.f32.mrf.mxu1 }
 0x129   : > { %v869_v36 = vadd.f32 %v868_v30, %v4192_v58  ;;  %3593 = vmatmul.msk.f32.gmra.mxu1 %vm375_vm1, %v339_v32 }
 0x12a   : > { %1219 = vmatmul.f32.vlgmr.msra.gmra.mxu2 %v1025_v13  ;;  %v343_v13 = vld [vmem:[%s4039_s9 + $0x158] sm:$0xff] }
 0x12b   : > { %v1038_v38 = vmax.f32 %v869_v36, 0.0 }
 0x12d   : > { %v644_v57 = vpop.f32.mrf.mxu0  ;;  %1446 = vmatmul.f32.gmra.mxu3 %v1038_v38 }
 0x12e   : > { %v645_v17 = vadd.f32 %v644_v57, %v4314_v8 }
 0x130   : > { %3523 = vmatmul.msk.f32.gmra.mxu0 %vm375_vm1, %v334_v55  ;;  %v1027_v20 = vmax.f32 %v645_v17, 0.0  ;;  %v871_v43 = vpop.f32.mrf.mxu1 }
 0x131   : > { %v872_v48 = vadd.f32 %v871_v43, %v4192_v58  ;;  %3594 = vmatmul.msk.f32.gmra.mxu1 %vm375_vm1, %v340_v45 }
 0x132   : > { %1222 = vmatmul.f32.gmra.mxu2 %v1027_v20  ;;  %v344_v20 = vld [vmem:[%s4039_s9 + $0x160] sm:$0xff] }
 0x133   : > { %v1040_v49 = vmax.f32 %v872_v48, 0.0  ;;  %v346_v48 = vld [vmem:[%s4039_s9 + $0x170] sm:$0xff] }
 0x135   : > { %v647_v24 = vpop.f32.mrf.mxu0  ;;  %1449 = vmatmul.f32.gmra.mxu3 %v1040_v49 }
 0x136   : > { %v648_v28 = vadd.f32 %v647_v24, %v4314_v8 }
 0x138   : > { %3524 = vmatmul.msk.f32.gmra.mxu0 %vm375_vm1, %v335_v63  ;;  %v1029_v35 = vmax.f32 %v648_v28, 0.0  ;;  %v874_v55 = vpop.f32.mrf.mxu1 }
 0x139   : > { %v875_v62 = vadd.f32 %v874_v55, %v4192_v58  ;;  %3595 = vmatmul.msk.f32.gmra.mxu1 %vm375_vm1, %v341_v56 }
 0x13a   : > { %1225 = vmatmul.f32.gmra.mxu2 %v1029_v35  ;;  %v345_v35 = vld [vmem:[%s4039_s9 + $0x168] sm:$0xff] }
 0x13b   : > { %v1042_v63 = vmax.f32 %v875_v62, 0.0 }
 0x13d   : > { %v650_v40 = vpop.f32.mrf.mxu0  ;;  %1452 = vmatmul.f32.gmra.mxu3 %v1042_v63  ;;  %v347_v63 = vld [vmem:[%s4039_s9 + $0x178] sm:$0xff] }
 0x13e   : > { %v651_v41 = vadd.f32 %v650_v40, %v4314_v8 }
 0x140   : > { %3525 = vmatmul.msk.f32.gmra.mxu0 %vm375_vm1, %v336_v4  ;;  %v1031_v47 = vmax.f32 %v651_v41, 0.0  ;;  %v877_v3 = vpop.f32.mrf.mxu1  ;;  %v342_v4 = vld [vmem:[%s4039_s9 + $0x150] sm:$0xff] }
 0x141   : > { %v878_v7 = vadd.f32 %v877_v3, %v4192_v58  ;;  %3596 = vmatmul.msk.f32.gmra.mxu1 %vm375_vm1, %v342_v4 }
 0x142   : > { %1228 = vmatmul.f32.gmra.mxu2 %v1031_v47 }
 0x143   : > { %v1044_v9 = vmax.f32 %v878_v7, 0.0 }
 0x145   : > { %v653_v50 = vpop.f32.mrf.mxu0  ;;  %1455 = vmatmul.f32.gmra.mxu3 %v1044_v9  ;;  %v4362_v47 = vpop.f32.mrf.mxu3 }
 0x146   : > { %v654_v54 = vadd.f32 %v653_v50, %v4314_v8  ;;  %6831 = vst [vmem:[#allocation8_spill] sm:$0xff] %v4362_v47 }
 0x148   : > { %3526 = vmatmul.msk.f32.gmra.mxu0 %vm375_vm1, %v337_v12  ;;  %v1033_v59 = vmax.f32 %v654_v54, 0.0  ;;  %v880_v12 = vpop.f32.mrf.mxu1 }
 0x149   : > { %v881_v16 = vadd.f32 %v880_v12, %v4192_v58  ;;  %3597 = vmatmul.msk.f32.gmra.mxu1 %vm375_vm1, %v343_v13 }
 0x14a   : > { %1231 = vmatmul.f32.gmra.mxu2 %v1033_v59 }
 0x14b   : > { %v1046_v57 = vmax.f32 %v881_v16, 0.0 }
 0x14d   : > { %v656_v0 = vpop.f32.mrf.mxu0  ;;  %1458 = vmatmul.f32.gmra.mxu3 %v1046_v57  ;;  %v4369_v62 = vpop.f32.mrf.mxu3 }
 0x14e   : > { %v657_v1 = vadd.f32 %v656_v0, %v4314_v8  ;;  %6832 = vst [vmem:[#allocation9_spill] sm:$0xff] %v4369_v62 }
 0x150   : > { %3527 = vmatmul.msk.f32.gmra.mxu0 %vm375_vm1, %v338_v19  ;;  %v1035_v5 = vmax.f32 %v657_v1, 0.0  ;;  %v883_v19 = vpop.f32.mrf.mxu1 }
 0x151   : > { %v884_v22 = vadd.f32 %v883_v19, %v4192_v58  ;;  %3598 = vmatmul.msk.f32.gmra.mxu1 %vm375_vm1, %v344_v20 }
 0x152   : > { %1234 = vmatmul.f32.gmra.mxu2 %v1035_v5 }
 0x153   : > { %v1048_v24 = vmax.f32 %v884_v22, 0.0 }
 0x155   : > { %v659_v10 = vpop.f32.mrf.mxu0  ;;  %1461 = vmatmul.f32.gmra.mxu3 %v1048_v24  ;;  %v4376_v9 = vpop.f32.mrf.mxu3 }
 0x156   : > { %v660_v11 = vadd.f32 %v659_v10, %v4314_v8  ;;  %6833 = vst [vmem:[#allocation10_spill] sm:$0xff] %v4376_v9  ;;  %v348_v10 = vld [vmem:[%s4039_s9 + $0x180] sm:$0xff] }
 0x158   : > { %3528 = vmatmul.msk.f32.gmra.mxu0 %vm375_vm1, %v339_v32  ;;  %v1037_v14 = vmax.f32 %v660_v11, 0.0  ;;  %v886_v32 = vpop.f32.mrf.mxu1 }
 0x159   : > { %v887_v38 = vadd.f32 %v886_v32, %v4192_v58  ;;  %3599 = vmatmul.msk.f32.gmra.mxu1 %vm375_vm1, %v345_v35  ;;  %v350_v32 = vld [vmem:[%s4039_s9 + $0x190] sm:$0xff] }
 0x15a   : > { %1237 = vmatmul.f32.gmra.mxu2 %v1037_v14 }
 0x15b   : > { %v1050_v40 = vmax.f32 %v887_v38, 0.0 }
 0x15d   : > { %v662_v17 = vpop.f32.mrf.mxu0  ;;  %1464 = vmatmul.f32.gmra.mxu3 %v1050_v40 }
 0x15e   : > { %v663_v18 = vadd.f32 %v662_v17, %v4314_v8 }
 0x160   : > { %3529 = vmatmul.msk.f32.gmra.mxu0 %vm375_vm1, %v340_v45  ;;  %v1039_v21 = vmax.f32 %v663_v18, 0.0  ;;  %v889_v45 = vpop.f32.mrf.mxu1  ;;  %v349_v18 = vld [vmem:[%s4039_s9 + $0x188] sm:$0xff] }
 0x161   : > { %v890_v50 = vadd.f32 %v889_v45, %v4192_v58  ;;  %3600 = vmatmul.msk.f32.gmra.mxu1 %vm375_vm1, %v346_v48 }
 0x162   : > { %1240 = vmatmul.f32.gmra.mxu2 %v1039_v21 }
 0x163   : > { %v1052_v54 = vmax.f32 %v890_v50, 0.0 }
 0x165   : > { %v665_v28 = vpop.f32.mrf.mxu0  ;;  %1467 = vmatmul.f32.gmra.mxu3 %v1052_v54  ;;  %v3633_v54 = vld [vmem:[%s6696_s3 + $0x178] sm:$0xff] }
 0x166   : > { %v666_v30 = vadd.f32 %v665_v28, %v4314_v8  ;;  %1815 = vmatpush.msrb.mxu1 %v3633_v54 }
 0x168   : > { %3530 = vmatmul.msk.f32.gmra.mxu0 %vm375_vm1, %v341_v56  ;;  %v1041_v36 = vmax.f32 %v666_v30, 0.0  ;;  %v892_v59 = vpop.f32.mrf.mxu1 }
 0x169   : > { %v893_v1 = vadd.f32 %v892_v59, %v4192_v58  ;;  %3601 = vmatmul.msk.f32.gmra.mxu1 %vm375_vm1, %v347_v63 }
 0x16a   : > { %1243 = vmatmul.f32.gmra.mxu2 %v1041_v36 }
 0x16b   : > { %v1054_v3 = vmax.f32 %v893_v1, 0.0 }
 0x16d   : > { %v668_v41 = vpop.f32.mrf.mxu0  ;;  %1470 = vmatmul.f32.gmra.mxu3 %v1054_v3 }
 0x16e   : > { %v669_v43 = vadd.f32 %v668_v41, %v4314_v8 }
 0x170   : > { %3531 = vmatmul.msk.f32.gmra.mxu0 %vm375_vm1, %v342_v4  ;;  %v1043_v49 = vmax.f32 %v669_v43, 0.0  ;;  %v895_v7 = vpop.f32.mrf.mxu1 }
 0x171   : > { %v896_v12 = vadd.f32 %v895_v7, %v4192_v58  ;;  %3602 = vmatmul.msk.f32.gmra.mxu1 %vm375_vm1, %v348_v10 }
 0x172   : > { %1246 = vmatmul.f32.gmra.mxu2 %v1043_v49  ;;  %v351_v49 = vld [vmem:[%s4039_s9 + $0x198] sm:$0xff] }
 0x175   : > { %v671_v55 = vpop.f32.mrf.mxu0  ;;  %v4383_v17 = vpop.f32.mrf.mxu3 }
 0x176   : > { %v672_v56 = vadd.f32 %v671_v55, %v4314_v8 }
 0x178   : > { %3532 = vmatmul.msk.f32.gmra.mxu0 %vm375_vm1, %v343_v13  ;;  %v1045_v0 = vmax.f32 %v672_v56, 0.0  ;;  %v1056_v13 = vmax.f32 %v896_v12, 0.0  ;;  %v898_v57 = vpop.f32.mrf.mxu1  ;;  %v299_v12 = vld [vmem:[%s6697_s4] sm:$0xf] }
 0x179   : > { %3603 = vmatmul.msk.f32.gmra.mxu1 %vm375_vm1, %v349_v18 }
 0x17a   : > { %1249 = vmatmul.f32.gmra.mxu2 %v1045_v0  ;;  %1473 = vmatmul.f32.gmra.mxu3 %v1056_v13 }
 0x17d   : > { %v674_v4 = vpop.f32.mrf.mxu0  ;;  %v1429_v30 = vpop.f32.mrf.mxu3 }
 0x17e   : > { %v675_v5 = vadd.f32 %v674_v4, %v4314_v8 }
 0x180   : > { %3533 = vmatmul.msk.f32.gmra.mxu0 %vm375_vm1, %v344_v20  ;;  %v1047_v11 = vmax.f32 %v675_v5, 0.0  ;;  %v899_v20 = vadd.f32 %v898_v57, %v4192_v58  ;;  %v901_v28 = vpop.f32.mrf.mxu1 }
 0x181   : > { %3604 = vmatmul.msk.f32.gmra.mxu1 %vm375_vm1, %v350_v32 }
 0x182   : > { %1252 = vmatmul.f32.gmra.mxu2 %v1047_v11  ;;  %v1058_v21 = vmax.f32 %v899_v20, 0.0 }
 0x184   : > { %1476 = vmatmul.f32.gmra.mxu3 %v1058_v21 }
 0x185   : > { %v677_v14 = vpop.f32.mrf.mxu0 }
 0x186   : > { %v678_v16 = vadd.f32 %v677_v14, %v4314_v8 }
 0x188   : > { %3534 = vmatmul.msk.f32.gmra.mxu0 %vm375_vm1, %v345_v35  ;;  %v1049_v19 = vmax.f32 %v678_v16, 0.0  ;;  %v902_v35 = vadd.f32 %v901_v28, %v4192_v58  ;;  %v904_v43 = vpop.f32.mrf.mxu1  ;;  %v1432_v45 = vpop.f32.mrf.mxu3 }
 0x189   : > { %3605 = vmatmul.msk.f32.gmra.mxu1 %vm375_vm1, %v351_v49 }
 0x18a   : > { %1255 = vmatmul.f32.gmra.mxu2 %v1049_v19  ;;  %v1060_v38 = vmax.f32 %v902_v35, 0.0  ;;  %v4420_v19 = vperm.slane %v299_v12, 0 }
 0x18c   : > { %1479 = vmatmul.f32.gmra.mxu3 %v1060_v38 }
 0x18d   : > { %v680_v22 = vpop.f32.mrf.mxu0 }
 0x18e   : > { %v681_v24 = vadd.f32 %v680_v22, %v4314_v8 }
 0x190   : > { %3535 = vmatmul.msk.f32.gmra.mxu0 %vm375_vm1, %v346_v48  ;;  %v1051_v36 = vmax.f32 %v681_v24, 0.0  ;;  %v905_v48 = vadd.f32 %v904_v43, %v4192_v58  ;;  %v907_v0 = vpop.f32.mrf.mxu1  ;;  %v1435_v1 = vpop.f32.mrf.mxu3 }
 0x191   : > { %v908_v4 = vadd.f32 %v907_v0, %v4192_v58 }
 0x192   : > { %1258 = vmatmul.f32.gmra.mxu2 %v1051_v36  ;;  %v1062_v55 = vmax.f32 %v905_v48, 0.0 }
 0x193   : > { %v1064_v5 = vmax.f32 %v908_v4, 0.0 }
 0x194   : > { %1482 = vmatmul.f32.gmra.mxu3 %v1062_v55 }
 0x195   : > { %v683_v40 = vpop.f32.mrf.mxu0 }
 0x196   : > { %v684_v41 = vadd.f32 %v683_v40, %v4314_v8 }
 0x198   : > { %3536 = vmatmul.msk.f32.gmra.mxu0 %vm375_vm1, %v347_v63  ;;  %v1053_v50 = vmax.f32 %v684_v41, 0.0  ;;  %v352_v63 = vld [vmem:[%s4039_s9 + $0x1a0] sm:$0xff]  ;;  %v910_v13 = vpop.f32.mrf.mxu1  ;;  %v4411_v14 = vpop.f32.mrf.mxu3 }
 0x199   : > { %3606 = vmatmul.msk.f32.gmra.mxu1 %vm375_vm1, %v352_v63  ;;  %v911_v57 = vadd.f32 %v910_v13, %v4192_v58 }
 0x19a   : > { %1261 = vmatmul.f32.gmra.mxu2 %v1053_v50 }
 0x19b   : > { %v1066_v20 = vmax.f32 %v911_v57, 0.0 }
 0x19c   : > { %1485 = vmatmul.f32.gmra.mxu3 %v1064_v5 }
 0x19d   : > { %v686_v56 = vpop.f32.mrf.mxu0 }
 0x19e   : > { %v687_v59 = vadd.f32 %v686_v56, %v4314_v8 }
 0x1a0   : > { %3537 = vmatmul.msk.f32.gmra.mxu0 %vm375_vm1, %v348_v10  ;;  %v1055_v3 = vmax.f32 %v687_v59, 0.0  ;;  %v4414_v10 = vld [vmem:[%s4039_s9 + $0x1a8] sm:$0xff]  ;;  %v913_v36 = vpop.f32.mrf.mxu1  ;;  %v4424_v35 = vpop.f32.mrf.mxu3  ;;  %v4443_v59 = vld [vmem:[%s4039_s9 + $0x1b8] sm:$0xff] }
 0x1a1   : > { %3607 = vmatmul.msk.f32.gmra.mxu1 %vm375_vm1, %v4414_v10  ;;  %v914_v41 = vadd.f32 %v913_v36, %v4192_v58 }
 0x1a2   : > { %1264 = vmatmul.f32.gmra.mxu2 %v1055_v3 }
 0x1a3   : > { %v1068_v43 = vmax.f32 %v914_v41, 0.0 }
 0x1a4   : > { %1488 = vmatmul.f32.gmra.mxu3 %v1066_v20 }
 0x1a5   : > { %v689_v7 = vpop.f32.mrf.mxu0 }
 0x1a6   : > { %v690_v11 = vadd.f32 %v689_v7, %v4314_v8 }
 0x1a8   : > { %3538 = vmatmul.msk.f32.gmra.mxu0 %vm375_vm1, %v349_v18  ;;  %v1057_v16 = vmax.f32 %v690_v11, 0.0  ;;  %v4427_v18 = vld [vmem:[%s4039_s9 + $0x1b0] sm:$0xff]  ;;  %v4440_v56 = vpop.f32.mrf.mxu3 }
 0x1a9   : > { %3608 = vmatmul.msk.f32.gmra.mxu1 %vm375_vm1, %v4427_v18 }
 0x1aa   : > { %1267 = vmatmul.f32.gmra.mxu2 %v1057_v16 }
 0x1ac   : > { %1491 = vmatmul.f32.gmra.mxu3 %v1068_v43 }
 0x1ad   : > { %v692_v21 = vpop.f32.mrf.mxu0  ;;  %v1220_v22 = vpop.f32.mrf.mxu2 }
 0x1ae   : > { %v693_v24 = vadd.f32 %v692_v21, %v4314_v8  ;;  %v1221_v28 = vadd.f32 %v1220_v22, %v4420_v19 }
 0x1b0   : > { %v4429_v38 = vadd.f32 %v1429_v30, %v1221_v28  ;;  %3539 = vmatmul.msk.f32.gmra.mxu0 %vm375_vm1, %v350_v32  ;;  %v1059_v40 = vmax.f32 %v693_v24, 0.0  ;;  %v3632_v30 = vld [vmem:[%s6696_s3 + $0x170] sm:$0xff]  ;;  %v916_v32 = vpop.f32.mrf.mxu1 }
 0x1b1   : > { %1816 = vmatpush.msrb.mxu1 %v3632_v30  ;;  %v917_v4 = vadd.f32 %v916_v32, %v4192_v58 }
 0x1b2   : > { %6834 = vst [vmem:[#allocation11_spill] sm:$0xff] %v4429_v38  ;;  %1270 = vmatmul.f32.gmra.mxu2 %v1059_v40  ;;  %3609 = vmatmul.msk.f32.gmra.mxu1 %vm375_vm1, %v4443_v59 }
 0x1b3   : > { %v1070_v5 = vmax.f32 %v917_v4, 0.0  ;;  %v4482_v4 = vld [vmem:[%s4039_s9 + $0x1d0] sm:$0xff] }
 0x1b5   : > { %v695_v50 = vpop.f32.mrf.mxu0  ;;  %v1223_v48 = vpop.f32.mrf.mxu2  ;;  %1494 = vmatmul.f32.gmra.mxu3 %v1070_v5 }
 0x1b6   : > { %v696_v54 = vadd.f32 %v695_v50, %v4314_v8  ;;  %v1224_v55 = vadd.f32 %v1223_v48, %v4420_v19 }
 0x1b8   : > { %v4445_v0 = vadd.f32 %v1432_v45, %v1224_v55  ;;  %3540 = vmatmul.msk.f32.gmra.mxu0 %vm375_vm1, %v351_v49  ;;  %v1061_v3 = vmax.f32 %v696_v54, 0.0  ;;  %v919_v16 = vpop.f32.mrf.mxu1  ;;  %v4453_v45 = vpop.f32.mrf.mxu3  ;;  %v4456_v49 = vld [vmem:[%s4039_s9 + $0x1c0] sm:$0xff] }
 0x1b9   : > { %v920_v21 = vadd.f32 %v919_v16, %v4192_v58 }
 0x1ba   : > { %6835 = vst [vmem:[#allocation12_spill] sm:$0xff] %v4445_v0  ;;  %1273 = vmatmul.f32.gmra.mxu2 %v1061_v3  ;;  %3610 = vmatmul.msk.f32.gmra.mxu1 %vm375_vm1, %v4456_v49 }
 0x1bb   : > { %v1072_v22 = vmax.f32 %v920_v21, 0.0 }
 0x1bd   : > { %v698_v7 = vpop.f32.mrf.mxu0  ;;  %v1226_v11 = vpop.f32.mrf.mxu2  ;;  %1497 = vmatmul.f32.gmra.mxu3 %v1072_v22  ;;  %v4498_v22 = vld [vmem:[%s4039_s9 + $0x1d8] sm:$0xff] }
 0x1be   : > { %v699_v12 = vadd.f32 %v698_v7, %v4314_v8  ;;  %v1227_v13 = vadd.f32 %v1226_v11, %v4420_v19 }
 0x1c0   : > { %v4458_v57 = vadd.f32 %v1435_v1, %v1227_v13  ;;  %3541 = vmatmul.msk.f32.gmra.mxu0 %vm375_vm1, %v352_v63  ;;  %v1063_v20 = vmax.f32 %v699_v12, 0.0  ;;  %v922_v41 = vpop.f32.mrf.mxu1  ;;  %v4466_v1 = vpop.f32.mrf.mxu3  ;;  %v4469_v63 = vld [vmem:[%s4039_s9 + $0x1c8] sm:$0xff] }
 0x1c1   : > { %v923_v48 = vadd.f32 %v922_v41, %v4192_v58  ;;  %v3631_v13 = vld [vmem:[%s6696_s3 + $0x168] sm:$0xff] }
 0x1c2   : > { %6836 = vst [vmem:[#allocation13_spill] sm:$0xff] %v4458_v57  ;;  %1276 = vmatmul.f32.gmra.mxu2 %v1063_v20  ;;  %3611 = vmatmul.msk.f32.gmra.mxu1 %vm375_vm1, %v4469_v63 }
 0x1c3   : > { %v1074_v54 = vmax.f32 %v923_v48, 0.0  ;;  %1817 = vmatpush.msrb.mxu1 %v3631_v13 }
 0x1c5   : > { %v701_v24 = vpop.f32.mrf.mxu0  ;;  %v1229_v28 = vpop.f32.mrf.mxu2  ;;  %1500 = vmatmul.f32.gmra.mxu3 %v1074_v54 }
 0x1c6   : > { %v702_v36 = vadd.f32 %v701_v24, %v4314_v8  ;;  %v1230_v40 = vadd.f32 %v1229_v28, %v4420_v19 }
 0x1c8   : > { %v4472_v43 = vadd.f32 %v4411_v14, %v1230_v40  ;;  %3542 = vmatmul.msk.f32.gmra.mxu0 %vm375_vm1, %v4414_v10  ;;  %v1065_v50 = vmax.f32 %v702_v36, 0.0  ;;  %v925_v14 = vpop.f32.mrf.mxu1  ;;  %v1453_v11 = vpop.f32.mrf.mxu3 }
 0x1c9   : > { %v926_v7 = vadd.f32 %v925_v14, %v4192_v58 }
 0x1ca   : > { %6837 = vst [vmem:[#allocation14_spill] sm:$0xff] %v4472_v43  ;;  %1279 = vmatmul.f32.gmra.mxu2 %v1065_v50  ;;  %3612 = vmatmul.msk.f32.gmra.mxu1 %vm375_vm1, %v4482_v4 }
 0x1cb   : > { %v1076_v12 = vmax.f32 %v926_v7, 0.0 }
 0x1cd   : > { %v704_v55 = vpop.f32.mrf.mxu0  ;;  %v1232_v30 = vpop.f32.mrf.mxu2  ;;  %1503 = vmatmul.f32.gmra.mxu3 %v1076_v12 }
 0x1ce   : > { %v705_v32 = vadd.f32 %v704_v55, %v4314_v8  ;;  %v1233_v3 = vadd.f32 %v1232_v30, %v4420_v19  ;;  %v4511_v30 = vld [vmem:[%s4039_s9 + $0x1e0] sm:$0xff] }
 0x1d0   : > { %v4485_v10 = vadd.f32 %v4424_v35, %v1233_v3  ;;  %3543 = vmatmul.msk.f32.gmra.mxu0 %vm375_vm1, %v4427_v18  ;;  %v1067_v5 = vmax.f32 %v705_v32, 0.0  ;;  %v928_v21 = vpop.f32.mrf.mxu1  ;;  %v1456_v41 = vpop.f32.mrf.mxu3 }
 0x1d1   : > { %v929_v36 = vadd.f32 %v928_v21, %v4192_v58 }
 0x1d2   : > { %1282 = vmatmul.f32.gmra.mxu2 %v1067_v5  ;;  %3613 = vmatmul.msk.f32.gmra.mxu1 %vm375_vm1, %v4498_v22 }
 0x1d3   : > { %v1078_v40 = vmax.f32 %v929_v36, 0.0 }
 0x1d5   : > { %v707_v35 = vpop.f32.mrf.mxu0  ;;  %v1235_v16 = vpop.f32.mrf.mxu2  ;;  %1506 = vmatmul.f32.gmra.mxu3 %v1078_v40 }
 0x1d6   : > { %v708_v20 = vadd.f32 %v707_v35, %v4314_v8  ;;  %v1236_v18 = vadd.f32 %v1235_v16, %v4420_v19  ;;  %v361_v16 = vld [vmem:[%s4039_s9 + $0x1e8] sm:$0xff] }
 0x1d8   : > { %v4501_v24 = vadd.f32 %v4440_v56, %v1236_v18  ;;  %3544 = vmatmul.msk.f32.gmra.mxu0 %vm375_vm1, %v4443_v59  ;;  %v1069_v28 = vmax.f32 %v708_v20, 0.0  ;;  %v931_v55 = vpop.f32.mrf.mxu1  ;;  %v1459_v5 = vpop.f32.mrf.mxu3 }
 0x1d9   : > { %v932_v3 = vadd.f32 %v931_v55, %v4192_v58 }
 0x1da   : > { %1285 = vmatmul.f32.gmra.mxu2 %v1069_v28  ;;  %3614 = vmatmul.msk.f32.gmra.mxu1 %vm375_vm1, %v4511_v30 }
 0x1db   : > { %v1080_v14 = vmax.f32 %v932_v3, 0.0 }
 0x1dd   : > { %v710_v50 = vpop.f32.mrf.mxu0  ;;  %v1238_v48 = vpop.f32.mrf.mxu2  ;;  %1509 = vmatmul.f32.gmra.mxu3 %v1080_v14 }
 0x1de   : > { %v711_v54 = vadd.f32 %v710_v50, %v4314_v8  ;;  %v1239_v56 = vadd.f32 %v1238_v48, %v4420_v19 }
 0x1e0   : > { %v4514_v59 = vadd.f32 %v4453_v45, %v1239_v56  ;;  %3545 = vmatmul.msk.f32.gmra.mxu0 %vm375_vm1, %v4456_v49  ;;  %v1071_v32 = vmax.f32 %v711_v54, 0.0  ;;  %v934_v35 = vpop.f32.mrf.mxu1  ;;  %v1462_v48 = vpop.f32.mrf.mxu3 }
 0x1e1   : > { %v935_v18 = vadd.f32 %v934_v35, %v4192_v58 }
 0x1e2   : > { %6838 = vst [vmem:[#allocation15_spill] sm:$0xff] %v4514_v59  ;;  %1288 = vmatmul.f32.gmra.mxu2 %v1071_v32  ;;  %3615 = vmatmul.msk.f32.gmra.mxu1 %vm375_vm1, %v361_v16 }
 0x1e3   : > { %v1082_v21 = vmax.f32 %v935_v18, 0.0 }
 0x1e5   : > { %v713_v7 = vpop.f32.mrf.mxu0  ;;  %v1241_v12 = vpop.f32.mrf.mxu2  ;;  %1512 = vmatmul.f32.gmra.mxu3 %v1082_v21 }
 0x1e6   : > { %v714_v13 = vadd.f32 %v713_v7, %v4314_v8  ;;  %v1242_v45 = vadd.f32 %v1241_v12, %v4420_v19 }
 0x1e8   : > { %v1073_v49 = vmax.f32 %v714_v13, 0.0  ;;  %v4525_v20 = vadd.f32 %v4466_v1, %v1242_v45  ;;  %3546 = vmatmul.msk.f32.gmra.mxu0 %vm375_vm1, %v4469_v63  ;;  %v937_v54 = vpop.f32.mrf.mxu1  ;;  %v362_v1 = vld [vmem:[%s4039_s9 + $0x1f0] sm:$0xff]  ;;  %v3630_v63 = vld [vmem:[%s6696_s3 + $0x160] sm:$0xff] }
 0x1e9   : > { %v938_v32 = vadd.f32 %v937_v54, %v4192_v58  ;;  %1818 = vmatpush.msrb.mxu1 %v3630_v63 }
 0x1ea   : > { %1291 = vmatmul.f32.gmra.mxu2 %v1073_v49  ;;  %3616 = vmatmul.msk.f32.gmra.mxu1 %vm375_vm1, %v362_v1  ;;  %v1465_v49 = vpop.f32.mrf.mxu3 }
 0x1eb   : > { %v1084_v3 = vmax.f32 %v938_v32, 0.0 }
 0x1ed   : > { %v716_v28 = vpop.f32.mrf.mxu0  ;;  %v1244_v36 = vpop.f32.mrf.mxu2  ;;  %1515 = vmatmul.f32.gmra.mxu3 %v1084_v3 }
 0x1ee   : > { %v717_v40 = vadd.f32 %v716_v28, %v4314_v8  ;;  %v1245_v50 = vadd.f32 %v1244_v36, %v4420_v19 }
 0x1f0   : > { %v1075_v56 = vmax.f32 %v717_v40, 0.0  ;;  %v4534_v55 = vadd.f32 %v1453_v11, %v1245_v50  ;;  %3547 = vmatmul.msk.f32.gmra.mxu0 %vm375_vm1, %v4482_v4  ;;  %v940_v13 = vpop.f32.mrf.mxu1  ;;  %v363_v4 = vld [vmem:[%s4039_s9 + $0x1f8] sm:$0xff] }
 0x1f1   : > { %v941_v18 = vadd.f32 %v940_v13, %v4192_v58 }
 0x1f2   : > { %6839 = vst [vmem:[#allocation16_spill] sm:$0xff] %v4534_v55  ;;  %1294 = vmatmul.f32.gmra.mxu2 %v1075_v56  ;;  %3617 = vmatmul.msk.f32.gmra.mxu1 %vm375_vm1, %v363_v4  ;;  %v1468_v63 = vpop.f32.mrf.mxu3 }
 0x1f3   : > { %v1086_v21 = vmax.f32 %v941_v18, 0.0 }
 0x1f5   : > { %v719_v14 = vpop.f32.mrf.mxu0  ;;  %v1247_v7 = vpop.f32.mrf.mxu2  ;;  %1518 = vmatmul.f32.gmra.mxu3 %v1086_v21 }
 0x1f6   : > { %v720_v11 = vadd.f32 %v719_v14, %v4314_v8  ;;  %v1248_v12 = vadd.f32 %v1247_v7, %v4420_v19 }
 0x1f8   : > { %v1077_v45 = vmax.f32 %v720_v11, 0.0  ;;  %v4546_v35 = vadd.f32 %v1456_v41, %v1248_v12  ;;  %3548 = vmatmul.msk.f32.gmra.mxu0 %vm375_vm1, %v4498_v22  ;;  %v943_v54 = vpop.f32.mrf.mxu1 }
 0x1f9   : > { %v944_v22 = vadd.f32 %v943_v54, %v4192_v58 }
 0x1fa   : > { %1297 = vmatmul.f32.gmra.mxu2 %v1077_v45  ;;  %v1471_v18 = vpop.f32.mrf.mxu3 }
 0x1fb   : > { %v1088_v32 = vmax.f32 %v944_v22, 0.0 }
 0x1fd   : > { %v722_v28 = vpop.f32.mrf.mxu0  ;;  %v1250_v36 = vpop.f32.mrf.mxu2  ;;  %1521 = vmatmul.f32.gmra.mxu3 %v1088_v32 }
 0x1fe   : > { %v723_v40 = vadd.f32 %v722_v28, %v4314_v8  ;;  %v1251_v50 = vadd.f32 %v1250_v36, %v4420_v19 }
 0x200   : > { %v1079_v41 = vmax.f32 %v723_v40, 0.0  ;;  %v4554_v56 = vadd.f32 %v1459_v5, %v1251_v50  ;;  %3549 = vmatmul.msk.f32.gmra.mxu0 %vm375_vm1, %v4511_v30  ;;  %v946_v12 = vpop.f32.mrf.mxu1 }
 0x201   : > { %v947_v30 = vadd.f32 %v946_v12, %v4192_v58 }
 0x202   : > { %1300 = vmatmul.f32.gmra.mxu2 %v1079_v41 }
 0x203   : > { %v1090_v5 = vmax.f32 %v947_v30, 0.0 }
 0x205   : > { %v725_v3 = vpop.f32.mrf.mxu0  ;;  %v1253_v14 = vpop.f32.mrf.mxu2  ;;  %1524 = vmatmul.f32.gmra.mxu3 %v1090_v5 }
 0x206   : > { %v726_v7 = vadd.f32 %v725_v3, %v4314_v8  ;;  %v1254_v11 = vadd.f32 %v1253_v14, %v4420_v19 }
 0x208   : > { %v1081_v13 = vmax.f32 %v726_v7, 0.0  ;;  %v4561_v45 = vadd.f32 %v1462_v48, %v1254_v11  ;;  %3550 = vmatmul.msk.f32.gmra.mxu0 %vm375_vm1, %v361_v16  ;;  %v949_v50 = vpop.f32.mrf.mxu1  ;;  %v3629_v16 = vld [vmem:[%s6696_s3 + $0x158] sm:$0xff] }
 0x209   : > { %v950_v48 = vadd.f32 %v949_v50, %v4192_v58  ;;  %1819 = vmatpush.msrb.mxu1 %v3629_v16  ;;  %v3806_v16 = vld [vmem:[%s4039_s9] sm:$0xff] }
 0x20a   : > { %1303 = vmatmul.f32.gmra.mxu2 %v1081_v13 }
 0x20b   : > { %v1092_v22 = vmax.f32 %v950_v48, 0.0  ;;  %v3807_v48 = vld [vmem:[%s6696_s3 + $0xf8] sm:$0xff] }
 0x20d   : > { %v728_v21 = vpop.f32.mrf.mxu0  ;;  %v1256_v28 = vpop.f32.mrf.mxu2  ;;  %1527 = vmatmul.f32.gmra.mxu3 %v1092_v22 }
 0x20e   : > { %v729_v36 = vadd.f32 %v728_v21, %v4314_v8  ;;  %v1257_v40 = vadd.f32 %v1256_v28, %v4420_v19 }
 0x210   : > { %v1083_v54 = vmax.f32 %v729_v36, 0.0  ;;  %v4567_v41 = vadd.f32 %v1465_v49, %v1257_v40  ;;  %3551 = vmatmul.msk.f32.gmra.mxu0 %vm375_vm1, %v362_v1  ;;  %v1474_v49 = vpop.f32.mrf.mxu3  ;;  %v952_v11 = vpop.f32.mrf.mxu1 }
 0x211   : > { %v953_v13 = vadd.f32 %v952_v11, %v4192_v58 }
 0x212   : > { %1306 = vmatmul.f32.gmra.mxu2 %v1083_v54 }
 0x213   : > { %v1094_v30 = vmax.f32 %v953_v13, 0.0 }
 0x215   : > { %v731_v32 = vpop.f32.mrf.mxu0  ;;  %v1259_v3 = vpop.f32.mrf.mxu2  ;;  %1530 = vmatmul.f32.gmra.mxu3 %v1094_v30  ;;  %v3810_v30 = vld [vmem:[%s6696_s3 + $0xe0] sm:$0xff] }
 0x216   : > { %v732_v14 = vadd.f32 %v731_v32, %v4314_v8  ;;  %v1260_v7 = vadd.f32 %v1259_v3, %v4420_v19  ;;  %v3808_v32 = vld [vmem:[%s6696_s3 + $0xf0] sm:$0xff] }
 0x218   : > { %v1085_v1 = vmax.f32 %v732_v14, 0.0  ;;  %v4576_v12 = vadd.f32 %v1468_v63, %v1260_v7  ;;  %3552 = vmatmul.msk.f32.gmra.mxu0 %vm375_vm1, %v363_v4  ;;  %v955_v40 = vpop.f32.mrf.mxu1  ;;  %v1477_v63 = vpop.f32.mrf.mxu3  ;;  %v3809_v7 = vld [vmem:[%s6696_s3 + $0xe8] sm:$0xff] }
 0x219   : > { %v956_v4 = vadd.f32 %v955_v40, %v4192_v58  ;;  %v3812_v40 = vld [vmem:[%s6696_s3 + $0xd8] sm:$0xff] }
 0x21a   : > { %1309 = vmatmul.f32.gmra.mxu2 %v1085_v1 }
 0x21b   : > { %v1096_v22 = vmax.f32 %v956_v4, 0.0  ;;  %v3813_v4 = vld [vmem:[%s6696_s3 + $0xd0] sm:$0xff] }
 0x21d   : > { %v734_v5 = vpop.f32.mrf.mxu0  ;;  %v1262_v21 = vpop.f32.mrf.mxu2  ;;  %1533 = vmatmul.f32.gmra.mxu3 %v1096_v22  ;;  %v3814_v22 = vld [vmem:[%s6696_s3 + $0xc8] sm:$0xff] }
 0x21e   : > { %v735_v28 = vadd.f32 %v734_v5, %v4314_v8  ;;  %v1263_v36 = vadd.f32 %v1262_v21, %v4420_v19 }
 0x220   : > { %v1087_v50 = vmax.f32 %v735_v28, 0.0  ;;  %v4582_v54 = vadd.f32 %v1471_v18, %v1263_v36  ;;  %3554 = vmatmul.msk.f32.vlgmr.msrb.gmra.mxu0 %vm375_vm1, %v3806_v16  ;;  %v3628_v18 = vld [vmem:[%s6696_s3 + $0x150] sm:$0xff]  ;;  %v958_v13 = vpop.f32.mrf.mxu1  ;;  %v3811_v28 = vld [vmem:[%s4039_s9 + $0x8] sm:$0xff] }
 0x221   : > { %1361 = vmatpush.msrb.mxu0 %v3807_v48  ;;  %1820 = vmatpush.msrb.mxu1 %v3628_v18  ;;  %v959_v36 = vadd.f32 %v958_v13, %v4192_v58 }
 0x222   : > { %1312 = vmatmul.f32.gmra.mxu2 %v1087_v50  ;;  %v1480_v50 = vpop.f32.mrf.mxu3 }
 0x223   : > { %1362 = vmatpush.msrb.mxu0 %v3808_v32  ;;  %v1098_v16 = vmax.f32 %v959_v36, 0.0 }
 0x225   : > { %v737_v3 = vpop.f32.mrf.mxu0  ;;  %v1265_v14 = vpop.f32.mrf.mxu2  ;;  %1363 = vmatpush.msrb.mxu0 %v3809_v7  ;;  %1536 = vmatmul.f32.gmra.mxu3 %v1098_v16  ;;  %v3819_v16 = vld [vmem:[%s6696_s3 + $0xa8] sm:$0xff] }
 0x226   : > { %v738_v11 = vadd.f32 %v737_v3, %v4314_v8  ;;  %v1266_v1 = vadd.f32 %v1265_v14, %v4420_v19  ;;  %v3815_v14 = vld [vmem:[%s6696_s3 + $0xc0] sm:$0xff] }
 0x227   : > { %1364 = vmatpush.msrb.mxu0 %v3810_v30  ;;  %v3817_v30 = vld [vmem:[%s6696_s3 + $0xb8] sm:$0xff] }
 0x228   : > { %v1089_v5 = vmax.f32 %v738_v11, 0.0  ;;  %v4604_v21 = vadd.f32 %v1474_v49, %v1266_v1  ;;  %3555 = vmatmul.msk.f32.gmra.mxu0 %vm375_vm1, %v3811_v28  ;;  %v961_v3 = vpop.f32.mrf.mxu1  ;;  %v3816_v1 = vld [vmem:[%s4039_s9 + $0x10] sm:$0xff] }
 0x229   : > { %1365 = vmatpush.msrb.mxu0 %v3812_v40  ;;  %v962_v13 = vadd.f32 %v961_v3, %v4192_v58  ;;  %v3818_v28 = vld [vmem:[%s6696_s3 + $0xb0] sm:$0xff]  ;;  %v3821_v3 = vld [vmem:[%s4039_s9 + $0x18] sm:$0xff] }
 0x22a   : > { %1315 = vmatmul.f32.gmra.mxu2 %v1089_v5 }
 0x22b   : > { %1366 = vmatpush.msrb.mxu0 %v3813_v4  ;;  %v1100_v5 = vmax.f32 %v962_v13, 0.0  ;;  %v3823_v13 = vld [vmem:[%s6696_s3 + $0x90] sm:$0xff] }
 0x22d   : > { %v740_v49 = vpop.f32.mrf.mxu0  ;;  %v1268_v48 = vpop.f32.mrf.mxu2  ;;  %1367 = vmatpush.msrb.mxu0 %v3814_v22  ;;  %1539 = vmatmul.f32.gmra.mxu3 %v1100_v5  ;;  %v3820_v22 = vld [vmem:[%s6696_s3 + $0xa0] sm:$0xff]  ;;  %v3824_v5 = vld [vmem:[%s6696_s3 + $0x88] sm:$0xff] }
 0x22e   : > { %v741_v32 = vadd.f32 %v740_v49, %v4314_v8  ;;  %v1269_v18 = vadd.f32 %v1268_v48, %v4420_v19 }
 0x22f   : > { %1368 = vmatpush.msrb.mxu0 %v3815_v14 }
 0x230   : > { %v1091_v7 = vmax.f32 %v741_v32, 0.0  ;;  %v4623_v11 = vadd.f32 %v1477_v63, %v1269_v18  ;;  %3556 = vmatmul.msk.f32.gmra.mxu0 %vm375_vm1, %v3816_v1  ;;  %v1483_v63 = vpop.f32.mrf.mxu3  ;;  %v964_v48 = vpop.f32.mrf.mxu1 }
 0x231   : > { %1369 = vmatpush.msrb.mxu0 %v3817_v30  ;;  %v965_v14 = vadd.f32 %v964_v48, %v4192_v58 }
 0x232   : > { %1318 = vmatmul.f32.gmra.mxu2 %v1091_v7  ;;  %v3822_v7 = vld [vmem:[%s6696_s3 + $0x98] sm:$0xff] }
 0x233   : > { %1370 = vmatpush.msrb.mxu0 %v3818_v28  ;;  %v1102_v1 = vmax.f32 %v965_v14, 0.0 }
 0x235   : > { %v743_v36 = vpop.f32.mrf.mxu0  ;;  %v1271_v40 = vpop.f32.mrf.mxu2  ;;  %1371 = vmatpush.msrb.mxu0 %v3819_v16  ;;  %1542 = vmatmul.f32.gmra.mxu3 %v1102_v1 }
 0x236   : > { %v744_v4 = vadd.f32 %v743_v36, %v4314_v8  ;;  %v1272_v49 = vadd.f32 %v1271_v40, %v4420_v19 }
 0x237   : > { %1372 = vmatpush.msrb.mxu0 %v3820_v22  ;;  %v3826_v22 = vld [vmem:[%s4039_s9 + $0x20] sm:$0xff] }
 0x238   : > { %v1093_v32 = vmax.f32 %v744_v4, 0.0  ;;  %v4642_v18 = vadd.f32 %v1480_v50, %v1272_v49  ;;  %3557 = vmatmul.msk.f32.gmra.mxu0 %vm375_vm1, %v3821_v3  ;;  %v1486_v40 = vpop.f32.mrf.mxu3  ;;  %v967_v16 = vpop.f32.mrf.mxu1  ;;  %v3825_v4 = vld [vmem:[%s6696_s3 + $0x80] sm:$0xff] }
 0x239   : > { %1373 = vmatpush.msrb.mxu0 %v3822_v7 }
 0x23a   : > { %1321 = vmatmul.f32.gmra.mxu2 %v1093_v32  ;;  %v968_v32 = vadd.f32 %v967_v16, %v4192_v58 }
 0x23b   : > { %1374 = vmatpush.msrb.mxu0 %v3823_v13 }
 0x23c   : > { %v1104_v3 = vmax.f32 %v968_v32, 0.0 }
 0x23d   : > { %v746_v50 = vpop.f32.mrf.mxu0  ;;  %v1274_v30 = vpop.f32.mrf.mxu2  ;;  %1375 = vmatpush.msrb.mxu0 %v3824_v5 }
 0x23e   : > { %v747_v28 = vadd.f32 %v746_v50, %v4314_v8  ;;  %v1275_v36 = vadd.f32 %v1274_v30, %v4420_v19  ;;  %1545 = vmatmul.f32.gmra.mxu3 %v1104_v3 }
 0x23f   : > { %1376 = vmatpush.msrb.mxu0 %v3825_v4 }
 0x240   : > { %v1095_v49 = vmax.f32 %v747_v28, 0.0  ;;  %v4661_v48 = vadd.f32 %v1483_v63, %v1275_v36  ;;  %3558 = vmatmul.msk.f32.gmra.mxu0 %vm375_vm1, %v3826_v22  ;;  %v970_v50 = vpop.f32.mrf.mxu1  ;;  %v3827_v63 = vld [vmem:[%s4039_s9 + $0x28] sm:$0xff]  ;;  %v1489_v28 = vpop.f32.mrf.mxu3 }
 0x241   : > { %v971_v36 = vadd.f32 %v970_v50, %v4192_v58 }
 0x242   : > { %1324 = vmatmul.f32.gmra.mxu2 %v1095_v49 }
 0x243   : > { %v1106_v16 = vmax.f32 %v971_v36, 0.0 }
 0x245   : > { %v749_v14 = vpop.f32.mrf.mxu0  ;;  %v1277_v7 = vpop.f32.mrf.mxu2 }
 0x246   : > { %v750_v1 = vadd.f32 %v749_v14, %v4314_v8  ;;  %v1278_v13 = vadd.f32 %v1277_v7, %v4420_v19  ;;  %1548 = vmatmul.f32.gmra.mxu3 %v1106_v16 }
 0x248   : > { %v1097_v30 = vmax.f32 %v750_v1, 0.0  ;;  %v4668_v5 = vadd.f32 %v1486_v40, %v1278_v13  ;;  %3559 = vmatmul.msk.f32.gmra.mxu0 %vm375_vm1, %v3827_v63  ;;  %v973_v3 = vpop.f32.mrf.mxu1  ;;  %v3828_v40 = vld [vmem:[%s4039_s9 + $0x30] sm:$0xff]  ;;  %v3627_v1 = vld [vmem:[%s6696_s3 + $0x148] sm:$0xff]  ;;  %v1492_v50 = vpop.f32.mrf.mxu3 }
 0x249   : > { %v974_v13 = vadd.f32 %v973_v3, %v4192_v58  ;;  %1821 = vmatpush.msrb.mxu1 %v3627_v1  ;;  %v3626_v1 = vld [vmem:[%s6696_s3 + $0x140] sm:$0xff] }
 0x24a   : > { %1327 = vmatmul.f32.gmra.mxu2 %v1097_v30 }
 0x24b   : > { %v1108_v30 = vmax.f32 %v974_v13, 0.0  ;;  %1822 = vmatpush.msrb.mxu1 %v3626_v1 }
 0x24d   : > { %v752_v4 = vpop.f32.mrf.mxu0  ;;  %v1280_v49 = vpop.f32.mrf.mxu2 }
 0x24e   : > { %v753_v22 = vadd.f32 %v752_v4, %v4314_v8  ;;  %v1281_v32 = vadd.f32 %v1280_v49, %v4420_v19  ;;  %1551 = vmatmul.f32.gmra.mxu3 %v1108_v30 }
 0x250   : > { %v1099_v14 = vmax.f32 %v753_v22, 0.0  ;;  %v4675_v7 = vadd.f32 %v1489_v28, %v1281_v32  ;;  %3560 = vmatmul.msk.f32.gmra.mxu0 %vm375_vm1, %v3828_v40  ;;  %v976_v4 = vpop.f32.mrf.mxu1  ;;  %v3829_v32 = vld [vmem:[%s4039_s9 + $0x38] sm:$0xff]  ;;  %v1495_v40 = vpop.f32.mrf.mxu3 }
 0x251   : > { %v977_v3 = vadd.f32 %v976_v4, %v4192_v58  ;;  %v3830_v4 = vld [vmem:[%s4039_s9 + $0x40] sm:$0xff]  ;;  %s3883_s9 = scalar_lea.hbm %s6700_s7, 32 }
 0x252   : > { %1330 = vmatmul.f32.gmra.mxu2 %v1099_v14  ;;  %p3885_p4 = scmp.lt.s32.totalorder %s3883_s9, %s3879_s28 }
 0x253   : > { %v1110_v14 = vmax.f32 %v977_v3, 0.0 }
 0x254   : > { %p3886_p7 = por %p3885_p4, %p3884_p3 }
 0x255   : > { %v755_v63 = vpop.f32.mrf.mxu0  ;;  %v1283_v36 = vpop.f32.mrf.mxu2 }
 0x256   : > { %v756_v28 = vadd.f32 %v755_v63, %v4314_v8  ;;  %v1284_v16 = vadd.f32 %v1283_v36, %v4420_v19  ;;  %1554 = vmatmul.f32.gmra.mxu3 %v1110_v14  ;;  %p3887_p8 = pnand %p3886_p7, %p3882_p2 }
 0x258   : > { %v1101_v49 = vmax.f32 %v756_v28, 0.0  ;;  %v4685_v22 = vadd.f32 %v1492_v50, %v1284_v16  ;;  %3561 = vmatmul.msk.f32.gmra.mxu0 %vm375_vm1, %v3829_v32  ;;  %v979_v36 = vpop.f32.mrf.mxu1  ;;  %v591_v32 = vadd.f32 %v4088_v23, %v4314_v8 }
 0x25a   : > { %6840 = vst [vmem:[#allocation17_spill] sm:$0xff] %v4685_v22  ;;  %1333 = vmatmul.f32.gmra.mxu2 %v1101_v49  ;;  %v980_v49 = vadd.f32 %v979_v36, %v4192_v58  ;;  %v991_v1 = vmax.f32 %v591_v32, 0.0 }
 0x25c   : > { %v1112_v3 = vmax.f32 %v980_v49, 0.0 }
 0x25d   : > { %v758_v13 = vpop.f32.mrf.mxu0  ;;  %v1286_v30 = vpop.f32.mrf.mxu2 }
 0x25e   : > { %v759_v50 = vadd.f32 %v758_v13, %v4314_v8  ;;  %v1287_v63 = vadd.f32 %v1286_v30, %v4420_v19  ;;  %1557 = vmatmul.f32.gmra.mxu3 %v1112_v3  ;;  %v597_v3 = vadd.f32 %v4098_v27, %v4314_v8  ;;  %v600_v27 = vadd.f32 %v4103_v29, %v4314_v8 }
 0x25f   : > { %v606_v29 = vadd.f32 %v4113_v33, %v4314_v8 }
 0x260   : > { %v1103_v28 = vmax.f32 %v759_v50, 0.0  ;;  %v4695_v16 = vadd.f32 %v1495_v40, %v1287_v63  ;;  %3562 = vmatmul.msk.f32.gmra.mxu0 %vm375_vm1, %v3830_v4  ;;  %v982_v30 = vpop.f32.mrf.mxu1  ;;  %v594_v50 = vadd.f32 %v4093_v25, %v4314_v8  ;;  %v995_v25 = vmax.f32 %v597_v3, 0.0 }
 0x261   : > { %v983_v40 = vadd.f32 %v982_v30, %v4192_v58 }
 0x262   : > { %6841 = vst [vmem:[#allocation18_spill] sm:$0xff] %v4695_v16  ;;  %1336 = vmatmul.f32.gmra.mxu2 %v1103_v28  ;;  %v993_v23 = vmax.f32 %v594_v50, 0.0 }
 0x263   : > { %v1114_v63 = vmax.f32 %v983_v40, 0.0  ;;  %v3625_v40 = vld [vmem:[%s6696_s3 + $0x138] sm:$0xff] }
 0x264   : > { %1823 = vmatpush.msrb.mxu1 %v3625_v40  ;;  %v3624_v40 = vld [vmem:[%s6696_s3 + $0x130] sm:$0xff] }
 0x265   : > { %v761_v14 = vpop.f32.mrf.mxu0 }
 0x266   : > { %v762_v13 = vadd.f32 %v761_v14, %v4314_v8  ;;  %1560 = vmatmul.f32.gmra.mxu3 %v1114_v63  ;;  %1824 = vmatpush.msrb.mxu1 %v3624_v40  ;;  %v630_v40 = vadd.f32 %v4281_v42, %v4314_v8 }
 0x268   : > { %v1105_v9 = vmax.f32 %v762_v13, 0.0  ;;  %1168 = vmatmul.f32.vlgmr.msra.gmra.mxu0 %v991_v1  ;;  %v985_v4 = vpop.f32.mrf.mxu1 }
 0x269   : > { %v986_v32 = vadd.f32 %v985_v4, %v4192_v58 }
 0x26a   : > { %1339 = vmatmul.f32.gmra.mxu2 %v1105_v9 }
 0x26b   : > { %v1116_v14 = vmax.f32 %v986_v32, 0.0 }
 0x26d   : > { %v764_v36 = vpop.f32.mrf.mxu0 }
 0x26e   : > { %v765_v28 = vadd.f32 %v764_v36, %v4314_v8  ;;  %1563 = vmatmul.f32.gmra.mxu3 %v1116_v14 }
 0x270   : > { %v1107_v49 = vmax.f32 %v765_v28, 0.0  ;;  %1171 = vmatmul.f32.gmra.mxu0 %v993_v23  ;;  %v988_v13 = vpop.f32.mrf.mxu1  ;;  %v997_v23 = vmax.f32 %v600_v27, 0.0 }
 0x271   : > { %v989_v50 = vadd.f32 %v988_v13, %v4192_v58 }
 0x272   : > { %1342 = vmatmul.f32.gmra.mxu2 %v1107_v49  ;;  %v603_v49 = vadd.f32 %v4108_v31, %v4314_v8  ;;  %v609_v31 = vadd.f32 %v4123_v37, %v4314_v8  ;;  %v615_v37 = vadd.f32 %v4167_v51, %v4314_v8  ;;  %v624_v51 = vadd.f32 %v4243_v15, %v4314_v8 }
 0x273   : > { %v1118_v63 = vmax.f32 %v989_v50, 0.0  ;;  %v633_v15 = vadd.f32 %v4294_v52, %v4314_v8  ;;  %v3621_v52 = vld [vmem:[%s6696_s3 + $0x118] sm:$0xff] }
 0x274   : > { %v999_v3 = vmax.f32 %v603_v49, 0.0  ;;  %v1003_v27 = vmax.f32 %v609_v31, 0.0  ;;  %v1007_v49 = vmax.f32 %v615_v37, 0.0  ;;  %v4756_v37 = vpop.f32.mrf.mxu3 }
 0x275   : > { %v767_v1 = vpop.f32.mrf.mxu0 }
 0x276   : > { %v768_v9 = vadd.f32 %v767_v1, %v4314_v8  ;;  %1566 = vmatmul.f32.gmra.mxu3 %v1118_v63 }
 0x278   : > { %v1109_v30 = vmax.f32 %v768_v9, 0.0  ;;  %1174 = vmatmul.f32.gmra.mxu0 %v995_v25  ;;  %v1001_v9 = vmax.f32 %v606_v29, 0.0 }
 0x27a   : > { %1345 = vmatmul.f32.gmra.mxu2 %v1109_v30 }
 0x27d   : > { %v770_v36 = vpop.f32.mrf.mxu0 }
 0x27e   : > { %v771_v28 = vadd.f32 %v770_v36, %v4314_v8  ;;  %v612_v36 = vadd.f32 %v4145_v44, %v4314_v8  ;;  %v3623_v44 = vld [vmem:[%s6696_s3 + $0x128] sm:$0xff] }
 0x27f   : > { %1825 = vmatpush.msrb.mxu1 %v3623_v44 }
 0x280   : > { %v1111_v4 = vmax.f32 %v771_v28, 0.0  ;;  %1177 = vmatmul.f32.gmra.mxu0 %v997_v23  ;;  %v1005_v28 = vmax.f32 %v612_v36, 0.0  ;;  %v4754_v36 = vpop.f32.mrf.mxu2 }
 0x282   : > { %1348 = vmatmul.f32.gmra.mxu2 %v1111_v4 }
 0x285   : > { %v773_v32 = vpop.f32.mrf.mxu0 }
 0x286   : > { %v774_v14 = vadd.f32 %v773_v32, %v4314_v8  ;;  %v618_v32 = vadd.f32 %v4197_v60, %v4314_v8  ;;  %v627_v60 = vadd.f32 %v4262_v26, %v4314_v8  ;;  %v636_v26 = vadd.f32 %v4301_v61, %v4314_v8  ;;  %v4767_v61 = vpop.f32.mrf.mxu3 }
 0x288   : > { %v1113_v1 = vmax.f32 %v774_v14, 0.0  ;;  %1180 = vmatmul.f32.gmra.mxu0 %v999_v3  ;;  %v1009_v14 = vmax.f32 %v618_v32, 0.0  ;;  %v1015_v31 = vmax.f32 %v627_v60, 0.0  ;;  %v4765_v44 = vpop.f32.mrf.mxu2 }
 0x28a   : > { %1351 = vmatmul.f32.gmra.mxu2 %v1113_v1  ;;  %v621_v1 = vadd.f32 %v4221_v6, %v4314_v8  ;;  %v1017_v6 = vmax.f32 %v630_v40, 0.0 }
 0x28d   : > { %v776_v25 = vpop.f32.mrf.mxu0 }
 0x28e   : > { %v777_v13 = vadd.f32 %v776_v25, %v4314_v8  ;;  %v1011_v25 = vmax.f32 %v621_v1, 0.0 }
 0x290   : > { %v1115_v30 = vmax.f32 %v777_v13, 0.0  ;;  %1183 = vmatmul.f32.gmra.mxu0 %v1001_v9  ;;  %v1013_v13 = vmax.f32 %v624_v51, 0.0 }
 0x292   : > { %1354 = vmatmul.f32.gmra.mxu2 %v1115_v30 }
 0x295   : > { %v779_v50 = vpop.f32.mrf.mxu0 }
 0x296   : > { %v780_v33 = vadd.f32 %v779_v50, %v4314_v8 }
 0x298   : > { %v1117_v63 = vmax.f32 %v780_v33, 0.0  ;;  %1186 = vmatmul.f32.gmra.mxu0 %v1003_v27  ;;  %v3622_v27 = vld [vmem:[%s6696_s3 + $0x120] sm:$0xff] }
 0x299   : > { %1826 = vmatpush.msrb.mxu1 %v3622_v27 }
 0x29a   : > { %1357 = vmatmul.f32.gmra.mxu2 %v1117_v63  ;;  %v1019_v63 = vmax.f32 %v633_v15, 0.0 }
 0x29b   : > { %1827 = vmatpush.msrb.mxu1 %v3621_v52 }
 0x29d   : > { %v799_v23 = vpop.f32.mrf.mxu0 }
 0x29e   : > { %v800_v1 = vadd.f32 %v799_v23, %v4192_v58 }
 0x2a0   : > { %1189 = vmatmul.f32.gmra.mxu0 %v1005_v28  ;;  %v1021_v28 = vmax.f32 %v636_v26, 0.0  ;;  %v992_v51 = vmax.f32 %v800_v1, 0.0 }
 0x2a5   : > { %v802_v4 = vpop.f32.mrf.mxu0 }
 0x2a8   : > { %1192 = vmatmul.f32.gmra.mxu0 %v1007_v49  ;;  %v639_v49 = vadd.f32 %v4307_v2, %v4314_v8  ;;  %v803_v2 = vadd.f32 %v802_v4, %v4192_v58  ;;  %v4775_v8 = vpop.f32.mrf.mxu3 }
 0x2ad   : > { %v805_v3 = vpop.f32.mrf.mxu0 }
 0x2b0   : > { %1195 = vmatmul.f32.gmra.mxu0 %v1009_v14  ;;  %v1023_v14 = vmax.f32 %v639_v49, 0.0  ;;  %v4784_v23 = vpop.f32.mrf.mxu3 }
 0x2b5   : > { %v808_v29 = vpop.f32.mrf.mxu0 }
 0x2b8   : > { %1198 = vmatmul.f32.gmra.mxu0 %v1011_v25  ;;  %v4791_v49 = vpop.f32.mrf.mxu3 }
 0x2bd   : > { %v811_v9 = vpop.f32.mrf.mxu0 }
 0x2be   : > { %v812_v52 = vadd.f32 %v811_v9, %v4192_v58  ;;  %v3619_v9 = vld [vmem:[%s6696_s3 + $0x108] sm:$0xff] }
 0x2c0   : > { %1201 = vmatmul.f32.gmra.mxu0 %v1013_v13  ;;  %v4772_v13 = vpop.f32.mrf.mxu2  ;;  %v1000_v1 = vmax.f32 %v812_v52, 0.0 }
 0x2c5   : > { %v814_v30 = vpop.f32.mrf.mxu0 }
 0x2c8   : > { %1204 = vmatmul.f32.gmra.mxu0 %v1015_v31  ;;  %v994_v31 = vmax.f32 %v803_v2, 0.0  ;;  %v4779_v40 = vpop.f32.mrf.mxu2  ;;  %v815_v2 = vadd.f32 %v814_v30, %v4192_v58 }
 0x2cd   : > { %v817_v50 = vpop.f32.mrf.mxu0 }
 0x2d0   : > { %1207 = vmatmul.f32.gmra.mxu0 %v1017_v6  ;;  %v806_v6 = vadd.f32 %v805_v3, %v4192_v58  ;;  %v4787_v26 = vpop.f32.mrf.mxu2 }
 0x2d2   : > { %v996_v15 = vmax.f32 %v806_v6, 0.0  ;;  %v1002_v6 = vmax.f32 %v815_v2, 0.0 }
 0x2d5   : > { %v820_v33 = vpop.f32.mrf.mxu0 }
 0x2d8   : > { %1210 = vmatmul.f32.gmra.mxu0 %v1019_v63  ;;  %v809_v63 = vadd.f32 %v808_v29, %v4192_v58  ;;  %v4796_v3 = vpop.f32.mrf.mxu2  ;;  %v4801_v29 = vpop.f32.mrf.mxu3 }
 0x2dd   : > { %v823_v42 = vpop.f32.mrf.mxu0 }
 0x2e0   : > { %1213 = vmatmul.f32.gmra.mxu0 %v1021_v28  ;;  %v998_v28 = vmax.f32 %v809_v63, 0.0  ;;  %v818_v63 = vadd.f32 %v817_v50, %v4192_v58 }
 0x2e5   : > { %v4763_v32 = vpop.f32.mrf.mxu0 }
 0x2e8   : > { %1216 = vmatmul.f32.gmra.mxu0 %v1023_v14 }
 0x2ed   : > { %v4770_v25 = vpop.f32.mrf.mxu0 }
 0x2f0   : > { %1377 = vmatmul.f32.vlgmr.msrb.gmra.mxu0 %v992_v51  ;;  %v3620_v51 = vld [vmem:[%s6696_s3 + $0x110] sm:$0xff] }
 0x2f1   : > { %1828 = vmatpush.msrb.mxu1 %v3620_v51  ;;  %v821_v51 = vadd.f32 %v820_v33, %v4192_v58 }
 0x2f3   : > { %1829 = vmatpush.msrb.mxu1 %v3619_v9  ;;  %v1006_v62 = vmax.f32 %v821_v51, 0.0  ;;  %v824_v9 = vadd.f32 %v823_v42, %v4192_v58  ;;  %v3618_v51 = vld [vmem:[%s6696_s3 + $0x100] sm:$0xff] }
 0x2f5   : > { %v4777_v60 = vpop.f32.mrf.mxu0  ;;  %v1008_v16 = vmax.f32 %v824_v9, 0.0  ;;  %1830 = vmatpush.msrb.mxu1 %v3618_v51 }
 0x2f8   : > { %1380 = vmatmul.f32.gmra.mxu0 %v994_v31 }
 0x2fd   : > { %v4782_v27 = vpop.f32.mrf.mxu0 }
 0x300   : > { %1383 = vmatmul.f32.gmra.mxu0 %v996_v15  ;;  %v4806_v15 = vpop.f32.mrf.mxu2 }
 0x305   : > { %v4789_v4 = vpop.f32.mrf.mxu0 }
 0x308   : > { %1386 = vmatmul.f32.gmra.mxu0 %v998_v28  ;;  %v4812_v28 = vpop.f32.mrf.mxu3  ;;  %v4816_v30 = vpop.f32.mrf.mxu2 }
 0x309   : > { %6842 = vst [vmem:[#allocation19_spill] sm:$0xff] %v4816_v30 }
 0x30d   : > { %v4794_v14 = vpop.f32.mrf.mxu0 }
 0x310   : > { %1389 = vmatmul.f32.gmra.mxu0 %v1000_v1  ;;  %v1004_v1 = vmax.f32 %v818_v63, 0.0  ;;  %v4824_v47 = vpop.f32.mrf.mxu2  ;;  %v827_v63 = vadd.f32 %v4115_v34, %v4192_v58 }
 0x315   : > { %v4804_v31 = vpop.f32.mrf.mxu0 }
 0x318   : > { %1392 = vmatmul.f32.gmra.mxu0 %v1002_v6  ;;  %v4821_v6 = vpop.f32.mrf.mxu3  ;;  %v4834_v30 = vpop.f32.mrf.mxu2 }
 0x319   : > { %6843 = vst [vmem:[#allocation20_spill] sm:$0xff] %v4821_v6 }
 0x31d   : > { %v4814_v52 = vpop.f32.mrf.mxu0 }
 0x320   : > { %1395 = vmatmul.f32.gmra.mxu0 %v1004_v1  ;;  %v4828_v22 = vpop.f32.mrf.mxu3  ;;  %v1010_v1 = vmax.f32 %v827_v63, 0.0  ;;  %v4845_v34 = vpop.f32.mrf.mxu2  ;;  %v833_v63 = vadd.f32 %v4150_v46, %v4192_v58 }
 0x321   : > { %6844 = vst [vmem:[#allocation21_spill] sm:$0xff] %v4828_v22 }
 0x325   : > { %v4819_v2 = vpop.f32.mrf.mxu0 }
 0x328   : > { %1398 = vmatmul.f32.gmra.mxu0 %v1006_v62  ;;  %v830_v62 = vadd.f32 %v4128_v39, %v4192_v58  ;;  %v4838_v42 = vpop.f32.mrf.mxu3  ;;  %v1014_v39 = vmax.f32 %v833_v63, 0.0  ;;  %v4855_v22 = vpop.f32.mrf.mxu2 }
 0x32a   : > { %v1012_v9 = vmax.f32 %v830_v62, 0.0 }
 0x32d   : > { %v4826_v50 = vpop.f32.mrf.mxu0 }
 0x330   : > { %1401 = vmatmul.f32.gmra.mxu0 %v1008_v16 }
 0x335   : > { %v4832_v33 = vpop.f32.mrf.mxu0 }
 0x336   : > { %6845 = vst [vmem:[#allocation22_spill] sm:$0xff] %v4832_v33  ;;  %v836_v33 = vadd.f32 %v4172_v53, %v4192_v58 }
 0x338   : > { %1404 = vmatmul.f32.gmra.mxu0 %v1010_v1  ;;  %v4849_v1 = vpop.f32.mrf.mxu3  ;;  %v1016_v62 = vmax.f32 %v836_v33, 0.0 }
 0x339   : > { %6847 = vst [vmem:[#allocation24_spill] sm:$0xff] %v4849_v1 }
 0x33d   : > { %v4843_v16 = vpop.f32.mrf.mxu0 }
 0x33e   : > { %6846 = vst [vmem:[#allocation23_spill] sm:$0xff] %v4843_v16 }
 0x340   : > { %1407 = vmatmul.f32.gmra.mxu0 %v1012_v9  ;;  %v4859_v16 = vpop.f32.mrf.mxu3  ;;  %v4861_v9 = vpop.f32.mrf.mxu2 }
 0x341   : > { %6850 = vst [vmem:[#allocation27_spill] sm:$0xff] %v4859_v16 }
 0x342   : > { %6851 = vst [vmem:[#allocation28_spill] sm:$0xff] %v4861_v9 }
 0x345   : > { %v4851_v6 = vpop.f32.mrf.mxu0 }
 0x346   : > { %6848 = vst [vmem:[#allocation25_spill] sm:$0xff] %v4851_v6 }
 0x348   : > { %1410 = vmatmul.f32.gmra.mxu0 %v1014_v39  ;;  %v4865_v1 = vpop.f32.mrf.mxu3  ;;  %v4869_v63 = vpop.f32.mrf.mxu2 }
 0x349   : > { %6853 = vst [vmem:[#allocation30_spill] sm:$0xff] %v4865_v1  ;;  %v6707_v1 = vmax.f32 %v4445_v0, 0.0 }
 0x34a   : > { %6855 = vst [vmem:[#allocation32_spill] sm:$0xff] %v4869_v63  ;;  %v6709_v63 = vmax.f32 %v4472_v43, 0.0 }
 0x34d   : > { %v4857_v51 = vpop.f32.mrf.mxu0 }
 0x34e   : > { %6849 = vst [vmem:[#allocation26_spill] sm:$0xff] %v4857_v51 }
 0x350   : > { %1413 = vmatmul.f32.gmra.mxu0 %v1016_v62  ;;  %v4871_v39 = vpop.f32.mrf.mxu3  ;;  %v4874_v51 = vpop.f32.mrf.mxu2  ;;  %v6704_v62 = vmax.f32 %v4429_v38, 0.0 }
 0x351   : > { %6856 = vst [vmem:[#allocation33_spill] sm:$0xff] %v4871_v39 }
 0x352   : > { %6857 = vst [vmem:[#allocation34_spill] sm:$0xff] %v4874_v51 }
 0x355   : > { %v4863_v46 = vpop.f32.mrf.mxu0 }
 0x356   : > { %6852 = vst [vmem:[#allocation29_spill] sm:$0xff] %v4863_v46 }
 0x358   : > { %v4882_v9 = vpop.f32.mrf.mxu3  ;;  %v4896_v59 = vpop.f32.mrf.mxu2 }
 0x359   : > { %6859 = vst [vmem:[#allocation36_spill] sm:$0xff] %v4882_v9 }
 0x35d   : > { %v4867_v6 = vpop.f32.mrf.mxu0 }
 0x35e   : > { %6854 = vst [vmem:[#allocation31_spill] sm:$0xff] %v4867_v6  ;;  %v1170_v6 = vadd.f32 %v4763_v32, %v4420_v19 }
 0x360   : > { %v4904_v0 = vpop.f32.mrf.mxu3 }
 0x365   : > { %v1217_v53 = vpop.f32.mrf.mxu0 }
 0x366   : > { %v1218_v58 = vadd.f32 %v1217_v53, %v4420_v19 }
 0x368   : > { %v4877_v33 = vadd.f32 %v4383_v17, %v1218_v58  ;;  %v6708_v17 = vmax.f32 %v4458_v57, 0.0 }
 0x36a   : > { %6858 = vst [vmem:[#allocation35_spill] sm:$0xff] %v4877_v33  ;;  %v6705_v46 = vmax.f32 %v4877_v33, 0.0  ;;  %v1293_v33 = vadd.f32 %v4765_v44, %v4420_v19 }
 0x36c   : > { %v1660_v53 = vmax.f32 %v6705_v46, %v6704_v62  ;;  %v1173_v62 = vadd.f32 %v4770_v25, %v4420_v19  ;;  %v1179_v25 = vadd.f32 %v4782_v27, %v4420_v19 }
 0x36d   : > { %v1378_v51 = vpop.f32.mrf.mxu0 }
 0x36e   : > { %v1661_v58 = vmax.f32 %v1660_v53, %v6707_v1  ;;  %v1379_v39 = vadd.f32 %v1378_v51, %v1170_v6  ;;  %v4906_v1 = vpop.f32.mrf.mxu2 }
 0x370   : > { %v1662_v9 = vmax.f32 %v1661_v58, %v6708_v17  ;;  %v1570_v16 = vmax.f32 %v1379_v39, 0.0  ;;  %v1176_v39 = vadd.f32 %v4777_v60, %v4420_v19  ;;  %v1182_v60 = vadd.f32 %v4789_v4, %v4420_v19 }
 0x371   : > { %v1188_v4 = vadd.f32 %v4804_v31, %v4420_v19  ;;  %v6719_v31 = vmax.f32 %v4525_v20, 0.0 }
 0x372   : > { %v4900_v32 = vmax.f32 %v1662_v9, %v6709_v63  ;;  %1831 = vmatmul.f32.vlgmr.msrb.gmra.mxu1 %v1570_v16  ;;  %v4910_v9 = vpop.f32.mrf.mxu3 }
 0x375   : > { %v1381_v46 = vpop.f32.mrf.mxu0 }
 0x376   : > { %v1382_v6 = vadd.f32 %v1381_v46, %v1173_v62  ;;  %v4914_v46 = vpop.f32.mrf.mxu2 }
 0x378   : > { %v1571_v51 = vmax.f32 %v1382_v6, 0.0 }
 0x37a   : > { %v1634_v53 = vmax.f32 %v1570_v16, %v1571_v51  ;;  %1834 = vmatmul.f32.gmra.mxu1 %v1571_v51  ;;  %v4916_v6 = vpop.f32.mrf.mxu3 }
 0x37d   : > { %v1384_v58 = vpop.f32.mrf.mxu0 }
 0x37e   : > { %v1385_v17 = vadd.f32 %v1384_v58, %v1176_v39 }
 0x380   : > { %v1572_v63 = vmax.f32 %v1385_v17, 0.0  ;;  %v4920_v17 = vpop.f32.mrf.mxu2 }
 0x382   : > { %v1635_v43 = vmax.f32 %v1634_v53, %v1572_v63  ;;  %1837 = vmatmul.f32.gmra.mxu1 %v1572_v63  ;;  %v4924_v27 = vpop.f32.mrf.mxu3 }
 0x385   : > { %v1387_v57 = vpop.f32.mrf.mxu0 }
 0x386   : > { %v1388_v16 = vadd.f32 %v1387_v57, %v1179_v25  ;;  %v1185_v57 = vadd.f32 %v4794_v14, %v4420_v19 }
 0x388   : > { %v1573_v62 = vmax.f32 %v1388_v16, 0.0 }
 0x38a   : > { %v1636_v51 = vmax.f32 %v1635_v43, %v1573_v62  ;;  %1840 = vmatmul.f32.gmra.mxu1 %v1573_v62  ;;  %v4931_v62 = vpop.f32.mrf.mxu2 }
 0x38d   : > { %v1390_v39 = vpop.f32.mrf.mxu0 }
 0x38e   : > { %v1391_v58 = vadd.f32 %v1390_v39, %v1182_v60  ;;  %v4937_v60 = vpop.f32.mrf.mxu3 }
 0x390   : > { %v1574_v63 = vmax.f32 %v1391_v58, 0.0 }
 0x392   : > { %v4922_v53 = vmax.f32 %v1636_v51, %v1574_v63  ;;  %1843 = vmatmul.f32.gmra.mxu1 %v1574_v63  ;;  %v4944_v58 = vpop.f32.mrf.mxu2  ;;  %v1191_v63 = vadd.f32 %v4814_v52, %v4420_v19  ;;  %v6722_v52 = vmax.f32 %v4554_v56, 0.0 }
 0x395   : > { %v1393_v25 = vpop.f32.mrf.mxu0 }
 0x396   : > { %v4928_v16 = vadd.f32 %v1393_v25, %v1185_v57  ;;  %v6718_v57 = vmax.f32 %v4534_v55, 0.0  ;;  %v1296_v55 = vadd.f32 %v4772_v13, %v4420_v19  ;;  %v3649_v13 = vld [vmem:[%s6696_s3 + $0x1f8] sm:$0xff] }
 0x397   : > { %1795 = vmatpush.msra.mxu0 %v3649_v13 }
 0x398   : > { %v6712_v43 = vmax.f32 %v4928_v16, 0.0 }
 0x39a   : > { %1846 = vmatmul.f32.gmra.mxu1 %v6712_v43 }
 0x39d   : > { %v1396_v51 = vpop.f32.mrf.mxu0 }
 0x39e   : > { %v4939_v39 = vadd.f32 %v1396_v51, %v1188_v4  ;;  %v6721_v4 = vmax.f32 %v4546_v35, 0.0  ;;  %v4953_v51 = vpop.f32.mrf.mxu3 }
 0x3a0   : > { %6860 = vst [vmem:[#allocation37_spill] sm:$0xff] %v4939_v39  ;;  %v6714_v14 = vmax.f32 %v4939_v39, 0.0 }
 0x3a2   : > { %1849 = vmatmul.f32.gmra.mxu1 %v6714_v14  ;;  %v1673_v14 = vmax.f32 %v6719_v31, %v6718_v57  ;;  %v1194_v31 = vadd.f32 %v4819_v2, %v4420_v19  ;;  %v6723_v57 = vmax.f32 %v4604_v21, 0.0  ;;  %v3648_v2 = vld [vmem:[%s6696_s3 + $0x1f0] sm:$0xff] }
 0x3a3   : > { %1796 = vmatpush.msra.mxu0 %v3648_v2 }
 0x3a5   : > { %v1399_v25 = vpop.f32.mrf.mxu0 }
 0x3a6   : > { %v4949_v43 = vadd.f32 %v1399_v25, %v1191_v63  ;;  %v1290_v63 = vadd.f32 %v4754_v36, %v4420_v19  ;;  %v1674_v25 = vmax.f32 %v1673_v14, %v6721_v4  ;;  %v1299_v14 = vadd.f32 %v4779_v40, %v4420_v19 }
 0x3a7   : > { %v1302_v36 = vadd.f32 %v4787_v26, %v4420_v19 }
 0x3a8   : > { %v6720_v38 = vmax.f32 %v4949_v43, 0.0  ;;  %v1675_v44 = vmax.f32 %v1674_v25, %v6722_v52  ;;  %v4989_v39 = vadd.f32 %v4756_v37, %v1290_v63  ;;  %v4991_v25 = vpop.f32.mrf.mxu2  ;;  %v6864_v63 = vmax.f32 %v4623_v11, 0.0 }
 0x3a9   : > { %v5016_v13 = vadd.f32 %v4784_v23, %v1299_v14  ;;  %v5033_v14 = vadd.f32 %v4791_v49, %v1302_v36  ;;  %v1317_v49 = vadd.f32 %v4834_v30, %v4420_v19  ;;  %v1197_v36 = vadd.f32 %v4826_v50, %v4420_v19  ;;  %v3645_v30 = vld [vmem:[%s6696_s3 + $0x1d8] sm:$0xff] }
 0x3aa   : > { %1852 = vmatmul.f32.gmra.mxu1 %v6720_v38  ;;  %v4979_v38 = vadd.f32 %v4767_v61, %v1293_v33  ;;  %v6862_v61 = vmax.f32 %v4561_v45, 0.0  ;;  %v4998_v33 = vadd.f32 %v4775_v8, %v1296_v55  ;;  %v6726_v55 = vmax.f32 %v4989_v39, 0.0  ;;  %v5027_v8 = vpop.f32.mrf.mxu3 }
 0x3ab   : > { %6865 = vst [vmem:[#allocation40_spill] sm:$0xff] %v5016_v13  ;;  %v6730_v50 = vmax.f32 %v4582_v54, 0.0 }
 0x3ac   : > { %6861 = vst [vmem:[#allocation38_spill] sm:$0xff] %v4979_v38  ;;  %v1676_v40 = vmax.f32 %v1675_v44, %v6862_v61  ;;  %v6725_v26 = vmax.f32 %v4979_v38, 0.0  ;;  %v3647_v61 = vld [vmem:[%s6696_s3 + $0x1e8] sm:$0xff]  ;;  %v6728_v23 = vmax.f32 %v4998_v33, 0.0 }
 0x3ad   : > { %v1402_v4 = vpop.f32.mrf.mxu0  ;;  %6863 = vst [vmem:[#allocation39_spill] sm:$0xff] %v4998_v33  ;;  %1797 = vmatpush.msra.mxu0 %v3647_v61  ;;  %v6870_v61 = vmax.f32 %v4661_v48, 0.0 }
 0x3ae   : > { %v4993_v52 = vadd.f32 %v1402_v4, %v1194_v31  ;;  %v1686_v31 = vmax.f32 %v6723_v57, %v6864_v63  ;;  %v6866_v63 = vmax.f32 %v4567_v41, 0.0  ;;  %v6867_v4 = vmax.f32 %v4642_v18, 0.0  ;;  %6868 = vst [vmem:[#allocation41_spill] sm:$0xff] %v5033_v14 }
 0x3b0   : > { %v6724_v44 = vmax.f32 %v4993_v52, 0.0  ;;  %v1677_v57 = vmax.f32 %v1676_v40, %v6866_v63  ;;  %v1687_v37 = vmax.f32 %v1686_v31, %v6867_v4  ;;  %v1305_v40 = vadd.f32 %v4796_v3, %v4420_v19  ;;  %v3646_v4 = vld [vmem:[%s6696_s3 + $0x1e0] sm:$0xff] }
 0x3b1   : > { %v1308_v31 = vadd.f32 %v4806_v15, %v4420_v19  ;;  %v6869_v63 = vmax.f32 %v4576_v12, 0.0  ;;  %1798 = vmatpush.msra.mxu0 %v3646_v4  ;;  %v1699_v3 = vmax.f32 %v6726_v55, %v6725_v26  ;;  %v6871_v4 = vmax.f32 %v4668_v5, 0.0 }
 0x3b2   : > { %1855 = vmatmul.f32.gmra.mxu1 %v6724_v44  ;;  %v1688_v44 = vmax.f32 %v1687_v37, %v6870_v61  ;;  %v1320_v37 = vadd.f32 %v4845_v34, %v4420_v19  ;;  %v6729_v26 = vmax.f32 %v4675_v7, 0.0  ;;  %v5072_v15 = vadd.f32 %v4801_v29, %v1305_v40  ;;  %v6877_v40 = vld [vmem:[#allocation17_spill] sm:$0xff] }
 0x3b3   : > { %v1678_v2 = vmax.f32 %v1677_v57, %v6869_v63  ;;  %v1314_v57 = vadd.f32 %v4824_v47, %v4420_v19  ;;  %1799 = vmatpush.msra.mxu0 %v3645_v30  ;;  %v1700_v47 = vmax.f32 %v1699_v3, %v6728_v23  ;;  %v5075_v38 = vadd.f32 %v4812_v28, %v1308_v31  ;;  %v6872_v28 = vld [vmem:[#allocation15_spill] sm:$0xff]  ;;  %v6874_v23 = vld [vmem:[#allocation21_spill] sm:$0xff] }
 0x3b4   : > { %v1689_v61 = vmax.f32 %v1688_v44, %v6871_v4  ;;  %v3644_v44 = vld [vmem:[%s6696_s3 + $0x1d0] sm:$0xff]  ;;  %v5081_v4 = vadd.f32 %v4838_v42, %v1317_v49  ;;  %v1341_v3 = vadd.f32 %v4914_v46, %v4420_v19  ;;  %v6873_v31 = vmax.f32 %v5016_v13, 0.0  ;;  %v6875_v42 = vld [vmem:[#allocation24_spill] sm:$0xff] }
 0x3b5   : > { %v1405_v63 = vpop.f32.mrf.mxu0  ;;  %1800 = vmatpush.msra.mxu0 %v3644_v44  ;;  %v5094_v34 = vadd.f32 %v6874_v23, %v1314_v57  ;;  %v5097_v49 = vadd.f32 %v6875_v42, %v1320_v37  ;;  %v5104_v46 = vmax.f32 %v1678_v2, %v6730_v50  ;;  %v1338_v23 = vadd.f32 %v4906_v1, %v4420_v19 }
 0x3b6   : > { %v5066_v55 = vadd.f32 %v1405_v63, %v1197_v36  ;;  %v1323_v36 = vadd.f32 %v4855_v22, %v4420_v19  ;;  %v5087_v63 = vpop.f32.mrf.mxu2  ;;  %v1701_v30 = vmax.f32 %v1700_v47, %v6873_v31  ;;  %v3643_v22 = vld [vmem:[%s6696_s3 + $0x1c8] sm:$0xff]  ;;  %v1690_v44 = vmax.f32 %v1689_v61, %v6729_v26  ;;  %v3642_v61 = vld [vmem:[%s6696_s3 + $0x1c0] sm:$0xff] }
 0x3b7   : > { %6876 = vst [vmem:[#allocation15_spill] sm:$0xff] %v5097_v49  ;;  %1801 = vmatpush.msra.mxu0 %v3643_v22  ;;  %v6879_v37 = vmax.f32 %v5033_v14, 0.0  ;;  %v1344_v42 = vadd.f32 %v4920_v17, %v4420_v19  ;;  %v6880_v26 = vld [vmem:[#allocation27_spill] sm:$0xff]  ;;  %v5127_v22 = vadd.f32 %v4916_v6, %v1341_v3  ;;  %v3641_v6 = vld [vmem:[%s6696_s3 + $0x1b8] sm:$0xff]  ;;  %v6885_v3 = vld [vmem:[#allocation28_spill] sm:$0xff]  ;;  %v6888_v29 = vmax.f32 %v6877_v40, 0.0 }
 0x3b8   : > { %v6878_v57 = vmax.f32 %v5066_v55, 0.0  ;;  %v5124_v50 = vadd.f32 %v6880_v26, %v1323_v36  ;;  %v6884_v17 = vld [vmem:[#allocation19_spill] sm:$0xff]  ;;  %v1347_v26 = vadd.f32 %v4931_v62, %v4420_v19  ;;  %v1326_v1 = vadd.f32 %v6885_v3, %v4420_v19 }
 0x3b9   : > { %v1702_v47 = vmax.f32 %v1701_v30, %v6879_v37  ;;  %6882 = vst [vmem:[#allocation24_spill] sm:$0xff] %v5127_v22  ;;  %v5129_v30 = vpop.f32.mrf.mxu3  ;;  %1802 = vmatpush.msra.mxu0 %v3642_v61  ;;  %v1311_v2 = vadd.f32 %v6884_v17, %v4420_v19  ;;  %v6886_v61 = vld [vmem:[#allocation32_spill] sm:$0xff]  ;;  %v5147_v17 = vadd.f32 %v4910_v9, %v1338_v23  ;;  %v6889_v62 = vmax.f32 %v5072_v15, 0.0  ;;  %v3640_v9 = vld [vmem:[%s6696_s3 + $0x1b0] sm:$0xff] }
 0x3ba   : > { %1858 = vmatmul.f32.gmra.mxu1 %v6878_v57  ;;  %6881 = vst [vmem:[#allocation21_spill] sm:$0xff] %v5124_v50  ;;  %v6883_v57 = vld [vmem:[#allocation22_spill] sm:$0xff]  ;;  %v5151_v14 = vmax.f32 %v1690_v44, %v6888_v29  ;;  %v5156_v33 = vadd.f32 %v4924_v27, %v1344_v42  ;;  %v1350_v3 = vadd.f32 %v4944_v58, %v4420_v19  ;;  %v6890_v23 = vmax.f32 %v5081_v4, 0.0  ;;  %v6893_v58 = vld [vmem:[#allocation20_spill] sm:$0xff]  ;;  %v6915_v29 = vld [vmem:[#allocation37_spill] sm:$0xff] }
 0x3bb   : > { %v1200_v37 = vadd.f32 %v6883_v57, %v4420_v19  ;;  %v1329_v57 = vadd.f32 %v6886_v61, %v4420_v19  ;;  %6887 = vst [vmem:[#allocation17_spill] sm:$0xff] %v5147_v17  ;;  %1803 = vmatpush.msra.mxu0 %v3641_v6  ;;  %v1703_v13 = vmax.f32 %v1702_v47, %v6889_v62  ;;  %v6892_v27 = vmax.f32 %v5075_v38, 0.0 }
 0x3bc   : > { %v5174_v6 = vadd.f32 %v6893_v58, %v1311_v2  ;;  %v5177_v61 = vadd.f32 %v4937_v60, %v1347_v26  ;;  %v1353_v62 = vadd.f32 %v4991_v25, %v4420_v19  ;;  %v6734_v2 = vmax.f32 %v5147_v17, 0.0  ;;  %v6897_v25 = vld [vmem:[#allocation34_spill] sm:$0xff]  ;;  %v6906_v17 = vld [vmem:[#allocation36_spill] sm:$0xff] }
 0x3bd   : > { %v1408_v36 = vpop.f32.mrf.mxu0  ;;  %1804 = vmatpush.msra.mxu0 %v3640_v9  ;;  %v5171_v42 = vmax.f32 %v1703_v13, %v6892_v27  ;;  %v6896_v13 = vld [vmem:[#allocation33_spill] sm:$0xff]  ;;  %v1332_v26 = vadd.f32 %v6897_v25, %v4420_v19  ;;  %v1335_v58 = vadd.f32 %v4896_v59, %v4420_v19  ;;  %v1356_v59 = vadd.f32 %v5087_v63, %v4420_v19 }
 0x3be   : > { %v1409_v31 = vadd.f32 %v1408_v36, %v1200_v37  ;;  %v6891_v37 = vmax.f32 %v5094_v34, 0.0  ;;  %v5190_v27 = vadd.f32 %v6896_v13, %v1329_v57  ;;  %v1358_v60 = vpop.f32.mrf.mxu2  ;;  %v6899_v57 = vmax.f32 %v5124_v50, 0.0  ;;  %v6901_v13 = vld [vmem:[#allocation23_spill] sm:$0xff] }
 0x3bf   : > { %v1203_v25 = vadd.f32 %v6901_v13, %v4420_v19  ;;  %v5235_v50 = vadd.f32 %v6906_v17, %v1332_v26 }
 0x3c0   : > { %v1712_v36 = vmax.f32 %v6891_v37, %v6890_v23  ;;  %v1580_v47 = vmax.f32 %v1409_v31, 0.0  ;;  %v3639_v23 = vld [vmem:[%s6696_s3 + $0x1a8] sm:$0xff]  ;;  %v6894_v31 = vmax.f32 %v5097_v49, 0.0  ;;  %v6895_v37 = vld [vmem:[#allocation30_spill] sm:$0xff] }
 0x3c1   : > { %v5187_v44 = vadd.f32 %v6895_v37, %v1326_v1  ;;  %1805 = vmatpush.msra.mxu0 %v3639_v23  ;;  %v3638_v1 = vld [vmem:[%s6696_s3 + $0x1a0] sm:$0xff]  ;;  %v6900_v23 = vmax.f32 %v5127_v22, 0.0  ;;  %v1567_v22 = vpop.f32.mrf.mxu3 }
 0x3c2   : > { %v1713_v9 = vmax.f32 %v1712_v36, %v6894_v31  ;;  %1861 = vmatmul.f32.gmra.mxu1 %v1580_v47  ;;  %v5199_v36 = vadd.f32 %v4953_v51, %v1350_v3  ;;  %v3637_v51 = vld [vmem:[%s6696_s3 + $0x198] sm:$0xff]  ;;  %v6904_v3 = vmax.f32 %v5066_v55, 0.0  ;;  %v3635_v55 = vld [vmem:[%s6696_s3 + $0x188] sm:$0xff] }
 0x3c3   : > { %v1725_v37 = vmax.f32 %v6734_v2, %v6900_v23  ;;  %1806 = vmatpush.msra.mxu0 %v3638_v1  ;;  %v6903_v23 = vmax.f32 %v4485_v10, 0.0  ;;  %v3636_v1 = vld [vmem:[%s6696_s3 + $0x190] sm:$0xff] }
 0x3c4   : > { %6898 = vst [vmem:[#allocation27_spill] sm:$0xff] %v5199_v36  ;;  %v1714_v31 = vmax.f32 %v1713_v9, %v6899_v57  ;;  %v5219_v9 = vadd.f32 %v5027_v8, %v1353_v62  ;;  %v1359_v57 = vadd.f32 %v1358_v60, %v4420_v19  ;;  %v6905_v8 = vmax.f32 %v4993_v52, 0.0 }
 0x3c5   : > { %v1664_v2 = vmax.f32 %v4900_v32, %v6903_v23  ;;  %v1411_v63 = vpop.f32.mrf.mxu0  ;;  %1807 = vmatpush.msra.mxu0 %v3637_v51  ;;  %v5238_v32 = vadd.f32 %v4904_v0, %v1335_v58  ;;  %v6907_v23 = vmax.f32 %v5156_v33, 0.0  ;;  %v6739_v13 = vmax.f32 %v5199_v36, 0.0 }
 0x3c6   : > { %6902 = vst [vmem:[#allocation22_spill] sm:$0xff] %v5219_v9  ;;  %v1647_v62 = vmax.f32 %v6905_v8, %v6904_v3  ;;  %v1412_v60 = vadd.f32 %v1411_v63, %v1203_v25  ;;  %v5247_v52 = vadd.f32 %v5129_v30, %v1356_v59  ;;  %v6909_v25 = vmax.f32 %v4928_v16, 0.0  ;;  %v6914_v59 = vld [vmem:[#allocation26_spill] sm:$0xff] }
 0x3c7   : > { %v1726_v49 = vmax.f32 %v1725_v37, %v6907_v23  ;;  %1808 = vmatpush.msra.mxu0 %v3636_v1  ;;  %v6910_v0 = vmax.f32 %v5177_v61, 0.0  ;;  %v6740_v37 = vmax.f32 %v5219_v9, 0.0  ;;  %v5255_v3 = vadd.f32 %v1567_v22, %v1359_v57  ;;  %v6913_v23 = vld [vmem:[#allocation18_spill] sm:$0xff] }
 0x3c8   : > { %6908 = vst [vmem:[#allocation19_spill] sm:$0xff] %v5247_v52  ;;  %v1638_v17 = vmax.f32 %v4922_v53, %v6909_v25  ;;  %v1648_v26 = vmax.f32 %v1647_v62, %v1580_v47  ;;  %v1581_v51 = vmax.f32 %v1412_v60, 0.0  ;;  %v6912_v63 = vmax.f32 %v4501_v24, 0.0  ;;  %v6918_v25 = vld [vmem:[#allocation25_spill] sm:$0xff] }
 0x3c9   : > { %v1727_v58 = vmax.f32 %v1726_v49, %v6910_v0  ;;  %6911 = vst [vmem:[#allocation28_spill] sm:$0xff] %v5255_v3  ;;  %v6743_v30 = vmax.f32 %v6913_v23, 0.0  ;;  %v1209_v16 = vadd.f32 %v6914_v59, %v4420_v19  ;;  %v6916_v53 = vmax.f32 %v6915_v29, 0.0  ;;  %1809 = vmatpush.msra.mxu0 %v3635_v55  ;;  %v3634_v49 = vld [vmem:[%s6696_s3 + $0x180] sm:$0xff]  ;;  %v6919_v55 = vld [vmem:[#allocation29_spill] sm:$0xff]  ;;  %v6923_v29 = vld [vmem:[#allocation8_spill] sm:$0xff] }
 0x3ca   : > { %v1665_v8 = vmax.f32 %v1664_v2, %v6912_v63  ;;  %v1649_v62 = vmax.f32 %v1648_v26, %v1581_v51  ;;  %1864 = vmatmul.f32.gmra.mxu1 %v1581_v51  ;;  %v6741_v22 = vmax.f32 %v5174_v6, 0.0  ;;  %v6917_v57 = vmax.f32 %v5187_v44, 0.0 }
 0x3cb   : > { %v1639_v47 = vmax.f32 %v1638_v17, %v6916_v53  ;;  %v6742_v1 = vmax.f32 %v5235_v50, 0.0  ;;  %v1728_v60 = vmax.f32 %v1727_v58, %v6739_v13  ;;  %v1206_v17 = vadd.f32 %v6918_v25, %v4420_v19  ;;  %1810 = vmatpush.msra.mxu0 %v3634_v49 }
 0x3cc   : > { %v1715_v2 = vmax.f32 %v1714_v31, %v6917_v57  ;;  %v1212_v26 = vadd.f32 %v6919_v55, %v4420_v19  ;;  %v6920_v51 = vmax.f32 %v4949_v43, 0.0  ;;  %v6921_v63 = vmax.f32 %v5190_v27, 0.0  ;;  %v6924_v43 = vld [vmem:[#allocation31_spill] sm:$0xff] }
 0x3cd   : > { %v6745_v59 = vmax.f32 %v5238_v32, 0.0  ;;  %v1729_v58 = vmax.f32 %v1728_v60, %v6740_v37  ;;  %v6922_v53 = vmax.f32 %v6872_v28, 0.0  ;;  %v1414_v13 = vpop.f32.mrf.mxu0  ;;  %v6747_v25 = vmax.f32 %v5255_v3, 0.0 }
 0x3ce   : > { %v1640_v0 = vmax.f32 %v1639_v47, %v6920_v51  ;;  %v1716_v31 = vmax.f32 %v1715_v2, %v6921_v63  ;;  %v1418_v55 = vadd.f32 %v6923_v29, %v1209_v16  ;;  %v1215_v47 = vadd.f32 %v6924_v43, %v4420_v19  ;;  %v6927_v43 = vld [vmem:[#allocation10_spill] sm:$0xff] }
 0x3cf   : > { %v1666_v57 = vmax.f32 %v1665_v8, %v6922_v53  ;;  %v1415_v49 = vadd.f32 %v1414_v13, %v1206_v17  ;;  %v1692_v2 = vmax.f32 %v5151_v14, %v6743_v30  ;;  %v1705_v60 = vmax.f32 %v5171_v42, %v6741_v22  ;;  %v6926_v53 = vld [vmem:[#allocation9_spill] sm:$0xff] }
 0x3d0   : > { %v1717_v8 = vmax.f32 %v1716_v31, %v6742_v1  ;;  %v6925_v51 = vmax.f32 %v5247_v52, 0.0  ;;  %v1421_v16 = vadd.f32 %v6926_v53, %v1212_v26  ;;  %v1641_v29 = vrot.slane %v1640_v0, 4 }
 0x3d1   : > { %v1582_v37 = vmax.f32 %v1415_v49, 0.0  ;;  %v1680_v19 = vrot.slane %v5104_v46, 4  ;;  %v1667_v14 = vrot.slane %v1666_v57, 4  ;;  %v1583_v42 = vmax.f32 %v1418_v55, 0.0 }
 0x3d2   : > { %v1730_v63 = vmax.f32 %v1729_v58, %v6925_v51  ;;  %v1718_v13 = vmax.f32 %v1717_v8, %v6745_v59  ;;  %v5308_v22 = vadd.f32 %v6927_v43, %v1215_v47  ;;  %v1693_v58 = vrot.slane %v1692_v2, 4 }
 0x3d3   : > { %v1650_v31 = vmax.f32 %v1649_v62, %v1582_v37  ;;  %1867 = vmatmul.f32.gmra.mxu1 %v1582_v37  ;;  %v1706_v51 = vrot.slane %v1705_v60, 4  ;;  %v1584_v26 = vmax.f32 %v1421_v16, 0.0  ;;  %v1642_v53 = vmax.f32 %v1640_v0, %v1641_v29 }
 0x3d4   : > { %v1731_v17 = vmax.f32 %v1730_v63, %v6747_v25  ;;  %v1719_v1 = vrot.slane %v1718_v13, 4  ;;  %v1668_v30 = vmax.f32 %v1666_v57, %v1667_v14  ;;  %v1681_v52 = vmax.f32 %v5104_v46, %v1680_v19 }
 0x3d5   : > { %v1651_v49 = vmax.f32 %v1650_v31, %v1583_v42  ;;  %v1585_v59 = vmax.f32 %v5308_v22, 0.0  ;;  %v1694_v63 = vmax.f32 %v1692_v2, %v1693_v58  ;;  %v1707_v55 = vmax.f32 %v1705_v60, %v1706_v51 }
 0x3d6   : > { %v1732_v8 = vrot.slane %v1731_v17, 4  ;;  %v1643_v25 = vrot.slane %v1642_v53, 2  ;;  %v1720_v43 = vmax.f32 %v1718_v13, %v1719_v1  ;;  %v1669_v62 = vrot.slane %v1668_v30, 2 }
 0x3d7   : > { %v1652_v3 = vmax.f32 %v1651_v49, %v1584_v26  ;;  %v1682_v37 = vrot.slane %v1681_v52, 2  ;;  %v1695_v0 = vrot.slane %v1694_v63, 2  ;;  %v1708_v16 = vrot.slane %v1707_v55, 2 }
 0x3d8   : > { %v1733_v9 = vmax.f32 %v1731_v17, %v1732_v8  ;;  %v1644_v29 = vmax.f32 %v1642_v53, %v1643_v25  ;;  %v1721_v14 = vrot.slane %v1720_v43, 2  ;;  %v1670_v46 = vmax.f32 %v1668_v30, %v1669_v62 }
 0x3d9   : > { %v1653_v47 = vmax.f32 %v1652_v3, %v1585_v59  ;;  %v1683_v19 = vmax.f32 %v1681_v52, %v1682_v37  ;;  %v1696_v49 = vmax.f32 %v1694_v63, %v1695_v0  ;;  %v1709_v2 = vmax.f32 %v1707_v55, %v1708_v16 }
 0x3da   : > { %v1734_v31 = vrot.slane %v1733_v9, 2  ;;  %v1645_v60 = vrot.slane %v1644_v29, 1  ;;  %v1722_v3 = vmax.f32 %v1720_v43, %v1721_v14  ;;  %v1671_v1 = vrot.slane %v1670_v46, 1 }
 0x3db   : > { %v1654_v36 = vrot.slane %v1653_v47, 4  ;;  %1870 = vmatmul.f32.gmra.mxu1 %v1583_v42  ;;  %v1684_v13 = vrot.slane %v1683_v19, 1  ;;  %v1697_v42 = vrot.slane %v1696_v49, 1  ;;  %v1710_v8 = vrot.slane %v1709_v2, 1 }
 0x3dc   : > { %v1735_v51 = vmax.f32 %v1733_v9, %v1734_v31  ;;  %v1646_v25 = vmax.f32 %v1644_v29, %v1645_v60  ;;  %v1723_v30 = vrot.slane %v1722_v3, 1  ;;  %v1672_v52 = vmax.f32 %v1670_v46, %v1671_v1  ;;  %v6928_v46 = vld [vmem:[#allocation35_spill] sm:$0xff] }
 0x3dd   : > { %v1655_v57 = vmax.f32 %v1653_v47, %v1654_v36  ;;  %v1685_v53 = vmax.f32 %v1683_v19, %v1684_v13  ;;  %v1698_v47 = vmax.f32 %v1696_v49, %v1697_v42  ;;  %v1711_v9 = vmax.f32 %v1709_v2, %v1710_v8 }
 0x3de   : > { %v1736_v63 = vrot.slane %v1735_v51, 1  ;;  %v1724_v62 = vmax.f32 %v1722_v3, %v1723_v30  ;;  %v6929_v19 = vmax.f32 %v6928_v46, 0.0  ;;  %v6934_v3 = vld [vmem:[#allocation13_spill] sm:$0xff]  ;;  %v6938_v8 = vmax.f32 %v4485_v10, 0.0  ;;  %v3665_v30 = vld [vmem:[%s6696_s3 + $0x278] sm:$0xff] }
 0x3df   : > { %v1656_v22 = vrot.slane %v1655_v57, 2  ;;  %v6935_v1 = vmax.f32 %v6934_v3, 0.0  ;;  %2350 = vmatpush.msrb.mxu3 %v3665_v30  ;;  %v6941_v10 = vmax.f32 %v4525_v20, 0.0  ;;  %v3661_v20 = vld [vmem:[%s6696_s3 + $0x258] sm:$0xff]  ;;  %v6946_v3 = vmax.f32 %v4561_v45, 0.0 }
 0x3e0   : > { %v1737_v0 = vmax.f32 %v1735_v51, %v1736_v63  ;;  %v6936_v51 = vld [vmem:[#allocation14_spill] sm:$0xff] }
 0x3e1   : > { %v1657_v58 = vmax.f32 %v1655_v57, %v1656_v22  ;;  %v6930_v22 = vld [vmem:[#allocation11_spill] sm:$0xff]  ;;  %v3681_v30 = vld [vmem:[%s6696_s3 + $0x2f8] sm:$0xff] }
 0x3e2   : > { %v6931_v49 = vmax.f32 %v6930_v22, 0.0  ;;  %v3654_v22 = vld [vmem:[%s6696_s3 + $0x220] sm:$0xff]  ;;  %2330 = vmatpush.msrb.mxu2 %v3681_v30 }
 0x3e3   : > { %v1658_v17 = vrot.slane %v1657_v58, 1  ;;  %1873 = vmatmul.f32.gmra.mxu1 %v1584_v26 }
 0x3e5   : > { %v1659_v36 = vmax.f32 %v1657_v58, %v1658_v17  ;;  %v6937_v17 = vmax.f32 %v6936_v51, 0.0 }
 0x3e7   : > { %v1781_v55 = vsel %vm1780_vm2, %v1659_v36, %v1646_v25  ;;  %v6939_v36 = vmax.f32 %v4501_v24, 0.0  ;;  %v3664_v24 = vld [vmem:[%s6696_s3 + $0x270] sm:$0xff] }
 0x3e8   : > { %v1783_v43 = vsel %vm1782_vm3, %v1672_v52, %v1781_v55  ;;  %2351 = vmatpush.msrb.mxu3 %v3664_v24 }
 0x3e9   : > { %v1785_v26 = vsel %vm1784_vm4, %v1685_v53, %v1783_v43  ;;  %v6940_v53 = vmax.f32 %v6872_v28, 0.0  ;;  %v3662_v28 = vld [vmem:[%s6696_s3 + $0x260] sm:$0xff]  ;;  %v6942_v43 = vld [vmem:[#allocation16_spill] sm:$0xff] }
 0x3ea   : > { %v1787_v37 = vsel %vm1786_vm5, %v1698_v47, %v1785_v26  ;;  %v3663_v47 = vld [vmem:[%s6696_s3 + $0x268] sm:$0xff]  ;;  %v3660_v26 = vld [vmem:[%s6696_s3 + $0x250] sm:$0xff] }
 0x3eb   : > { %1876 = vmatmul.f32.gmra.mxu1 %v1585_v59  ;;  %v1789_v16 = vsel %vm1788_vm6, %v1711_v9, %v1787_v37  ;;  %v6932_v59 = vld [vmem:[#allocation12_spill] sm:$0xff]  ;;  %2352 = vmatpush.msrb.mxu3 %v3663_v47  ;;  %v6943_v9 = vmax.f32 %v6942_v43, 0.0  ;;  %v6949_v47 = vmax.f32 %v4582_v54, 0.0  ;;  %v6950_v54 = vmax.f32 %v4604_v21, 0.0 }
 0x3ec   : > { %v1791_v29 = vsel %vm1790_vm7, %v1724_v62, %v1789_v16  ;;  %v6933_v60 = vmax.f32 %v6932_v59, 0.0  ;;  %v3659_v37 = vld [vmem:[%s6696_s3 + $0x248] sm:$0xff]  ;;  %v6944_v16 = vmax.f32 %v4546_v35, 0.0  ;;  %v6945_v35 = vmax.f32 %v4554_v56, 0.0  ;;  %v3652_v59 = vld [vmem:[%s6696_s3 + $0x210] sm:$0xff] }
 0x3ed   : > { %v1793_v57 = vsel %vm1792_vm8, %v1737_v0, %v1791_v29  ;;  %2353 = vmatpush.msrb.mxu3 %v3662_v28  ;;  %v3658_v0 = vld [vmem:[%s6696_s3 + $0x240] sm:$0xff]  ;;  %v3657_v29 = vld [vmem:[%s6696_s3 + $0x238] sm:$0xff]  ;;  %v3651_v56 = vld [vmem:[%s6696_s3 + $0x208] sm:$0xff] }
 0x3ee   : > { %1811 = vmatmul.f32.vlgmr.msra.gmra.mxu0 %v1793_v57  ;;  %v3656_v57 = vld [vmem:[%s6696_s3 + $0x230] sm:$0xff] }
 0x3ef   : > { %v5319_v14 = vpop.f32.mrf.mxu1  ;;  %2354 = vmatpush.msrb.mxu3 %v3661_v20 }
 0x3f1   : > { %2355 = vmatpush.msrb.mxu3 %v3660_v26 }
 0x3f3   : > { %1879 = vmatmul.f32.gmra.mxu1 %v6929_v19  ;;  %2356 = vmatpush.msrb.mxu3 %v3659_v37  ;;  %v3655_v19 = vld [vmem:[%s6696_s3 + $0x228] sm:$0xff] }
 0x3f5   : > { %2357 = vmatpush.msrb.mxu3 %v3658_v0 }
 0x3f7   : > { %v5323_v31 = vpop.f32.mrf.mxu1  ;;  %2358 = vmatpush.msrb.mxu3 %v3657_v29 }
 0x3f9   : > { %2359 = vmatpush.msrb.mxu3 %v3656_v57 }
 0x3fb   : > { %1882 = vmatmul.f32.gmra.mxu1 %v6931_v49  ;;  %2360 = vmatpush.msrb.mxu3 %v3655_v19  ;;  %v3653_v49 = vld [vmem:[%s6696_s3 + $0x218] sm:$0xff] }
 0x3fd   : > { %2361 = vmatpush.msrb.mxu3 %v3654_v22 }
 0x3ff   : > { %v5327_v2 = vpop.f32.mrf.mxu1  ;;  %2362 = vmatpush.msrb.mxu3 %v3653_v49 }
 0x401   : > { %2363 = vmatpush.msrb.mxu3 %v3652_v59 }
 0x403   : > { %1885 = vmatmul.f32.gmra.mxu1 %v6933_v60  ;;  %2364 = vmatpush.msrb.mxu3 %v3651_v56 }
 0x407   : > { %v5331_v58 = vpop.f32.mrf.mxu1 }
 0x40b   : > { %1888 = vmatmul.f32.gmra.mxu1 %v6935_v1  ;;  %v3650_v1 = vld [vmem:[%s6696_s3 + $0x200] sm:$0xff] }
 0x40c   : > { %2365 = vmatpush.msrb.mxu3 %v3650_v1 }
 0x40f   : > { %v5335_v13 = vpop.f32.mrf.mxu1 }
 0x413   : > { %1891 = vmatmul.f32.gmra.mxu1 %v6937_v17  ;;  %v6947_v17 = vmax.f32 %v4567_v41, 0.0 }
 0x417   : > { %v5339_v42 = vpop.f32.mrf.mxu1 }
 0x41b   : > { %1894 = vmatmul.f32.gmra.mxu1 %v6938_v8 }
 0x41f   : > { %v5343_v25 = vpop.f32.mrf.mxu1 }
 0x423   : > { %1897 = vmatmul.f32.gmra.mxu1 %v6939_v36  ;;  %v6948_v36 = vmax.f32 %v4576_v12, 0.0 }
 0x427   : > { %v5350_v52 = vpop.f32.mrf.mxu1 }
 0x42b   : > { %1900 = vmatmul.f32.gmra.mxu1 %v6940_v53  ;;  %v3831_v53 = vld [vmem:[%s6697_s4] sm:$0xf] }
 0x42f   : > { %v5354_v63 = vpop.f32.mrf.mxu1 }
 0x433   : > { %1903 = vmatmul.f32.gmra.mxu1 %v6941_v10  ;;  %v1771_v10 = vperm.slane %v3831_v53, 1 }
 0x437   : > { %v5361_v55 = vpop.f32.mrf.mxu1 }
 0x43b   : > { %1906 = vmatmul.f32.gmra.mxu1 %v6943_v9 }
 0x43f   : > { %v1862_v62 = vpop.f32.mrf.mxu1 }
 0x443   : > { %1909 = vmatmul.f32.gmra.mxu1 %v6944_v16 }
 0x447   : > { %v1865_v46 = vpop.f32.mrf.mxu1 }
 0x44b   : > { %1912 = vmatmul.f32.gmra.mxu1 %v6945_v35 }
 0x450   : > { %v1868_v60 = vpop.f32.mrf.mxu1 }
 0x453   : > { %1915 = vmatmul.f32.gmra.mxu1 %v6946_v3 }
 0x458   : > { %v1871_v51 = vpop.f32.mrf.mxu1 }
 0x45b   : > { %1918 = vmatmul.f32.gmra.mxu1 %v6947_v17 }
 0x460   : > { %v1874_v8 = vpop.f32.mrf.mxu1 }
 0x463   : > { %1921 = vmatmul.f32.gmra.mxu1 %v6948_v36  ;;  %v6951_v36 = vmax.f32 %v4623_v11, 0.0 }
 0x468   : > { %v1877_v45 = vpop.f32.mrf.mxu1 }
 0x46b   : > { %v1812_v24 = vpop.f32.mrf.mxu0  ;;  %1924 = vmatmul.f32.gmra.mxu1 %v6949_v47 }
 0x46c   : > { %v5425_v41 = vadd.f32 %v1812_v24, %v1771_v10 }
 0x46e   : > { %v2025_v12 = vrot.slane %v5425_v41, 1  ;;  %v2032_v28 = vperm.slane %v5425_v41, 0 }
 0x470   : > { %v5429_v43 = vpop.f32.mrf.mxu1  ;;  %v2033_v9 = vperm.slane %v2025_v12, 0  ;;  %v2048_v20 = vadd.f32 %v2032_v28, %v5319_v14  ;;  %v2049_v26 = vadd.f32 %v2032_v28, %v5323_v31  ;;  %v2050_v37 = vadd.f32 %v2032_v28, %v5327_v2 }
 0x471   : > { %v2051_v0 = vadd.f32 %v2032_v28, %v5331_v58  ;;  %v5438_v57 = vadd.f32 %v2032_v28, %v5335_v13  ;;  %v5447_v2 = vadd.f32 %v2032_v28, %v5339_v42 }
 0x472   : > { %v2112_v16 = vmax.f32 %v2048_v20, 0.0  ;;  %v2113_v29 = vmax.f32 %v2049_v26, 0.0  ;;  %v2114_v35 = vmax.f32 %v2050_v37, 0.0  ;;  %v5441_v22 = vadd.f32 %v2033_v9, %v5354_v63 }
 0x473   : > { %1927 = vmatmul.f32.gmra.mxu1 %v6950_v54  ;;  %v5444_v14 = vadd.f32 %v2033_v9, %v5361_v55  ;;  %v2115_v31 = vmax.f32 %v2051_v0, 0.0  ;;  %v5449_v21 = vadd.f32 %v2033_v9, %v1862_v62  ;;  %v5453_v59 = vadd.f32 %v2033_v9, %v1865_v46 }
 0x474   : > { %2366 = vmatmul.f32.vlgmr.msrb.gmra.mxu3 %v2112_v16  ;;  %v2176_v19 = vmax.f32 %v2112_v16, %v2113_v29  ;;  %v2120_v49 = vmax.f32 %v5441_v22, 0.0  ;;  %v2116_v63 = vmax.f32 %v5438_v57, 0.0  ;;  %v2054_v55 = vadd.f32 %v2032_v28, %v5343_v25 }
 0x475   : > { %v2121_v13 = vmax.f32 %v5444_v14, 0.0  ;;  %v2122_v62 = vmax.f32 %v5449_v21, 0.0  ;;  %v5464_v1 = vadd.f32 %v2033_v9, %v1868_v60  ;;  %v2117_v17 = vmax.f32 %v5447_v2, 0.0  ;;  %v3680_v60 = vld [vmem:[%s6696_s3 + $0x2f0] sm:$0xff] }
 0x476   : > { %v2177_v58 = vmax.f32 %v2176_v19, %v2114_v35  ;;  %v2055_v46 = vadd.f32 %v2032_v28, %v5350_v52  ;;  %v2123_v53 = vmax.f32 %v5453_v59, 0.0  ;;  %v5473_v10 = vadd.f32 %v2033_v9, %v1871_v51  ;;  %2331 = vmatpush.msrb.mxu2 %v3680_v60 }
 0x477   : > { %v2189_v42 = vmax.f32 %v2120_v49, %v2121_v13  ;;  %v2118_v24 = vmax.f32 %v2054_v55, 0.0  ;;  %v2124_v11 = vmax.f32 %v5464_v1, 0.0  ;;  %v5481_v12 = vadd.f32 %v2033_v9, %v1874_v8 }
 0x478   : > { %v5455_v56 = vpop.f32.mrf.mxu1  ;;  %v2178_v3 = vmax.f32 %v2177_v58, %v2115_v31  ;;  %v2119_v28 = vmax.f32 %v2055_v46, 0.0  ;;  %v2125_v26 = vmax.f32 %v5473_v10, 0.0  ;;  %v5486_v37 = vadd.f32 %v2033_v9, %v1877_v45 }
 0x479   : > { %v2190_v25 = vmax.f32 %v2189_v42, %v2122_v62  ;;  %v6952_v57 = vmax.f32 %v4642_v18, 0.0  ;;  %v6968_v59 = vmax.f32 %v5075_v38, 0.0  ;;  %v3675_v38 = vld [vmem:[%s6696_s3 + $0x2c8] sm:$0xff] }
 0x47a   : > { %v2179_v30 = vmax.f32 %v2178_v3, %v2116_v63  ;;  %v2127_v2 = vmax.f32 %v5486_v37, 0.0 }
 0x47b   : > { %1930 = vmatmul.f32.gmra.mxu1 %v6951_v36  ;;  %v2191_v52 = vmax.f32 %v2190_v25, %v2123_v53  ;;  %v6953_v36 = vmax.f32 %v4661_v48, 0.0  ;;  %v3679_v48 = vld [vmem:[%s6696_s3 + $0x2e8] sm:$0xff] }
 0x47c   : > { %2369 = vmatmul.f32.gmra.mxu3 %v2113_v29  ;;  %v2180_v47 = vmax.f32 %v2179_v30, %v2117_v17  ;;  %v2126_v29 = vmax.f32 %v5481_v12, 0.0  ;;  %2332 = vmatpush.msrb.mxu2 %v3679_v48 }
 0x47d   : > { %v2192_v51 = vmax.f32 %v2191_v52, %v2124_v11  ;;  %v6954_v52 = vmax.f32 %v4668_v5, 0.0  ;;  %v6956_v5 = vmax.f32 %v6877_v40, 0.0 }
 0x47e   : > { %v2181_v20 = vmax.f32 %v2180_v47, %v2118_v24 }
 0x47f   : > { %v2193_v16 = vmax.f32 %v2192_v51, %v2125_v26 }
 0x480   : > { %v5488_v0 = vpop.f32.mrf.mxu1  ;;  %v2182_v54 = vmax.f32 %v2181_v20, %v2119_v28 }
 0x481   : > { %v2194_v19 = vmax.f32 %v2193_v16, %v2126_v29 }
 0x482   : > { %v2183_v8 = vrot.slane %v2182_v54, 4 }
 0x483   : > { %1933 = vmatmul.f32.gmra.mxu1 %v6952_v57  ;;  %v2195_v55 = vmax.f32 %v2194_v19, %v2127_v2 }
 0x484   : > { %2372 = vmatmul.f32.gmra.mxu3 %v2114_v35  ;;  %v2184_v58 = vmax.f32 %v2182_v54, %v2183_v8  ;;  %v3678_v54 = vld [vmem:[%s6696_s3 + $0x2e0] sm:$0xff] }
 0x485   : > { %v2196_v42 = vrot.slane %v2195_v55, 4  ;;  %2333 = vmatpush.msrb.mxu2 %v3678_v54 }
 0x486   : > { %v2185_v3 = vrot.slane %v2184_v58, 2 }
 0x487   : > { %v2197_v46 = vmax.f32 %v2195_v55, %v2196_v42 }
 0x488   : > { %v5494_v45 = vpop.f32.mrf.mxu1  ;;  %v2186_v9 = vmax.f32 %v2184_v58, %v2185_v3  ;;  %v3676_v58 = vld [vmem:[%s6696_s3 + $0x2d0] sm:$0xff] }
 0x489   : > { %v2198_v30 = vrot.slane %v2197_v46, 2 }
 0x48a   : > { %v2187_v18 = vrot.slane %v2186_v9, 1 }
 0x48b   : > { %1936 = vmatmul.f32.gmra.mxu1 %v6953_v36  ;;  %v2199_v25 = vmax.f32 %v2197_v46, %v2198_v30 }
 0x48c   : > { %2375 = vmatmul.f32.gmra.mxu3 %v2115_v31  ;;  %v2188_v47 = vmax.f32 %v2186_v9, %v2187_v18  ;;  %v6955_v31 = vmax.f32 %v4675_v7, 0.0  ;;  %v6970_v9 = vmax.f32 %v5094_v34, 0.0 }
 0x48d   : > { %v2200_v10 = vrot.slane %v2199_v25, 1 }
 0x48f   : > { %v2201_v35 = vmax.f32 %v2199_v25, %v2200_v10  ;;  %v6972_v25 = vld [vmem:[#allocation15_spill] sm:$0xff] }
 0x490   : > { %v5498_v60 = vpop.f32.mrf.mxu1  ;;  %v6973_v10 = vmax.f32 %v6972_v25, 0.0 }
 0x491   : > { %v5503_v12 = vsel %vm1780_vm2, %v2201_v35, %v2188_v47  ;;  %v2027_v47 = vrot.slane %v5425_v41, 3 }
 0x493   : > { %1939 = vmatmul.f32.gmra.mxu1 %v6954_v52  ;;  %v2035_v35 = vperm.slane %v2027_v47, 0 }
 0x494   : > { %2378 = vmatmul.f32.gmra.mxu3 %v2116_v63  ;;  %v6957_v63 = vmax.f32 %v6913_v23, 0.0 }
 0x498   : > { %v5505_v20 = vpop.f32.mrf.mxu1 }
 0x49b   : > { %1942 = vmatmul.f32.gmra.mxu1 %v6955_v31 }
 0x49c   : > { %2381 = vmatmul.f32.gmra.mxu3 %v2117_v17  ;;  %v6958_v17 = vmax.f32 %v4989_v39, 0.0  ;;  %v3677_v39 = vld [vmem:[%s6696_s3 + $0x2d8] sm:$0xff] }
 0x49d   : > { %2334 = vmatpush.msrb.mxu2 %v3677_v39 }
 0x49f   : > { %2335 = vmatpush.msrb.mxu2 %v3676_v58 }
 0x4a0   : > { %v5512_v51 = vpop.f32.mrf.mxu1 }
 0x4a1   : > { %2336 = vmatpush.msrb.mxu2 %v3675_v38 }
 0x4a3   : > { %1945 = vmatmul.f32.gmra.mxu1 %v6956_v5 }
 0x4a4   : > { %2384 = vmatmul.f32.gmra.mxu3 %v2118_v24  ;;  %v6959_v24 = vld [vmem:[#allocation38_spill] sm:$0xff] }
 0x4a5   : > { %v6960_v16 = vmax.f32 %v6959_v24, 0.0 }
 0x4a8   : > { %v5516_v37 = vpop.f32.mrf.mxu1 }
 0x4ab   : > { %1948 = vmatmul.f32.gmra.mxu1 %v6957_v63 }
 0x4ac   : > { %2387 = vmatmul.f32.gmra.mxu3 %v2119_v28  ;;  %v6961_v28 = vld [vmem:[#allocation39_spill] sm:$0xff] }
 0x4ad   : > { %v6962_v57 = vmax.f32 %v6961_v28, 0.0 }
 0x4b0   : > { %v1904_v7 = vpop.f32.mrf.mxu1 }
 0x4b1   : > { %v5582_v63 = vadd.f32 %v2035_v35, %v1904_v7 }
 0x4b3   : > { %1951 = vmatmul.f32.gmra.mxu1 %v6958_v17 }
 0x4b4   : > { %2390 = vmatmul.f32.gmra.mxu3 %v2120_v49  ;;  %v6963_v49 = vld [vmem:[#allocation40_spill] sm:$0xff] }
 0x4b5   : > { %v6964_v8 = vmax.f32 %v6963_v49, 0.0 }
 0x4b8   : > { %v1907_v40 = vpop.f32.mrf.mxu1 }
 0x4b9   : > { %v5578_v48 = vadd.f32 %v2035_v35, %v1907_v40 }
 0x4bb   : > { %1954 = vmatmul.f32.gmra.mxu1 %v6960_v16  ;;  %v2137_v17 = vmax.f32 %v5578_v48, 0.0  ;;  %v2136_v16 = vmax.f32 %v5582_v63, 0.0  ;;  %v6982_v63 = vld [vmem:[#allocation24_spill] sm:$0xff] }
 0x4bc   : > { %2393 = vmatmul.f32.gmra.mxu3 %v2121_v13  ;;  %v6965_v13 = vld [vmem:[#allocation41_spill] sm:$0xff] }
 0x4bd   : > { %v6966_v19 = vmax.f32 %v6965_v13, 0.0 }
 0x4c0   : > { %v1910_v23 = vpop.f32.mrf.mxu1 }
 0x4c1   : > { %v5584_v54 = vadd.f32 %v2035_v35, %v1910_v23 }
 0x4c3   : > { %1957 = vmatmul.f32.gmra.mxu1 %v6962_v57  ;;  %v2138_v40 = vmax.f32 %v5584_v54, 0.0 }
 0x4c4   : > { %2396 = vmatmul.f32.gmra.mxu3 %v2122_v62  ;;  %v6967_v62 = vmax.f32 %v5072_v15, 0.0 }
 0x4c8   : > { %v1913_v22 = vpop.f32.mrf.mxu1 }
 0x4c9   : > { %v5587_v24 = vadd.f32 %v2035_v35, %v1913_v22  ;;  %v2215_v22 = vmax.f32 %v2136_v16, %v2137_v17 }
 0x4cb   : > { %1960 = vmatmul.f32.gmra.mxu1 %v6964_v8  ;;  %v2139_v49 = vmax.f32 %v5587_v24, 0.0  ;;  %v2028_v8 = vrot.slane %v5425_v41, 4 }
 0x4cc   : > { %2399 = vmatmul.f32.gmra.mxu3 %v2123_v53  ;;  %v2026_v53 = vrot.slane %v5425_v41, 2 }
 0x4ce   : > { %v2034_v1 = vperm.slane %v2026_v53, 0 }
 0x4d0   : > { %v1916_v14 = vpop.f32.mrf.mxu1  ;;  %v2064_v15 = vadd.f32 %v2034_v1, %v5429_v43  ;;  %v6971_v43 = vmax.f32 %v5081_v4, 0.0  ;;  %v2066_v36 = vadd.f32 %v2034_v1, %v5488_v0  ;;  %v6974_v0 = vld [vmem:[#allocation21_spill] sm:$0xff]  ;;  %v2069_v23 = vadd.f32 %v2034_v1, %v5505_v20 }
 0x4d1   : > { %v6975_v5 = vmax.f32 %v6974_v0, 0.0  ;;  %v5592_v28 = vadd.f32 %v2035_v35, %v1916_v14  ;;  %v2216_v20 = vmax.f32 %v2215_v22, %v2138_v40 }
 0x4d2   : > { %v2128_v42 = vmax.f32 %v2064_v15, 0.0  ;;  %v2130_v18 = vmax.f32 %v2066_v36, 0.0 }
 0x4d3   : > { %1963 = vmatmul.f32.gmra.mxu1 %v6966_v19  ;;  %v2070_v19 = vadd.f32 %v2034_v1, %v5512_v51  ;;  %v2140_v58 = vmax.f32 %v5592_v28, 0.0  ;;  %v2217_v15 = vmax.f32 %v2216_v20, %v2139_v49  ;;  %v6978_v20 = vmax.f32 %v5235_v50, 0.0 }
 0x4d4   : > { %2402 = vmatmul.f32.gmra.mxu3 %v2124_v11  ;;  %v6969_v11 = vmax.f32 %v5174_v6, 0.0 }
 0x4d5   : > { %v2134_v38 = vmax.f32 %v2070_v19, 0.0 }
 0x4d8   : > { %v1919_v21 = vpop.f32.mrf.mxu1 }
 0x4db   : > { %1966 = vmatmul.f32.gmra.mxu1 %v6967_v62  ;;  %v6976_v62 = vmax.f32 %v5187_v44, 0.0 }
 0x4dc   : > { %2405 = vmatmul.f32.gmra.mxu3 %v2125_v26 }
 0x4e0   : > { %v1922_v55 = vpop.f32.mrf.mxu1 }
 0x4e3   : > { %1969 = vmatmul.f32.gmra.mxu1 %v6968_v59  ;;  %v5611_v59 = vadd.f32 %v2035_v35, %v1922_v55  ;;  %v2218_v55 = vmax.f32 %v2217_v15, %v2140_v58  ;;  %v3673_v15 = vld [vmem:[%s6696_s3 + $0x2b8] sm:$0xff] }
 0x4e4   : > { %2408 = vmatmul.f32.gmra.mxu3 %v2126_v29  ;;  %v2065_v29 = vadd.f32 %v2034_v1, %v5455_v56  ;;  %v2067_v56 = vadd.f32 %v2034_v1, %v5494_v45  ;;  %v2068_v45 = vadd.f32 %v2034_v1, %v5498_v60  ;;  %v5602_v60 = vadd.f32 %v2035_v35, %v1919_v21 }
 0x4e5   : > { %v5614_v21 = vadd.f32 %v2034_v1, %v5516_v37 }
 0x4e6   : > { %v2131_v31 = vmax.f32 %v2067_v56, 0.0  ;;  %v2132_v14 = vmax.f32 %v2068_v45, 0.0  ;;  %v2141_v51 = vmax.f32 %v5602_v60, 0.0  ;;  %v3670_v60 = vld [vmem:[%s6696_s3 + $0x2a0] sm:$0xff] }
 0x4e8   : > { %v1925_v3 = vpop.f32.mrf.mxu1 }
 0x4e9   : > { %v5619_v44 = vadd.f32 %v2035_v35, %v1925_v3  ;;  %v3674_v3 = vld [vmem:[%s6696_s3 + $0x2c0] sm:$0xff]  ;;  %v6977_v35 = vmax.f32 %v5190_v27, 0.0 }
 0x4ea   : > { %2337 = vmatpush.msrb.mxu2 %v3674_v3 }
 0x4eb   : > { %1972 = vmatmul.f32.gmra.mxu1 %v6969_v11  ;;  %v2133_v11 = vmax.f32 %v2069_v23, 0.0  ;;  %v2143_v25 = vmax.f32 %v5619_v44, 0.0 }
 0x4ec   : > { %2411 = vmatmul.f32.gmra.mxu3 %v2127_v2  ;;  %v2129_v2 = vmax.f32 %v2065_v29, 0.0  ;;  %v2142_v29 = vmax.f32 %v5611_v59, 0.0  ;;  %2338 = vmatpush.msrb.mxu2 %v3673_v15 }
 0x4ee   : > { %v2202_v7 = vmax.f32 %v2128_v42, %v2129_v2 }
 0x4f0   : > { %v5557_v26 = vpop.f32.mrf.mxu1  ;;  %v2203_v13 = vmax.f32 %v2202_v7, %v2130_v18 }
 0x4f2   : > { %v2204_v53 = vmax.f32 %v2203_v13, %v2131_v31 }
 0x4f3   : > { %1975 = vmatmul.f32.gmra.mxu1 %v6970_v9 }
 0x4f4   : > { %2414 = vmatmul.f32.gmra.mxu3 %v2128_v42  ;;  %v2036_v42 = vperm.slane %v2028_v8, 0  ;;  %v2205_v9 = vmax.f32 %v2204_v53, %v2132_v14 }
 0x4f6   : > { %v2206_v1 = vmax.f32 %v2205_v9, %v2133_v11  ;;  %v5636_v47 = vadd.f32 %v2036_v42, %v5557_v26 }
 0x4f7   : > { %v5565_v46 = vpop.f32.mrf.mxu3 }
 0x4f8   : > { %v1931_v6 = vpop.f32.mrf.mxu1  ;;  %v2144_v26 = vmax.f32 %v5636_v47, 0.0 }
 0x4f9   : > { %v5627_v36 = vadd.f32 %v2036_v42, %v1931_v6 }
 0x4fb   : > { %1978 = vmatmul.f32.gmra.mxu1 %v6971_v43  ;;  %v2135_v43 = vmax.f32 %v5614_v21, 0.0  ;;  %v2145_v0 = vmax.f32 %v5627_v36, 0.0 }
 0x4fc   : > { %2417 = vmatmul.f32.gmra.mxu3 %v2129_v2 }
 0x4ff   : > { %v5570_v34 = vpop.f32.mrf.mxu3 }
 0x500   : > { %v1934_v30 = vpop.f32.mrf.mxu1 }
 0x501   : > { %v5638_v56 = vadd.f32 %v2036_v42, %v1934_v30 }
 0x503   : > { %1981 = vmatmul.f32.gmra.mxu1 %v6973_v10  ;;  %v2207_v10 = vmax.f32 %v2206_v1, %v2134_v38  ;;  %v2146_v30 = vmax.f32 %v5638_v56, 0.0 }
 0x504   : > { %2420 = vmatmul.f32.gmra.mxu3 %v2130_v18  ;;  %v2219_v18 = vmax.f32 %v2218_v55, %v2141_v51 }
 0x506   : > { %v2220_v6 = vmax.f32 %v2219_v18, %v2142_v29 }
 0x507   : > { %v5576_v52 = vpop.f32.mrf.mxu3 }
 0x508   : > { %v1937_v4 = vpop.f32.mrf.mxu1  ;;  %v2221_v45 = vmax.f32 %v2220_v6, %v2143_v25 }
 0x50b   : > { %1984 = vmatmul.f32.gmra.mxu1 %v6975_v5  ;;  %v5645_v5 = vadd.f32 %v2036_v42, %v1937_v4  ;;  %v2228_v4 = vmax.f32 %v2144_v26, %v2145_v0 }
 0x50c   : > { %2423 = vmatmul.f32.gmra.mxu3 %v2131_v31  ;;  %v2208_v31 = vmax.f32 %v2207_v10, %v2135_v43 }
 0x50d   : > { %v2147_v8 = vmax.f32 %v5645_v5, 0.0  ;;  %v2229_v19 = vmax.f32 %v2228_v4, %v2146_v30  ;;  %v3668_v5 = vld [vmem:[%s6696_s3 + $0x290] sm:$0xff] }
 0x50e   : > { %v2209_v22 = vrot.slane %v2208_v31, 4 }
 0x50f   : > { %v5594_v57 = vpop.f32.mrf.mxu3 }
 0x510   : > { %v1940_v39 = vpop.f32.mrf.mxu1  ;;  %v2210_v53 = vmax.f32 %v2208_v31, %v2209_v22 }
 0x511   : > { %v5651_v7 = vadd.f32 %v2036_v42, %v1940_v39 }
 0x512   : > { %v2211_v3 = vrot.slane %v2210_v53, 2 }
 0x513   : > { %1987 = vmatmul.f32.gmra.mxu1 %v6976_v62  ;;  %v2148_v39 = vmax.f32 %v5651_v7, 0.0 }
 0x514   : > { %2426 = vmatmul.f32.gmra.mxu3 %v2132_v14  ;;  %v2222_v14 = vrot.slane %v2221_v45, 4 }
 0x516   : > { %v2223_v9 = vmax.f32 %v2221_v45, %v2222_v14  ;;  %v6979_v45 = vmax.f32 %v5238_v32, 0.0 }
 0x517   : > { %v5624_v2 = vpop.f32.mrf.mxu3 }
 0x518   : > { %v1943_v37 = vpop.f32.mrf.mxu1 }
 0x519   : > { %v5660_v13 = vadd.f32 %v2036_v42, %v1943_v37 }
 0x51b   : > { %1990 = vmatmul.f32.gmra.mxu1 %v6977_v35  ;;  %v2149_v21 = vmax.f32 %v5660_v13, 0.0  ;;  %v2029_v35 = vrot.slane %v5425_v41, 5 }
 0x51c   : > { %2429 = vmatmul.f32.gmra.mxu3 %v2133_v11  ;;  %v2230_v11 = vmax.f32 %v2229_v19, %v2147_v8 }
 0x51e   : > { %v2231_v55 = vmax.f32 %v2230_v11, %v2148_v39 }
 0x51f   : > { %v5653_v27 = vpop.f32.mrf.mxu3 }
 0x520   : > { %v1946_v23 = vpop.f32.mrf.mxu1  ;;  %v2232_v18 = vmax.f32 %v2231_v55, %v2149_v21 }
 0x521   : > { %v5665_v62 = vadd.f32 %v2036_v42, %v1946_v23  ;;  %v2212_v23 = vmax.f32 %v2210_v53, %v2211_v3 }
 0x523   : > { %1993 = vmatmul.f32.gmra.mxu1 %v6978_v20  ;;  %v2150_v37 = vmax.f32 %v5665_v62, 0.0  ;;  %v2213_v11 = vrot.slane %v2212_v23, 1 }
 0x524   : > { %2432 = vmatmul.f32.gmra.mxu3 %v2134_v38  ;;  %v2224_v38 = vrot.slane %v2223_v9, 2 }
 0x525   : > { %v2233_v6 = vmax.f32 %v2232_v18, %v2150_v37  ;;  %v6980_v18 = vld [vmem:[#allocation17_spill] sm:$0xff]  ;;  %v2214_v3 = vmax.f32 %v2212_v23, %v2213_v11 }
 0x526   : > { %v2225_v4 = vmax.f32 %v2223_v9, %v2224_v38  ;;  %v6981_v53 = vmax.f32 %v6980_v18, 0.0 }
 0x527   : > { %v5678_v50 = vpop.f32.mrf.mxu3 }
 0x528   : > { %v1949_v1 = vpop.f32.mrf.mxu1 }
 0x529   : > { %v5682_v10 = vadd.f32 %v2036_v42, %v1949_v1  ;;  %v5692_v42 = vperm.slane %v2029_v35, 0  ;;  %v2226_v1 = vrot.slane %v2225_v4, 1 }
 0x52b   : > { %v2151_v31 = vmax.f32 %v5682_v10, 0.0  ;;  %1996 = vmatmul.f32.gmra.mxu1 %v6979_v45 }
 0x52c   : > { %2435 = vmatmul.f32.gmra.mxu3 %v2135_v43  ;;  %v2227_v43 = vmax.f32 %v2225_v4, %v2226_v1 }
 0x52d   : > { %v2234_v22 = vmax.f32 %v2233_v6, %v2151_v31 }
 0x52f   : > { %v2235_v14 = vrot.slane %v2234_v22, 4  ;;  %v5694_v19 = vpop.f32.mrf.mxu3 }
 0x530   : > { %v1952_v20 = vpop.f32.mrf.mxu1 }
 0x531   : > { %v2236_v15 = vmax.f32 %v2234_v22, %v2235_v14  ;;  %v5697_v55 = vadd.f32 %v5692_v42, %v1952_v20  ;;  %v2323_v14 = vsel %vm1782_vm3, %v2214_v3, %v5503_v12  ;;  %v3672_v12 = vld [vmem:[%s6696_s3 + $0x2b0] sm:$0xff]  ;;  %v6984_v3 = vmax.f32 %v5156_v33, 0.0 }
 0x532   : > { %v2324_v20 = vsel %vm1784_vm4, %v2227_v43, %v2323_v14  ;;  %2339 = vmatpush.msrb.mxu2 %v3672_v12 }
 0x533   : > { %v2237_v32 = vrot.slane %v2236_v15, 2  ;;  %1999 = vmatmul.f32.gmra.mxu1 %v6981_v53  ;;  %v2152_v23 = vmax.f32 %v5697_v55, 0.0  ;;  %v3666_v55 = vld [vmem:[%s6696_s3 + $0x280] sm:$0xff] }
 0x534   : > { %2438 = vmatmul.f32.gmra.mxu3 %v2136_v16  ;;  %v6983_v16 = vmax.f32 %v6982_v63, 0.0 }
 0x535   : > { %v2238_v6 = vmax.f32 %v2236_v15, %v2237_v32 }
 0x537   : > { %v2239_v9 = vrot.slane %v2238_v6, 1  ;;  %v5703_v38 = vpop.f32.mrf.mxu3 }
 0x538   : > { %v1955_v35 = vpop.f32.mrf.mxu1 }
 0x539   : > { %v2240_v45 = vmax.f32 %v2238_v6, %v2239_v9  ;;  %v5706_v22 = vadd.f32 %v5692_v42, %v1955_v35  ;;  %v6985_v35 = vmax.f32 %v5177_v61, 0.0 }
 0x53b   : > { %v2153_v11 = vmax.f32 %v5706_v22, 0.0  ;;  %2002 = vmatmul.f32.gmra.mxu1 %v6983_v16  ;;  %v5716_v4 = vsel %vm1786_vm5, %v2240_v45, %v2324_v20  ;;  %v6986_v20 = vld [vmem:[#allocation27_spill] sm:$0xff] }
 0x53c   : > { %2441 = vmatmul.f32.gmra.mxu3 %v2137_v17  ;;  %v6987_v63 = vmax.f32 %v6986_v20, 0.0 }
 0x53d   : > { %v2241_v15 = vmax.f32 %v2152_v23, %v2153_v11 }
 0x53f   : > { %v5727_v1 = vpop.f32.mrf.mxu3 }
 0x540   : > { %v1958_v32 = vpop.f32.mrf.mxu1 }
 0x541   : > { %v5730_v18 = vadd.f32 %v5692_v42, %v1958_v32  ;;  %v6988_v32 = vld [vmem:[#allocation22_spill] sm:$0xff] }
 0x543   : > { %v2154_v53 = vmax.f32 %v5730_v18, 0.0  ;;  %2005 = vmatmul.f32.gmra.mxu1 %v6984_v3  ;;  %v6989_v3 = vmax.f32 %v6988_v32, 0.0  ;;  %v6992_v32 = vld [vmem:[#allocation28_spill] sm:$0xff] }
 0x544   : > { %2444 = vmatmul.f32.gmra.mxu3 %v2138_v40 }
 0x545   : > { %v2242_v48 = vmax.f32 %v2241_v15, %v2154_v53  ;;  %v3671_v15 = vld [vmem:[%s6696_s3 + $0x2a8] sm:$0xff] }
 0x546   : > { %2340 = vmatpush.msrb.mxu2 %v3671_v15 }
 0x547   : > { %v5739_v17 = vpop.f32.mrf.mxu3 }
 0x548   : > { %v1961_v6 = vpop.f32.mrf.mxu1  ;;  %2341 = vmatpush.msrb.mxu2 %v3670_v60 }
 0x549   : > { %v5742_v43 = vadd.f32 %v5692_v42, %v1961_v6 }
 0x54b   : > { %v2155_v9 = vmax.f32 %v5742_v43, 0.0  ;;  %2008 = vmatmul.f32.gmra.mxu1 %v6985_v35 }
 0x54c   : > { %2447 = vmatmul.f32.gmra.mxu3 %v2139_v49 }
 0x54d   : > { %v2243_v33 = vmax.f32 %v2242_v48, %v2155_v9 }
 0x54f   : > { %v5751_v45 = vpop.f32.mrf.mxu3 }
 0x550   : > { %v1964_v54 = vpop.f32.mrf.mxu1 }
 0x551   : > { %v5754_v40 = vadd.f32 %v5692_v42, %v1964_v54 }
 0x553   : > { %v2156_v14 = vmax.f32 %v5754_v40, 0.0  ;;  %2011 = vmatmul.f32.gmra.mxu1 %v6987_v63 }
 0x554   : > { %2450 = vmatmul.f32.gmra.mxu3 %v2140_v58 }
 0x555   : > { %v2244_v61 = vmax.f32 %v2243_v33, %v2156_v14  ;;  %v6990_v33 = vld [vmem:[#allocation19_spill] sm:$0xff] }
 0x556   : > { %v6991_v54 = vmax.f32 %v6990_v33, 0.0 }
 0x557   : > { %v5763_v16 = vpop.f32.mrf.mxu3 }
 0x558   : > { %v1967_v24 = vpop.f32.mrf.mxu1 }
 0x559   : > { %v5766_v49 = vadd.f32 %v5692_v42, %v1967_v24  ;;  %v2030_v24 = vrot.slane %v5425_v41, 6 }
 0x55b   : > { %v2157_v12 = vmax.f32 %v5766_v49, 0.0  ;;  %2014 = vmatmul.f32.gmra.mxu1 %v6989_v3  ;;  %v6993_v3 = vmax.f32 %v6992_v32, 0.0 }
 0x55c   : > { %2453 = vmatmul.f32.gmra.mxu3 %v2141_v51 }
 0x55d   : > { %v2245_v28 = vmax.f32 %v2244_v61, %v2157_v12 }
 0x55f   : > { %v5778_v58 = vpop.f32.mrf.mxu3 }
 0x560   : > { %v1970_v48 = vpop.f32.mrf.mxu1 }
 0x561   : > { %v5781_v6 = vadd.f32 %v5692_v42, %v1970_v48 }
 0x563   : > { %v2158_v35 = vmax.f32 %v5781_v6, 0.0  ;;  %2017 = vmatmul.f32.gmra.mxu1 %v6991_v54 }
 0x564   : > { %2456 = vmatmul.f32.gmra.mxu3 %v2142_v29 }
 0x565   : > { %v2246_v20 = vmax.f32 %v2245_v28, %v2158_v35  ;;  %v2038_v28 = vperm.slane %v2030_v24, 0 }
 0x567   : > { %v5793_v51 = vpop.f32.mrf.mxu3 }
 0x568   : > { %v1973_v63 = vpop.f32.mrf.mxu1 }
 0x569   : > { %v5796_v61 = vadd.f32 %v5692_v42, %v1973_v63 }
 0x56b   : > { %v6750_v15 = vmax.f32 %v5796_v61, 0.0  ;;  %2020 = vmatmul.f32.gmra.mxu1 %v6993_v3 }
 0x56c   : > { %2459 = vmatmul.f32.gmra.mxu3 %v2143_v25 }
 0x56d   : > { %v2247_v59 = vmax.f32 %v2246_v20, %v6750_v15 }
 0x56f   : > { %v2248_v29 = vrot.slane %v2247_v59, 4  ;;  %v5806_v48 = vpop.f32.mrf.mxu3 }
 0x570   : > { %v1976_v33 = vpop.f32.mrf.mxu1 }
 0x571   : > { %v2249_v42 = vmax.f32 %v2247_v59, %v2248_v29  ;;  %v5808_v54 = vadd.f32 %v2038_v28, %v1976_v33 }
 0x573   : > { %v2250_v60 = vrot.slane %v2249_v42, 2  ;;  %v6758_v25 = vmax.f32 %v5808_v54, 0.0 }
 0x574   : > { %2462 = vmatmul.f32.gmra.mxu3 %v2144_v26  ;;  %v3669_v26 = vld [vmem:[%s6696_s3 + $0x298] sm:$0xff] }
 0x575   : > { %v2251_v63 = vmax.f32 %v2249_v42, %v2250_v60  ;;  %2342 = vmatpush.msrb.mxu2 %v3669_v26 }
 0x577   : > { %v2252_v32 = vrot.slane %v2251_v63, 1  ;;  %v5812_v3 = vpop.f32.mrf.mxu3  ;;  %2343 = vmatpush.msrb.mxu2 %v3668_v5 }
 0x578   : > { %v1979_v20 = vpop.f32.mrf.mxu1 }
 0x579   : > { %v2253_v15 = vmax.f32 %v2251_v63, %v2252_v32  ;;  %v5814_v44 = vadd.f32 %v2038_v28, %v1979_v20 }
 0x57b   : > { %v6757_v24 = vmax.f32 %v5814_v44, 0.0  ;;  %v2326_v59 = vsel %vm1788_vm6, %v2253_v15, %v5716_v4 }
 0x57c   : > { %2465 = vmatmul.f32.gmra.mxu3 %v2145_v0 }
 0x57d   : > { %v2254_v47 = vmax.f32 %v6758_v25, %v6757_v24 }
 0x57f   : > { %v5829_v29 = vpop.f32.mrf.mxu3 }
 0x580   : > { %v1982_v33 = vpop.f32.mrf.mxu1 }
 0x581   : > { %v5831_v42 = vadd.f32 %v2038_v28, %v1982_v33 }
 0x583   : > { %v6756_v4 = vmax.f32 %v5831_v42, 0.0 }
 0x584   : > { %2468 = vmatmul.f32.gmra.mxu3 %v2146_v30 }
 0x585   : > { %v2255_v15 = vmax.f32 %v2254_v47, %v6756_v4 }
 0x587   : > { %v5838_v36 = vpop.f32.mrf.mxu3 }
 0x588   : > { %v1985_v0 = vpop.f32.mrf.mxu1 }
 0x589   : > { %v5840_v60 = vadd.f32 %v2038_v28, %v1985_v0 }
 0x58b   : > { %v6752_v63 = vmax.f32 %v5840_v60, 0.0 }
 0x58c   : > { %2471 = vmatmul.f32.gmra.mxu3 %v2147_v8 }
 0x58d   : > { %v2256_v32 = vmax.f32 %v2255_v15, %v6752_v63 }
 0x58f   : > { %v5847_v20 = vpop.f32.mrf.mxu3 }
 0x590   : > { %v1988_v26 = vpop.f32.mrf.mxu1 }
 0x591   : > { %v5849_v47 = vadd.f32 %v2038_v28, %v1988_v26 }
 0x593   : > { %v6751_v56 = vmax.f32 %v5849_v47, 0.0 }
 0x594   : > { %2474 = vmatmul.f32.gmra.mxu3 %v2148_v39 }
 0x595   : > { %v2257_v30 = vmax.f32 %v2256_v32, %v6751_v56 }
 0x597   : > { %v5856_v33 = vpop.f32.mrf.mxu3 }
 0x598   : > { %v1991_v0 = vpop.f32.mrf.mxu1 }
 0x599   : > { %v5858_v15 = vadd.f32 %v2038_v28, %v1991_v0 }
 0x59b   : > { %v6754_v8 = vmax.f32 %v5858_v15, 0.0 }
 0x59c   : > { %2477 = vmatmul.f32.gmra.mxu3 %v2149_v21 }
 0x59d   : > { %v2258_v26 = vmax.f32 %v2257_v30, %v6754_v8 }
 0x59f   : > { %v5868_v7 = vpop.f32.mrf.mxu3 }
 0x5a0   : > { %v1994_v39 = vpop.f32.mrf.mxu1 }
 0x5a1   : > { %v5870_v32 = vadd.f32 %v2038_v28, %v1994_v39 }
 0x5a3   : > { %v6753_v0 = vmax.f32 %v5870_v32, 0.0 }
 0x5a4   : > { %2480 = vmatmul.f32.gmra.mxu3 %v2150_v37 }
 0x5a5   : > { %v2259_v56 = vmax.f32 %v2258_v26, %v6753_v0  ;;  %v3667_v26 = vld [vmem:[%s6696_s3 + $0x288] sm:$0xff] }
 0x5a6   : > { %2344 = vmatpush.msrb.mxu2 %v3667_v26 }
 0x5a7   : > { %v5877_v5 = vpop.f32.mrf.mxu3 }
 0x5a8   : > { %v1997_v63 = vpop.f32.mrf.mxu1  ;;  %2345 = vmatpush.msrb.mxu2 %v3666_v55 }
 0x5a9   : > { %v5879_v30 = vadd.f32 %v2038_v28, %v1997_v63 }
 0x5ab   : > { %v6755_v13 = vmax.f32 %v5879_v30, 0.0 }
 0x5ac   : > { %2483 = vmatmul.f32.gmra.mxu3 %v2151_v31 }
 0x5ad   : > { %v2260_v21 = vmax.f32 %v2259_v56, %v6755_v13 }
 0x5af   : > { %v2261_v62 = vrot.slane %v2260_v21, 4  ;;  %v5889_v37 = vpop.f32.mrf.mxu3 }
 0x5b0   : > { %v2000_v39 = vpop.f32.mrf.mxu1 }
 0x5b1   : > { %v2262_v0 = vmax.f32 %v2260_v21, %v2261_v62 }
 0x5b3   : > { %v2263_v28 = vrot.slane %v2262_v0, 2 }
 0x5b4   : > { %2486 = vmatmul.f32.gmra.mxu3 %v2152_v23 }
 0x5b5   : > { %v2264_v63 = vmax.f32 %v2262_v0, %v2263_v28 }
 0x5b7   : > { %v2265_v8 = vrot.slane %v2264_v63, 1  ;;  %v5893_v56 = vpop.f32.mrf.mxu3 }
 0x5b8   : > { %v2003_v10 = vpop.f32.mrf.mxu1 }
 0x5b9   : > { %v2266_v31 = vmax.f32 %v2264_v63, %v2265_v8 }
 0x5bb   : > { %v2327_v13 = vsel %vm1790_vm7, %v2266_v31, %v2326_v59 }
 0x5bc   : > { %2489 = vmatmul.f32.gmra.mxu3 %v2153_v11  ;;  %v2031_v11 = vrot.slane %v5425_v41, 7 }
 0x5be   : > { %v2039_v18 = vperm.slane %v2031_v11, 0 }
 0x5bf   : > { %v5898_v26 = vpop.f32.mrf.mxu3 }
 0x5c0   : > { %v2006_v4 = vpop.f32.mrf.mxu1  ;;  %v2105_v21 = vadd.f32 %v2039_v18, %v2003_v10  ;;  %v2104_v62 = vadd.f32 %v2039_v18, %v2000_v39 }
 0x5c1   : > { %v2106_v28 = vadd.f32 %v2039_v18, %v2006_v4 }
 0x5c2   : > { %v2169_v63 = vmax.f32 %v2105_v21, 0.0  ;;  %v2168_v43 = vmax.f32 %v2104_v62, 0.0 }
 0x5c4   : > { %2492 = vmatmul.f32.gmra.mxu3 %v2154_v53 }
 0x5c7   : > { %v5905_v23 = vpop.f32.mrf.mxu3 }
 0x5c8   : > { %v2009_v0 = vpop.f32.mrf.mxu1 }
 0x5c9   : > { %v2107_v31 = vadd.f32 %v2039_v18, %v2009_v0 }
 0x5cb   : > { %v2171_v11 = vmax.f32 %v2107_v31, 0.0 }
 0x5cc   : > { %2495 = vmatmul.f32.gmra.mxu3 %v2155_v9  ;;  %v2170_v9 = vmax.f32 %v2106_v28, 0.0 }
 0x5cf   : > { %v5909_v59 = vpop.f32.mrf.mxu3 }
 0x5d0   : > { %v2012_v22 = vpop.f32.mrf.mxu1 }
 0x5d1   : > { %v5918_v55 = vadd.f32 %v2039_v18, %v2012_v22 }
 0x5d3   : > { %v2172_v39 = vmax.f32 %v5918_v55, 0.0 }
 0x5d4   : > { %2498 = vmatmul.f32.gmra.mxu3 %v2156_v14  ;;  %v2267_v14 = vmax.f32 %v2168_v43, %v2169_v63 }
 0x5d6   : > { %v2268_v25 = vmax.f32 %v2267_v14, %v2170_v9 }
 0x5d7   : > { %v5914_v53 = vpop.f32.mrf.mxu3 }
 0x5d8   : > { %v2015_v8 = vpop.f32.mrf.mxu1  ;;  %v2269_v10 = vmax.f32 %v2268_v25, %v2171_v11 }
 0x5d9   : > { %v5922_v24 = vadd.f32 %v2039_v18, %v2015_v8 }
 0x5db   : > { %v2173_v49 = vmax.f32 %v5922_v24, 0.0  ;;  %v3684_v24 = vld [vmem:[%s6696_s3 + $0x310] sm:$0xff] }
 0x5dc   : > { %2501 = vmatmul.f32.gmra.mxu3 %v2157_v12  ;;  %v2270_v12 = vmax.f32 %v2269_v10, %v2172_v39 }
 0x5de   : > { %v2271_v8 = vmax.f32 %v2270_v12, %v2173_v49 }
 0x5df   : > { %v5920_v41 = vpop.f32.mrf.mxu3 }
 0x5e0   : > { %v2018_v40 = vpop.f32.mrf.mxu1 }
 0x5e1   : > { %v5925_v4 = vadd.f32 %v2039_v18, %v2018_v40 }
 0x5e3   : > { %v6759_v0 = vmax.f32 %v5925_v4, 0.0 }
 0x5e4   : > { %2504 = vmatmul.f32.gmra.mxu3 %v2158_v35  ;;  %v6994_v35 = vmax.f32 %v5796_v61, 0.0 }
 0x5e5   : > { %v2272_v28 = vmax.f32 %v2271_v8, %v6759_v0 }
 0x5e7   : > { %v5931_v22 = vpop.f32.mrf.mxu3 }
 0x5e8   : > { %v2021_v21 = vpop.f32.mrf.mxu1 }
 0x5e9   : > { %v5935_v62 = vadd.f32 %v2039_v18, %v2021_v21  ;;  %v6996_v18 = vmax.f32 %v5808_v54, 0.0  ;;  %v6999_v54 = vmax.f32 %v5840_v60, 0.0  ;;  %v7003_v60 = vmax.f32 %v5879_v30, 0.0  ;;  %v3696_v30 = vld [vmem:[%s6696_s3 + $0x370] sm:$0xff] }
 0x5eb   : > { %v2175_v25 = vmax.f32 %v5935_v62, 0.0 }
 0x5ec   : > { %2507 = vmatmul.f32.gmra.mxu3 %v6994_v35  ;;  %v6998_v35 = vmax.f32 %v5831_v42, 0.0  ;;  %v7002_v42 = vmax.f32 %v5870_v32, 0.0  ;;  %v3697_v32 = vld [vmem:[%s6696_s3 + $0x378] sm:$0xff] }
 0x5ed   : > { %v2273_v6 = vmax.f32 %v2272_v28, %v2175_v25  ;;  %v6997_v28 = vmax.f32 %v5814_v44, 0.0  ;;  %v7001_v44 = vmax.f32 %v5858_v15, 0.0  ;;  %2885 = vmatpush.msra.mxu2 %v3697_v32  ;;  %v3686_v32 = vld [vmem:[%s6696_s3 + $0x320] sm:$0xff] }
 0x5ef   : > { %v2274_v31 = vrot.slane %v2273_v6, 4  ;;  %v5944_v55 = vpop.f32.mrf.mxu3  ;;  %2886 = vmatpush.msra.mxu2 %v3696_v30  ;;  %v3685_v30 = vld [vmem:[%s6696_s3 + $0x318] sm:$0xff] }
 0x5f0   : > { %6995 = vst [vmem:[#allocation32_spill] sm:$0xff] %v5944_v55 }
 0x5f1   : > { %v2275_v40 = vmax.f32 %v2273_v6, %v2274_v31 }
 0x5f3   : > { %v2276_v14 = vrot.slane %v2275_v40, 2 }
 0x5f4   : > { %2510 = vmatmul.f32.gmra.mxu3 %v6996_v18 }
 0x5f5   : > { %v2277_v10 = vmax.f32 %v2275_v40, %v2276_v14  ;;  %v7000_v40 = vmax.f32 %v5849_v47, 0.0 }
 0x5f7   : > { %v2278_v12 = vrot.slane %v2277_v10, 1  ;;  %v5948_v21 = vpop.f32.mrf.mxu3 }
 0x5f9   : > { %v2279_v8 = vmax.f32 %v2277_v10, %v2278_v12  ;;  %v3693_v12 = vld [vmem:[%s6696_s3 + $0x358] sm:$0xff] }
 0x5fb   : > { %v2328_v0 = vsel %vm1792_vm8, %v2279_v8, %v2327_v13  ;;  %v3691_v8 = vld [vmem:[%s6696_s3 + $0x348] sm:$0xff] }
 0x5fc   : > { %2346 = vmatmul.f32.vlgmr.msrb.gmra.mxu2 %v2328_v0  ;;  %2513 = vmatmul.f32.gmra.mxu3 %v6997_v28 }
 0x5ff   : > { %v5953_v61 = vpop.f32.mrf.mxu3 }
 0x604   : > { %2516 = vmatmul.f32.gmra.mxu3 %v6998_v35  ;;  %v3690_v35 = vld [vmem:[%s6696_s3 + $0x340] sm:$0xff] }
 0x607   : > { %v5957_v6 = vpop.f32.mrf.mxu3 }
 0x60c   : > { %2519 = vmatmul.f32.gmra.mxu3 %v6999_v54  ;;  %v3689_v54 = vld [vmem:[%s6696_s3 + $0x338] sm:$0xff] }
 0x60f   : > { %v5961_v31 = vpop.f32.mrf.mxu3 }
 0x614   : > { %2522 = vmatmul.f32.gmra.mxu3 %v7000_v40  ;;  %v3688_v40 = vld [vmem:[%s6696_s3 + $0x330] sm:$0xff] }
 0x617   : > { %v5965_v13 = vpop.f32.mrf.mxu3 }
 0x61c   : > { %2525 = vmatmul.f32.gmra.mxu3 %v7001_v44 }
 0x61f   : > { %v5969_v0 = vpop.f32.mrf.mxu3 }
 0x624   : > { %2528 = vmatmul.f32.gmra.mxu3 %v7002_v42  ;;  %v7005_v42 = vmax.f32 %v5925_v4, 0.0  ;;  %v3683_v4 = vld [vmem:[%s6696_s3 + $0x308] sm:$0xff] }
 0x627   : > { %v5973_v14 = vpop.f32.mrf.mxu3 }
 0x62c   : > { %2531 = vmatmul.f32.gmra.mxu3 %v7003_v60 }
 0x62f   : > { %v5977_v10 = vpop.f32.mrf.mxu3 }
 0x630   : > { %7004 = vst [vmem:[#allocation20_spill] sm:$0xff] %v5977_v10 }
 0x634   : > { %2534 = vmatmul.f32.gmra.mxu3 %v2168_v43 }
 0x637   : > { %v5979_v47 = vpop.f32.mrf.mxu3 }
 0x63c   : > { %2537 = vmatmul.f32.gmra.mxu3 %v2169_v63  ;;  %v3695_v63 = vld [vmem:[%s6696_s3 + $0x368] sm:$0xff] }
 0x63d   : > { %2887 = vmatpush.msra.mxu2 %v3695_v63 }
 0x63f   : > { %v5981_v18 = vpop.f32.mrf.mxu3 }
 0x644   : > { %2540 = vmatmul.f32.gmra.mxu3 %v2170_v9  ;;  %v3694_v9 = vld [vmem:[%s6696_s3 + $0x360] sm:$0xff] }
 0x645   : > { %2888 = vmatpush.msra.mxu2 %v3694_v9 }
 0x647   : > { %v5983_v15 = vpop.f32.mrf.mxu3  ;;  %2889 = vmatpush.msra.mxu2 %v3693_v12  ;;  %v6052_v12 = vld [vmem:[%s6697_s4] sm:$0xf] }
 0x648   : > { %7006 = vst [vmem:[#allocation30_spill] sm:$0xff] %v6052_v12 }
 0x64c   : > { %2543 = vmatmul.f32.gmra.mxu3 %v2171_v11  ;;  %v3692_v11 = vld [vmem:[%s6696_s3 + $0x350] sm:$0xff] }
 0x64d   : > { %2890 = vmatpush.msra.mxu2 %v3692_v11  ;;  %v2313_v11 = vperm.slane %v6052_v12, 2 }
 0x64f   : > { %v5994_v43 = vpop.f32.mrf.mxu3  ;;  %2891 = vmatpush.msra.mxu2 %v3691_v8 }
 0x651   : > { %2892 = vmatpush.msra.mxu2 %v3690_v35 }
 0x653   : > { %2893 = vmatpush.msra.mxu2 %v3689_v54 }
 0x654   : > { %2546 = vmatmul.f32.gmra.mxu3 %v2172_v39  ;;  %v3687_v39 = vld [vmem:[%s6696_s3 + $0x328] sm:$0xff] }
 0x655   : > { %2894 = vmatpush.msra.mxu2 %v3688_v40 }
 0x657   : > { %v6008_v28 = vpop.f32.mrf.mxu3  ;;  %2895 = vmatpush.msra.mxu2 %v3687_v39 }
 0x659   : > { %2896 = vmatpush.msra.mxu2 %v3686_v32 }
 0x65b   : > { %2897 = vmatpush.msra.mxu2 %v3685_v30 }
 0x65c   : > { %2549 = vmatmul.f32.gmra.mxu3 %v2173_v49  ;;  %v3682_v49 = vld [vmem:[%s6696_s3 + $0x300] sm:$0xff] }
 0x65d   : > { %2898 = vmatpush.msra.mxu2 %v3684_v24 }
 0x65f   : > { %v6024_v44 = vpop.f32.mrf.mxu3  ;;  %2899 = vmatpush.msra.mxu2 %v3683_v4 }
 0x661   : > { %2900 = vmatpush.msra.mxu2 %v3682_v49 }
 0x664   : > { %2552 = vmatmul.f32.gmra.mxu3 %v7005_v42 }
 0x667   : > { %v6028_v60 = vpop.f32.mrf.mxu3 }
 0x66c   : > { %2555 = vmatmul.f32.gmra.mxu3 %v2175_v25 }
 0x66f   : > { %v6047_v63 = vpop.f32.mrf.mxu3 }
 0x677   : > { %v2511_v9 = vpop.f32.mrf.mxu3 }
 0x67f   : > { %v2347_v8 = vpop.f32.mrf.mxu2  ;;  %v2514_v25 = vpop.f32.mrf.mxu3 }
 0x680   : > { %v6055_v62 = vadd.f32 %v2347_v8, %v2313_v11 }
 0x682   : > { %v2560_v35 = vrot.slane %v6055_v62, 1  ;;  %v2567_v54 = vperm.slane %v6055_v62, 0  ;;  %v2565_v40 = vrot.slane %v6055_v62, 6 }
 0x684   : > { %v6060_v39 = vperm.slane %v2565_v40, 0  ;;  %v2583_v42 = vadd.f32 %v2567_v54, %v5565_v46  ;;  %v2584_v32 = vadd.f32 %v2567_v54, %v5570_v34  ;;  %v2568_v30 = vperm.slane %v2560_v35, 0 }
 0x685   : > { %v2585_v24 = vadd.f32 %v2567_v54, %v5576_v52  ;;  %v2586_v4 = vadd.f32 %v2567_v54, %v5594_v57  ;;  %v6076_v35 = vadd.f32 %v2567_v54, %v5624_v2 }
 0x686   : > { %v6067_v49 = vadd.f32 %v6060_v39, %v2511_v9  ;;  %v6070_v11 = vadd.f32 %v6060_v39, %v2514_v25  ;;  %v2647_v8 = vmax.f32 %v2583_v42, 0.0  ;;  %v2648_v12 = vmax.f32 %v2584_v32, 0.0 }
 0x687   : > { %v2517_v10 = vpop.f32.mrf.mxu3  ;;  %v2649_v34 = vmax.f32 %v2585_v24, 0.0  ;;  %v6079_v52 = vadd.f32 %v2568_v30, %v5703_v38  ;;  %v2650_v9 = vmax.f32 %v2586_v4, 0.0  ;;  %v6082_v25 = vadd.f32 %v2568_v30, %v5727_v1 }
 0x688   : > { %v6073_v40 = vadd.f32 %v6060_v39, %v2517_v10  ;;  %2901 = vmatmul.f32.vlgmr.msra.gmra.mxu2 %v2647_v8  ;;  %v2711_v46 = vmax.f32 %v2647_v8, %v2648_v12  ;;  %v6086_v32 = vadd.f32 %v2568_v30, %v5739_v17  ;;  %v2651_v8 = vmax.f32 %v6076_v35, 0.0 }
 0x689   : > { %v6762_v42 = vmax.f32 %v6079_v52, 0.0  ;;  %v6761_v24 = vmax.f32 %v6082_v25, 0.0  ;;  %v6091_v2 = vadd.f32 %v2568_v30, %v5751_v45  ;;  %v6105_v45 = vadd.f32 %v2568_v30, %v5763_v16 }
 0x68a   : > { %v2712_v57 = vmax.f32 %v2711_v46, %v2649_v34  ;;  %v6763_v4 = vmax.f32 %v6086_v32, 0.0  ;;  %v6112_v55 = vadd.f32 %v2568_v30, %v5778_v58 }
 0x68b   : > { %7007 = vst [vmem:[#allocation33_spill] sm:$0xff] %v6091_v2  ;;  %v2724_v1 = vmax.f32 %v6762_v42, %v6761_v24  ;;  %v2564_v24 = vrot.slane %v6055_v62, 5  ;;  %v6766_v42 = vmax.f32 %v6105_v45, 0.0 }
 0x68c   : > { %v2713_v10 = vmax.f32 %v2712_v57, %v2650_v9  ;;  %v6765_v57 = vmax.f32 %v6091_v2, 0.0 }
 0x68d   : > { %v2725_v35 = vmax.f32 %v2724_v1, %v6763_v4  ;;  %v6118_v4 = vperm.slane %v2564_v24, 0 }
 0x68e   : > { %v2714_v38 = vmax.f32 %v2713_v10, %v2651_v8 }
 0x68f   : > { %v2520_v46 = vpop.f32.mrf.mxu3  ;;  %v2726_v10 = vmax.f32 %v2725_v35, %v6765_v57  ;;  %v6767_v35 = vmax.f32 %v6112_v55, 0.0  ;;  %v6125_v57 = vadd.f32 %v2568_v30, %v5793_v51  ;;  %v6132_v24 = vadd.f32 %v6118_v4, %v6008_v28 }
 0x690   : > { %v6099_v17 = vadd.f32 %v6060_v39, %v2520_v46  ;;  %2904 = vmatmul.f32.gmra.mxu2 %v2648_v12  ;;  %v2588_v12 = vadd.f32 %v2567_v54, %v5653_v27  ;;  %v2561_v46 = vrot.slane %v6055_v62, 2  ;;  %v2589_v27 = vadd.f32 %v2567_v54, %v5678_v50 }
 0x691   : > { %v2727_v1 = vmax.f32 %v2726_v10, %v6766_v42  ;;  %7008 = vst [vmem:[#allocation34_spill] sm:$0xff] %v6125_v57  ;;  %v6144_v50 = vadd.f32 %v2568_v30, %v5806_v48 }
 0x692   : > { %v2652_v58 = vmax.f32 %v2588_v12, 0.0  ;;  %v2569_v42 = vperm.slane %v2561_v46, 0  ;;  %v6768_v12 = vmax.f32 %v6125_v57, 0.0  ;;  %v2653_v28 = vmax.f32 %v2589_v27, 0.0 }
 0x693   : > { %v2728_v10 = vmax.f32 %v2727_v1, %v6767_v35  ;;  %7009 = vst [vmem:[#allocation23_spill] sm:$0xff] %v6144_v50  ;;  %v6148_v1 = vadd.f32 %v6118_v4, %v6047_v63  ;;  %v6151_v46 = vadd.f32 %v2567_v54, %v5694_v19  ;;  %v6769_v30 = vmax.f32 %v6144_v50, 0.0 }
 0x694   : > { %v2715_v51 = vmax.f32 %v2714_v38, %v2652_v58  ;;  %v6159_v38 = vadd.f32 %v2569_v42, %v5829_v29  ;;  %v6169_v27 = vadd.f32 %v2569_v42, %v5838_v36  ;;  %v6194_v57 = vadd.f32 %v2569_v42, %v5877_v5 }
 0x695   : > { %v2654_v19 = vmax.f32 %v6151_v46, 0.0 }
 0x696   : > { %7010 = vst [vmem:[#allocation36_spill] sm:$0xff] %v6159_v38  ;;  %v2716_v63 = vmax.f32 %v2715_v51, %v2653_v28  ;;  %v6773_v29 = vmax.f32 %v6159_v38, 0.0  ;;  %v6778_v46 = vmax.f32 %v6169_v27, 0.0  ;;  %v6816_v5 = vmax.f32 %v6194_v57, 0.0 }
 0x697   : > { %v2523_v16 = vpop.f32.mrf.mxu3  ;;  %7011 = vst [vmem:[#allocation18_spill] sm:$0xff] %v6169_v27 }
 0x698   : > { %v6121_v2 = vadd.f32 %v6060_v39, %v2523_v16  ;;  %2907 = vmatmul.f32.gmra.mxu2 %v2649_v34  ;;  %v6136_v16 = vadd.f32 %v6118_v4, %v6024_v44  ;;  %v6140_v34 = vadd.f32 %v6118_v4, %v6028_v60  ;;  %v2729_v44 = vmax.f32 %v2728_v10, %v6768_v12 }
 0x699   : > { %v6156_v60 = vadd.f32 %v2569_v42, %v5812_v3  ;;  %v2717_v10 = vmax.f32 %v2716_v63, %v2654_v19  ;;  %v6177_v12 = vadd.f32 %v2569_v42, %v5856_v33  ;;  %7014 = vst [vmem:[#allocation25_spill] sm:$0xff] %v6194_v57 }
 0x69a   : > { %v2730_v54 = vmax.f32 %v2729_v44, %v6769_v30 }
 0x69b   : > { %v6774_v3 = vmax.f32 %v6156_v60, 0.0  ;;  %7012 = vst [vmem:[#allocation26_spill] sm:$0xff] %v6177_v12  ;;  %v2718_v63 = vrot.slane %v2717_v10, 4  ;;  %v6776_v38 = vmax.f32 %v6177_v12, 0.0  ;;  %v2563_v12 = vrot.slane %v6055_v62, 4 }
 0x69d   : > { %v2737_v36 = vmax.f32 %v6774_v3, %v6773_v29  ;;  %v2719_v29 = vmax.f32 %v2717_v10, %v2718_v63 }
 0x69f   : > { %v2526_v35 = vpop.f32.mrf.mxu3  ;;  %v2738_v33 = vmax.f32 %v2737_v36, %v6778_v46 }
 0x6a0   : > { %v6162_v48 = vadd.f32 %v6060_v39, %v2526_v35  ;;  %2910 = vmatmul.f32.gmra.mxu2 %v2650_v9  ;;  %v6174_v35 = vadd.f32 %v2569_v42, %v5847_v20  ;;  %v2731_v9 = vrot.slane %v2730_v54, 4  ;;  %v6188_v20 = vadd.f32 %v2569_v42, %v5868_v7 }
 0x6a2   : > { %7013 = vst [vmem:[#allocation37_spill] sm:$0xff] %v6188_v20  ;;  %v6777_v30 = vmax.f32 %v6174_v35, 0.0  ;;  %v2732_v50 = vmax.f32 %v2730_v54, %v2731_v9  ;;  %v6780_v7 = vmax.f32 %v6188_v20, 0.0  ;;  %v2720_v9 = vrot.slane %v2719_v29, 2 }
 0x6a3   : > { %v2562_v20 = vrot.slane %v6055_v62, 3 }
 0x6a4   : > { %v2733_v27 = vrot.slane %v2732_v50, 2 }
 0x6a7   : > { %v2529_v51 = vpop.f32.mrf.mxu3 }
 0x6a8   : > { %v6185_v44 = vadd.f32 %v6060_v39, %v2529_v51  ;;  %2913 = vmatmul.f32.gmra.mxu2 %v2651_v8  ;;  %v2739_v51 = vmax.f32 %v2738_v33, %v6777_v30  ;;  %v6200_v8 = vadd.f32 %v2569_v42, %v5889_v37  ;;  %v2734_v42 = vmax.f32 %v2732_v50, %v2733_v27 }
 0x6a9   : > { %v2721_v33 = vmax.f32 %v2719_v29, %v2720_v9  ;;  %v6222_v9 = vperm.slane %v2563_v12, 0 }
 0x6aa   : > { %v2740_v3 = vmax.f32 %v2739_v51, %v6776_v38  ;;  %v6813_v10 = vmax.f32 %v6200_v8, 0.0  ;;  %v2735_v38 = vrot.slane %v2734_v42, 1 }
 0x6ab   : > { %v6243_v12 = vadd.f32 %v6222_v9, %v5953_v61  ;;  %v6259_v61 = vadd.f32 %v6118_v4, %v5979_v47  ;;  %v6277_v47 = vadd.f32 %v6222_v9, %v5957_v6  ;;  %v3711_v6 = vld [vmem:[%s6696_s3 + $0x3e8] sm:$0xff] }
 0x6ac   : > { %v2741_v54 = vmax.f32 %v2740_v3, %v6780_v7  ;;  %v2736_v7 = vmax.f32 %v2734_v42, %v2735_v38 }
 0x6ae   : > { %v2742_v37 = vmax.f32 %v2741_v54, %v6816_v5  ;;  %v6219_v54 = vperm.slane %v2562_v20, 0  ;;  %v6239_v20 = vadd.f32 %v6222_v9, %v5948_v21 }
 0x6af   : > { %v6205_v36 = vpop.f32.mrf.mxu3 }
 0x6b0   : > { %2916 = vmatmul.f32.gmra.mxu2 %v2652_v58  ;;  %v2743_v63 = vmax.f32 %v2742_v37, %v6813_v10  ;;  %v2722_v58 = vrot.slane %v2721_v33, 1  ;;  %v6232_v38 = vadd.f32 %v6219_v54, %v5898_v26  ;;  %v3712_v26 = vld [vmem:[%s6696_s3 + $0x3f0] sm:$0xff]  ;;  %v6255_v21 = vadd.f32 %v6219_v54, %v5905_v23 }
 0x6b2   : > { %v2744_v51 = vrot.slane %v2743_v63, 4  ;;  %v2723_v50 = vmax.f32 %v2721_v33, %v2722_v58  ;;  %v6784_v33 = vmax.f32 %v6239_v20, 0.0  ;;  %v7015_v58 = vmax.f32 %v6079_v52, 0.0 }
 0x6b4   : > { %v2745_v46 = vmax.f32 %v2743_v63, %v2744_v51  ;;  %v2857_v29 = vsel %vm1780_vm2, %v2736_v7, %v2723_v50  ;;  %v6263_v7 = vadd.f32 %v6118_v4, %v5981_v18  ;;  %v6783_v51 = vmax.f32 %v6243_v12, 0.0 }
 0x6b5   : > { %v6281_v18 = vadd.f32 %v6219_v54, %v5909_v59  ;;  %v6788_v50 = vmax.f32 %v6259_v61, 0.0  ;;  %v3710_v59 = vld [vmem:[%s6696_s3 + $0x3e0] sm:$0xff] }
 0x6b6   : > { %v2746_v3 = vrot.slane %v2745_v46, 2  ;;  %v6787_v52 = vmax.f32 %v6263_v7, 0.0 }
 0x6b7   : > { %v6215_v30 = vpop.f32.mrf.mxu3 }
 0x6b8   : > { %2919 = vmatmul.f32.gmra.mxu2 %v2653_v28  ;;  %v2747_v57 = vmax.f32 %v2745_v46, %v2746_v3  ;;  %v6228_v28 = vadd.f32 %v6219_v54, %v5893_v56  ;;  %v3713_v56 = vld [vmem:[%s6696_s3 + $0x3f8] sm:$0xff]  ;;  %v6785_v3 = vmax.f32 %v6255_v21, 0.0 }
 0x6b9   : > { %2865 = vmatpush.msrb.mxu0 %v3713_v56  ;;  %v6304_v56 = vadd.f32 %v6222_v9, %v5961_v31 }
 0x6ba   : > { %v2748_v27 = vrot.slane %v2747_v57, 1 }
 0x6bb   : > { %2866 = vmatpush.msrb.mxu0 %v3712_v26  ;;  %v6789_v26 = vmax.f32 %v6277_v47, 0.0 }
 0x6bc   : > { %v2749_v63 = vmax.f32 %v2747_v57, %v2748_v27  ;;  %v6798_v57 = vmax.f32 %v6228_v28, 0.0  ;;  %v2763_v27 = vmax.f32 %v6784_v33, %v6783_v51  ;;  %v6312_v51 = vadd.f32 %v6219_v54, %v5914_v53  ;;  %v3708_v53 = vld [vmem:[%s6696_s3 + $0x3d0] sm:$0xff] }
 0x6bd   : > { %2867 = vmatpush.msrb.mxu0 %v3711_v6  ;;  %v7016_v33 = vmax.f32 %v6082_v25, 0.0  ;;  %v6339_v25 = vadd.f32 %v6222_v9, %v5965_v13 }
 0x6be   : > { %v6235_v46 = vsel %vm1782_vm3, %v2749_v63, %v2857_v29  ;;  %v6298_v29 = vadd.f32 %v6118_v4, %v5983_v15  ;;  %v6795_v15 = vmax.f32 %v6281_v18, 0.0  ;;  %v2764_v31 = vmax.f32 %v2763_v27, %v6789_v26 }
 0x6bf   : > { %v6224_v37 = vpop.f32.mrf.mxu3  ;;  %2868 = vmatpush.msrb.mxu0 %v3710_v59  ;;  %v6793_v59 = vmax.f32 %v6067_v49, 0.0  ;;  %v6792_v27 = vmax.f32 %v6070_v11, 0.0  ;;  %v6360_v26 = vadd.f32 %v6222_v9, %v5969_v0  ;;  %v6801_v0 = vmax.f32 %v6099_v17, 0.0 }
 0x6c0   : > { %2922 = vmatmul.f32.gmra.mxu2 %v2654_v19  ;;  %v6786_v19 = vmax.f32 %v6232_v38, 0.0 }
 0x6c2   : > { %v2750_v23 = vmax.f32 %v6798_v57, %v6786_v19  ;;  %v6790_v19 = vmax.f32 %v6298_v29, 0.0 }
 0x6c4   : > { %v2751_v63 = vmax.f32 %v2750_v23, %v6785_v3  ;;  %v2776_v23 = vmax.f32 %v6788_v50, %v6787_v52  ;;  %v6330_v3 = vadd.f32 %v6118_v4, %v5994_v43  ;;  %v6344_v43 = vadd.f32 %v6219_v54, %v5920_v41 }
 0x6c5   : > { %v6794_v4 = vmax.f32 %v6312_v51, 0.0  ;;  %v2789_v41 = vmax.f32 %v6793_v59, %v6792_v27  ;;  %v7017_v59 = vmax.f32 %v6086_v32, 0.0 }
 0x6c6   : > { %v2752_v52 = vmax.f32 %v2751_v63, %v6795_v15  ;;  %v2777_v63 = vmax.f32 %v2776_v23, %v6790_v19  ;;  %v6797_v23 = vmax.f32 %v6339_v25, 0.0  ;;  %v6804_v19 = vmax.f32 %v6344_v43, 0.0 }
 0x6c7   : > { %v6265_v42 = vpop.f32.mrf.mxu3 }
 0x6c8   : > { %2925 = vmatmul.f32.gmra.mxu2 %v7015_v58  ;;  %v3709_v58 = vld [vmem:[%s6696_s3 + $0x3d8] sm:$0xff]  ;;  %v2753_v13 = vmax.f32 %v2752_v52, %v6794_v4  ;;  %v6800_v4 = vmax.f32 %v6132_v24, 0.0 }
 0x6c9   : > { %2869 = vmatpush.msrb.mxu0 %v3709_v58  ;;  %v6796_v58 = vmax.f32 %v6330_v3, 0.0 }
 0x6ca   : > { %v2754_v15 = vmax.f32 %v2753_v13, %v6804_v19 }
 0x6cb   : > { %2870 = vmatpush.msrb.mxu0 %v3708_v53  ;;  %v6799_v53 = vmax.f32 %v6073_v40, 0.0  ;;  %v2778_v52 = vmax.f32 %v2777_v63, %v6796_v58  ;;  %v2566_v63 = vrot.slane %v6055_v62, 7  ;;  %v6802_v58 = vmax.f32 %v6360_v26, 0.0 }
 0x6cd   : > { %v2790_v32 = vmax.f32 %v2789_v41, %v6799_v53  ;;  %v2779_v13 = vmax.f32 %v2778_v52, %v6800_v4  ;;  %v3705_v53 = vld [vmem:[%s6696_s3 + $0x3b8] sm:$0xff]  ;;  %v6807_v52 = vmax.f32 %v6162_v48, 0.0 }
 0x6cf   : > { %v6319_v6 = vpop.f32.mrf.mxu3  ;;  %v2791_v41 = vmax.f32 %v2790_v32, %v6801_v0  ;;  %v6423_v0 = vperm.slane %v2566_v63, 0 }
 0x6d0   : > { %2928 = vmatmul.f32.gmra.mxu2 %v7016_v33  ;;  %v6791_v33 = vmax.f32 %v6304_v56, 0.0 }
 0x6d1   : > { %v6438_v63 = vadd.f32 %v6423_v0, %v6224_v37 }
 0x6d2   : > { %v2765_v50 = vmax.f32 %v2764_v31, %v6791_v33  ;;  %v6366_v31 = vadd.f32 %v6219_v54, %v5931_v22  ;;  %v3707_v22 = vld [vmem:[%s6696_s3 + $0x3c8] sm:$0xff] }
 0x6d3   : > { %2871 = vmatpush.msrb.mxu0 %v3707_v22  ;;  %7020 = vst [vmem:[#allocation29_spill] sm:$0xff] %v6438_v63 }
 0x6d4   : > { %v2766_v27 = vmax.f32 %v2765_v50, %v6797_v23  ;;  %v6387_v50 = vadd.f32 %v6222_v9, %v5973_v14  ;;  %v7018_v23 = vld [vmem:[#allocation32_spill] sm:$0xff]  ;;  %v6803_v62 = vmax.f32 %v6366_v31, 0.0  ;;  %v6805_v14 = vmax.f32 %v6121_v2, 0.0 }
 0x6d5   : > { %v6397_v57 = vadd.f32 %v6219_v54, %v7018_v23  ;;  %v6806_v54 = vmax.f32 %v6136_v16, 0.0 }
 0x6d6   : > { %v2767_v22 = vmax.f32 %v2766_v27, %v6802_v58  ;;  %v2755_v23 = vmax.f32 %v2754_v15, %v6803_v62  ;;  %v7019_v27 = vld [vmem:[#allocation20_spill] sm:$0xff]  ;;  %v6808_v32 = vmax.f32 %v6387_v50, 0.0  ;;  %v3704_v58 = vld [vmem:[%s6696_s3 + $0x3b0] sm:$0xff] }
 0x6d7   : > { %v6371_v33 = vpop.f32.mrf.mxu3  ;;  %v6420_v4 = vadd.f32 %v6222_v9, %v7019_v27  ;;  %v6809_v15 = vmax.f32 %v6397_v57, 0.0  ;;  %v2780_v62 = vmax.f32 %v2779_v13, %v6806_v54  ;;  %v7021_v27 = vld [vmem:[#allocation33_spill] sm:$0xff]  ;;  %v3703_v13 = vld [vmem:[%s6696_s3 + $0x3a8] sm:$0xff]  ;;  %v6461_v54 = vadd.f32 %v6423_v0, %v6265_v42 }
 0x6d8   : > { %2931 = vmatmul.f32.gmra.mxu2 %v7017_v59  ;;  %v3706_v59 = vld [vmem:[%s6696_s3 + $0x3c0] sm:$0xff]  ;;  %v7022_v19 = vmax.f32 %v7021_v27, 0.0  ;;  %v6457_v27 = vadd.f32 %v6423_v0, %v6215_v30  ;;  %v6817_v30 = vmax.f32 %v6438_v63, 0.0  ;;  %v6475_v42 = vadd.f32 %v6423_v0, %v6319_v6  ;;  %v3699_v6 = vld [vmem:[%s6696_s3 + $0x388] sm:$0xff] }
 0x6d9   : > { %2872 = vmatpush.msrb.mxu0 %v3706_v59  ;;  %v6416_v59 = vadd.f32 %v6060_v39, %v6205_v36  ;;  %v2792_v39 = vmax.f32 %v2791_v41, %v6805_v14  ;;  %v6810_v36 = vmax.f32 %v6185_v44, 0.0  ;;  %v3702_v41 = vld [vmem:[%s6696_s3 + $0x3a0] sm:$0xff]  ;;  %7024 = vst [vmem:[#allocation31_spill] sm:$0xff] %v6461_v54 }
 0x6da   : > { %7023 = vst [vmem:[#allocation8_spill] sm:$0xff] %v6457_v27 }
 0x6db   : > { %2873 = vmatpush.msrb.mxu0 %v3705_v53  ;;  %v2768_v53 = vmax.f32 %v2767_v22, %v6808_v32  ;;  %v2756_v22 = vmax.f32 %v2755_v23, %v6809_v15  ;;  %v2793_v37 = vmax.f32 %v2792_v39, %v6807_v52  ;;  %v6814_v14 = vmax.f32 %v6416_v59, 0.0  ;;  %v3701_v23 = vld [vmem:[%s6696_s3 + $0x398] sm:$0xff]  ;;  %v3700_v32 = vld [vmem:[%s6696_s3 + $0x390] sm:$0xff] }
 0x6dc   : > { %v6815_v15 = vmax.f32 %v6148_v1, 0.0 }
 0x6dd   : > { %2874 = vmatpush.msrb.mxu0 %v3704_v58  ;;  %v6811_v58 = vmax.f32 %v6140_v34, 0.0 }
 0x6df   : > { %v2550_v9 = vpop.f32.mrf.mxu3  ;;  %2875 = vmatpush.msrb.mxu0 %v3703_v13  ;;  %v2781_v39 = vmax.f32 %v2780_v62, %v6811_v58  ;;  %v2794_v13 = vmax.f32 %v2793_v37, %v6810_v36  ;;  %v2757_v62 = vrot.slane %v2756_v22, 4  ;;  %v6487_v36 = vadd.f32 %v6423_v0, %v6371_v33 }
 0x6e0   : > { %2934 = vmatmul.f32.gmra.mxu2 %v7022_v19  ;;  %v6812_v19 = vmax.f32 %v6420_v4, 0.0  ;;  %v6500_v33 = vadd.f32 %v6423_v0, %v2550_v9 }
 0x6e1   : > { %2876 = vmatpush.msrb.mxu0 %v3702_v41  ;;  %v2795_v37 = vmax.f32 %v2794_v13, %v6814_v14  ;;  %v6818_v41 = vmax.f32 %v6457_v27, 0.0  ;;  %v2782_v58 = vmax.f32 %v2781_v39, %v6815_v15  ;;  %v7025_v14 = vmax.f32 %v6105_v45, 0.0  ;;  %v3698_v39 = vld [vmem:[%s6696_s3 + $0x380] sm:$0xff] }
 0x6e2   : > { %v2769_v52 = vmax.f32 %v2768_v53, %v6812_v19  ;;  %v6821_v53 = vmax.f32 %v6461_v54, 0.0  ;;  %v2758_v15 = vmax.f32 %v2756_v22, %v2757_v62  ;;  %v7027_v45 = vmax.f32 %v6475_v42, 0.0 }
 0x6e3   : > { %2877 = vmatpush.msrb.mxu0 %v3701_v23  ;;  %v2802_v23 = vmax.f32 %v6818_v41, %v6817_v30  ;;  %v6824_v30 = vmax.f32 %v6487_v36, 0.0  ;;  %v2783_v9 = vrot.slane %v2782_v58, 4  ;;  %v6823_v63 = vmax.f32 %v6500_v33, 0.0 }
 0x6e4   : > { %v2770_v10 = vrot.slane %v2769_v52, 4  ;;  %v2759_v27 = vrot.slane %v2758_v15, 2 }
 0x6e5   : > { %2878 = vmatpush.msrb.mxu0 %v3700_v32  ;;  %v2796_v32 = vrot.slane %v2795_v37, 4  ;;  %v2803_v5 = vmax.f32 %v2802_v23, %v6821_v53  ;;  %v2784_v23 = vmax.f32 %v2782_v58, %v2783_v9 }
 0x6e6   : > { %v2771_v13 = vmax.f32 %v2769_v52, %v2770_v10  ;;  %v2760_v52 = vmax.f32 %v2758_v15, %v2759_v27 }
 0x6e7   : > { %v2553_v19 = vpop.f32.mrf.mxu3  ;;  %2879 = vmatpush.msrb.mxu0 %v3699_v6  ;;  %v2797_v22 = vmax.f32 %v2795_v37, %v2796_v32 }
 0x6e8   : > { %2937 = vmatmul.f32.gmra.mxu2 %v7025_v14  ;;  %v6511_v41 = vadd.f32 %v6423_v0, %v2553_v19  ;;  %v2804_v14 = vmax.f32 %v2803_v5, %v7027_v45  ;;  %v2772_v54 = vrot.slane %v2771_v13, 2  ;;  %v7029_v5 = vmax.f32 %v6112_v55, 0.0  ;;  %v7030_v55 = vld [vmem:[#allocation34_spill] sm:$0xff] }
 0x6e9   : > { %2880 = vmatpush.msrb.mxu0 %v3698_v39  ;;  %v2798_v39 = vrot.slane %v2797_v22, 2  ;;  %v2785_v45 = vrot.slane %v2784_v23, 2 }
 0x6ea   : > { %7026 = vst [vmem:[#allocation9_spill] sm:$0xff] %v6511_v41  ;;  %v2805_v62 = vmax.f32 %v2804_v14, %v6824_v30  ;;  %v6826_v6 = vmax.f32 %v6511_v41, 0.0  ;;  %v2773_v58 = vmax.f32 %v2771_v13, %v2772_v54  ;;  %v2761_v14 = vrot.slane %v2760_v52, 1 }
 0x6ec   : > { %v2806_v19 = vmax.f32 %v2805_v62, %v6823_v63  ;;  %v2799_v62 = vmax.f32 %v2797_v22, %v2798_v39  ;;  %v2762_v15 = vmax.f32 %v2760_v52, %v2761_v14 }
 0x6ee   : > { %v2807_v37 = vmax.f32 %v2806_v19, %v6826_v6  ;;  %v2800_v27 = vrot.slane %v2799_v62, 1  ;;  %v2859_v6 = vsel %vm1784_vm4, %v2762_v15, %v6235_v46  ;;  %v7034_v46 = vmax.f32 %v6156_v60, 0.0 }
 0x6ef   : > { %v2556_v53 = vpop.f32.mrf.mxu3 }
 0x6f0   : > { %v6522_v10 = vadd.f32 %v6423_v0, %v2556_v53  ;;  %2940 = vmatmul.f32.gmra.mxu2 %v7029_v5  ;;  %v2786_v0 = vmax.f32 %v2784_v23, %v2785_v45  ;;  %v2774_v53 = vrot.slane %v2773_v58, 1  ;;  %v7031_v5 = vmax.f32 %v7030_v55, 0.0  ;;  %v7032_v45 = vld [vmem:[#allocation23_spill] sm:$0xff] }
 0x6f1   : > { %v7039_v55 = vmax.f32 %v6174_v35, 0.0  ;;  %v7047_v35 = vmax.f32 %v6228_v28, 0.0  ;;  %v7052_v28 = vmax.f32 %v6344_v43, 0.0 }
 0x6f2   : > { %7028 = vst [vmem:[#allocation10_spill] sm:$0xff] %v6522_v10  ;;  %v6828_v32 = vmax.f32 %v6522_v10, 0.0  ;;  %v2787_v19 = vrot.slane %v2786_v0, 1  ;;  %v2775_v54 = vmax.f32 %v2773_v58, %v2774_v53  ;;  %v2801_v10 = vmax.f32 %v2799_v62, %v2800_v27  ;;  %v7037_v62 = vld [vmem:[#allocation18_spill] sm:$0xff] }
 0x6f4   : > { %v2808_v9 = vmax.f32 %v2807_v37, %v6828_v32  ;;  %v2860_v37 = vsel %vm1786_vm5, %v2775_v54, %v2859_v6  ;;  %v2788_v39 = vmax.f32 %v2786_v0, %v2787_v19  ;;  %v7038_v0 = vmax.f32 %v7037_v62, 0.0  ;;  %v7042_v19 = vld [vmem:[#allocation37_spill] sm:$0xff] }
 0x6f5   : > { %v7043_v60 = vmax.f32 %v7042_v19, 0.0 }
 0x6f6   : > { %v2809_v63 = vrot.slane %v2808_v9, 4 }
 0x6f8   : > { %v2810_v30 = vmax.f32 %v2808_v9, %v2809_v63  ;;  %2943 = vmatmul.f32.gmra.mxu2 %v7031_v5  ;;  %v7033_v63 = vmax.f32 %v7032_v45, 0.0  ;;  %v2861_v9 = vsel %vm1788_vm6, %v2788_v39, %v2860_v37  ;;  %v7046_v39 = vmax.f32 %v6200_v8, 0.0 }
 0x6f9   : > { %v2862_v52 = vsel %vm1790_vm7, %v2801_v10, %v2861_v9  ;;  %v7040_v10 = vld [vmem:[#allocation26_spill] sm:$0xff]  ;;  %v7051_v8 = vmax.f32 %v6312_v51, 0.0 }
 0x6fa   : > { %v2811_v41 = vrot.slane %v2810_v30, 2  ;;  %v7041_v15 = vmax.f32 %v7040_v10, 0.0 }
 0x6fc   : > { %v2812_v13 = vmax.f32 %v2810_v30, %v2811_v41  ;;  %v7035_v41 = vld [vmem:[#allocation36_spill] sm:$0xff] }
 0x6fd   : > { %v7036_v58 = vmax.f32 %v7035_v41, 0.0 }
 0x6fe   : > { %v2813_v22 = vrot.slane %v2812_v13, 1 }
 0x700   : > { %v2814_v23 = vmax.f32 %v2812_v13, %v2813_v22  ;;  %2946 = vmatmul.f32.gmra.mxu2 %v7033_v63  ;;  %v7044_v13 = vld [vmem:[#allocation25_spill] sm:$0xff]  ;;  %v7048_v63 = vmax.f32 %v6232_v38, 0.0  ;;  %v7053_v38 = vmax.f32 %v6366_v31, 0.0 }
 0x701   : > { %v7045_v37 = vmax.f32 %v7044_v13, 0.0 }
 0x702   : > { %v2863_v14 = vsel %vm1792_vm8, %v2814_v23, %v2862_v52  ;;  %v7049_v52 = vmax.f32 %v6255_v21, 0.0 }
 0x703   : > { %2881 = vmatmul.f32.vlgmr.msrb.gmra.mxu0 %v2863_v14 }
 0x708   : > { %2949 = vmatmul.f32.gmra.mxu2 %v7034_v46  ;;  %v7050_v46 = vmax.f32 %v6281_v18, 0.0 }
 0x70b   : > { %v2902_v30 = vpop.f32.mrf.mxu2 }
 0x710   : > { %2952 = vmatmul.f32.gmra.mxu2 %v7036_v58 }
 0x713   : > { %v2905_v6 = vpop.f32.mrf.mxu2 }
 0x718   : > { %2955 = vmatmul.f32.gmra.mxu2 %v7038_v0 }
 0x71b   : > { %v2908_v53 = vpop.f32.mrf.mxu2 }
 0x720   : > { %2958 = vmatmul.f32.gmra.mxu2 %v7039_v55  ;;  %v7054_v55 = vld [vmem:[#allocation30_spill] sm:$0xff] }
 0x721   : > { %v2848_v21 = vperm.slane %v7054_v55, 3 }
 0x723   : > { %v2911_v5 = vpop.f32.mrf.mxu2 }
 0x728   : > { %2961 = vmatmul.f32.gmra.mxu2 %v7041_v15  ;;  %v7055_v15 = vmax.f32 %v6397_v57, 0.0 }
 0x72b   : > { %v2914_v27 = vpop.f32.mrf.mxu2 }
 0x730   : > { %2964 = vmatmul.f32.gmra.mxu2 %v7043_v60 }
 0x733   : > { %v2917_v54 = vpop.f32.mrf.mxu2 }
 0x738   : > { %2967 = vmatmul.f32.gmra.mxu2 %v7045_v37 }
 0x73b   : > { %v2920_v22 = vpop.f32.mrf.mxu2 }
 0x740   : > { %2970 = vmatmul.f32.gmra.mxu2 %v7046_v39 }
 0x743   : > { %v2923_v23 = vpop.f32.mrf.mxu2 }
 0x748   : > { %2973 = vmatmul.f32.gmra.mxu2 %v7047_v35  ;;  %v7056_v35 = vmax.f32 %v6239_v20, 0.0 }
 0x74b   : > { %v2926_v45 = vpop.f32.mrf.mxu2 }
 0x750   : > { %2976 = vmatmul.f32.gmra.mxu2 %v7048_v63 }
 0x753   : > { %v2929_v9 = vpop.f32.mrf.mxu2 }
 0x758   : > { %2979 = vmatmul.f32.gmra.mxu2 %v7049_v52 }
 0x75b   : > { %v2932_v14 = vpop.f32.mrf.mxu2 }
 0x760   : > { %2982 = vmatmul.f32.gmra.mxu2 %v7050_v46 }
 0x763   : > { %v2935_v41 = vpop.f32.mrf.mxu2 }
 0x768   : > { %2985 = vmatmul.f32.gmra.mxu2 %v7051_v8 }
 0x76b   : > { %v2938_v58 = vpop.f32.mrf.mxu2 }
 0x770   : > { %2988 = vmatmul.f32.gmra.mxu2 %v7052_v28 }
 0x773   : > { %v2941_v62 = vpop.f32.mrf.mxu2 }
 0x778   : > { %2991 = vmatmul.f32.gmra.mxu2 %v7053_v38 }
 0x77b   : > { %v2944_v0 = vpop.f32.mrf.mxu2 }
 0x780   : > { %v2882_v10 = vpop.f32.mrf.mxu0  ;;  %2994 = vmatmul.f32.gmra.mxu2 %v7055_v15 }
 0x781   : > { %v6574_v18 = vadd.f32 %v2882_v10, %v2848_v21 }
 0x783   : > { %v3095_v51 = vrot.slane %v6574_v18, 1  ;;  %v2947_v19 = vpop.f32.mrf.mxu2  ;;  %v3102_v60 = vperm.slane %v6574_v18, 0  ;;  %v3096_v10 = vrot.slane %v6574_v18, 2 }
 0x785   : > { %v3103_v43 = vperm.slane %v3095_v51, 0  ;;  %v3118_v13 = vadd.f32 %v3102_v60, %v2902_v30  ;;  %v3119_v37 = vadd.f32 %v3102_v60, %v2905_v6  ;;  %v3120_v63 = vadd.f32 %v3102_v60, %v2908_v53 }
 0x786   : > { %v3121_v28 = vadd.f32 %v3102_v60, %v2911_v5  ;;  %v3122_v15 = vadd.f32 %v3102_v60, %v2914_v27  ;;  %v7057_v53 = vmax.f32 %v6243_v12, 0.0  ;;  %v7058_v12 = vmax.f32 %v6277_v47, 0.0 }
 0x787   : > { %v3126_v39 = vadd.f32 %v3103_v43, %v2926_v45  ;;  %v3127_v31 = vadd.f32 %v3103_v43, %v2929_v9  ;;  %v3128_v52 = vadd.f32 %v3103_v43, %v2932_v14  ;;  %v3182_v46 = vmax.f32 %v3118_v13, %v3119_v37 }
 0x788   : > { %2997 = vmatmul.f32.gmra.mxu2 %v7056_v35  ;;  %v3129_v38 = vadd.f32 %v3103_v43, %v2935_v41  ;;  %v3130_v51 = vadd.f32 %v3103_v43, %v2938_v58  ;;  %v3123_v45 = vadd.f32 %v3102_v60, %v2917_v54  ;;  %v3131_v9 = vadd.f32 %v3103_v43, %v2941_v62 }
 0x789   : > { %v3195_v57 = vmax.f32 %v3126_v39, %v3127_v31  ;;  %v3183_v55 = vmax.f32 %v3182_v46, %v3120_v63  ;;  %v3104_v14 = vperm.slane %v3096_v10, 0  ;;  %v3124_v13 = vadd.f32 %v3102_v60, %v2920_v22 }
 0x78a   : > { %v3132_v37 = vadd.f32 %v3103_v43, %v2944_v0  ;;  %v3125_v39 = vadd.f32 %v3102_v60, %v2923_v23  ;;  %v3133_v31 = vadd.f32 %v3103_v43, %v2947_v19  ;;  %v7059_v10 = vmax.f32 %v6304_v56, 0.0 }
 0x78b   : > { %v2950_v8 = vpop.f32.mrf.mxu2  ;;  %v3196_v21 = vmax.f32 %v3195_v57, %v3128_v52  ;;  %v3184_v30 = vmax.f32 %v3183_v55, %v3121_v28 }
 0x78c   : > { %v3134_v58 = vadd.f32 %v3104_v14, %v2950_v8 }
 0x78d   : > { %v3197_v6 = vmax.f32 %v3196_v21, %v3129_v38  ;;  %v3185_v32 = vmax.f32 %v3184_v30, %v3122_v15 }
 0x78f   : > { %v3198_v20 = vmax.f32 %v3197_v6, %v3130_v51  ;;  %v3186_v5 = vmax.f32 %v3185_v32, %v3123_v45 }
 0x790   : > { %3000 = vmatmul.f32.gmra.mxu2 %v7057_v53  ;;  %v7060_v53 = vmax.f32 %v6339_v25, 0.0 }
 0x791   : > { %v3199_v41 = vmax.f32 %v3198_v20, %v3131_v9  ;;  %v3187_v63 = vmax.f32 %v3186_v5, %v3124_v13 }
 0x793   : > { %v2953_v35 = vpop.f32.mrf.mxu2  ;;  %v3200_v27 = vmax.f32 %v3199_v41, %v3132_v37  ;;  %v3188_v46 = vmax.f32 %v3187_v63, %v3125_v39  ;;  %v7061_v41 = vmax.f32 %v6360_v26, 0.0 }
 0x794   : > { %v3135_v52 = vadd.f32 %v3104_v14, %v2953_v35  ;;  %v7062_v35 = vmax.f32 %v6387_v50, 0.0 }
 0x795   : > { %v3201_v54 = vmax.f32 %v3200_v27, %v3133_v31  ;;  %v3189_v57 = vrot.slane %v3188_v46, 4 }
 0x796   : > { %v3208_v62 = vmax.f32 %v3134_v58, %v3135_v52  ;;  %v7063_v52 = vmax.f32 %v6420_v4, 0.0 }
 0x797   : > { %v3202_v28 = vrot.slane %v3201_v54, 4  ;;  %v3190_v38 = vmax.f32 %v3188_v46, %v3189_v57  ;;  %v7064_v57 = vmax.f32 %v6259_v61, 0.0 }
 0x798   : > { %3003 = vmatmul.f32.gmra.mxu2 %v7058_v12 }
 0x799   : > { %v3203_v22 = vmax.f32 %v3201_v54, %v3202_v28  ;;  %v3191_v32 = vrot.slane %v3190_v38, 2 }
 0x79b   : > { %v2956_v0 = vpop.f32.mrf.mxu2  ;;  %v3204_v55 = vrot.slane %v3203_v22, 2  ;;  %v3192_v19 = vmax.f32 %v3190_v38, %v3191_v32  ;;  %v3097_v38 = vrot.slane %v6574_v18, 3 }
 0x79c   : > { %v3136_v23 = vadd.f32 %v3104_v14, %v2956_v0  ;;  %v7065_v0 = vmax.f32 %v6263_v7, 0.0 }
 0x79d   : > { %v3205_v60 = vmax.f32 %v3203_v22, %v3204_v55  ;;  %v3193_v21 = vrot.slane %v3192_v19, 1  ;;  %v3105_v32 = vperm.slane %v3097_v38, 0  ;;  %v7074_v38 = vmax.f32 %v6073_v40, 0.0 }
 0x79e   : > { %v3209_v43 = vmax.f32 %v3208_v62, %v3136_v23 }
 0x79f   : > { %v3206_v8 = vrot.slane %v3205_v60, 1  ;;  %v3194_v15 = vmax.f32 %v3192_v19, %v3193_v21 }
 0x7a0   : > { %3006 = vmatmul.f32.gmra.mxu2 %v7059_v10 }
 0x7a1   : > { %v3207_v51 = vmax.f32 %v3205_v60, %v3206_v8  ;;  %v3286_v6 = vmax.f32 %v3194_v15, 0.0  ;;  %v7067_v15 = vmax.f32 %v6330_v3, 0.0 }
 0x7a3   : > { %v2959_v30 = vpop.f32.mrf.mxu2  ;;  %v3287_v47 = vmax.f32 %v3207_v51, 0.0 }
 0x7a4   : > { %v3137_v45 = vadd.f32 %v3104_v14, %v2959_v30 }
 0x7a5   : > { %v3340_v9 = vsel %vm1780_vm2, %v3287_v47, %v3286_v6  ;;  %v7068_v6 = vmax.f32 %v6132_v24, 0.0 }
 0x7a6   : > { %v3210_v20 = vmax.f32 %v3209_v43, %v3137_v45  ;;  %v7066_v43 = vmax.f32 %v6298_v29, 0.0 }
 0x7a8   : > { %3009 = vmatmul.f32.gmra.mxu2 %v7060_v53 }
 0x7ab   : > { %v2962_v13 = vpop.f32.mrf.mxu2 }
 0x7ac   : > { %v3138_v37 = vadd.f32 %v3104_v14, %v2962_v13 }
 0x7ae   : > { %v3211_v5 = vmax.f32 %v3210_v20, %v3138_v37  ;;  %v7070_v37 = vmax.f32 %v6140_v34, 0.0 }
 0x7b0   : > { %3012 = vmatmul.f32.gmra.mxu2 %v7061_v41 }
 0x7b3   : > { %v2965_v56 = vpop.f32.mrf.mxu2 }
 0x7b4   : > { %v3139_v39 = vadd.f32 %v3104_v14, %v2965_v56  ;;  %v7071_v56 = vmax.f32 %v6148_v1, 0.0 }
 0x7b6   : > { %v3212_v31 = vmax.f32 %v3211_v5, %v3139_v39 }
 0x7b8   : > { %3015 = vmatmul.f32.gmra.mxu2 %v7062_v35 }
 0x7bb   : > { %v2968_v63 = vpop.f32.mrf.mxu2 }
 0x7bc   : > { %v3140_v27 = vadd.f32 %v3104_v14, %v2968_v63  ;;  %v7072_v63 = vmax.f32 %v6067_v49, 0.0 }
 0x7be   : > { %v3213_v58 = vmax.f32 %v3212_v31, %v3140_v27 }
 0x7c0   : > { %3018 = vmatmul.f32.gmra.mxu2 %v7063_v52  ;;  %v3098_v52 = vrot.slane %v6574_v18, 4 }
 0x7c3   : > { %v2971_v25 = vpop.f32.mrf.mxu2 }
 0x7c4   : > { %v3141_v46 = vadd.f32 %v3104_v14, %v2971_v25 }
 0x7c6   : > { %v3214_v54 = vmax.f32 %v3213_v58, %v3141_v46  ;;  %v7073_v46 = vmax.f32 %v6070_v11, 0.0 }
 0x7c8   : > { %v3215_v62 = vrot.slane %v3214_v54, 4  ;;  %3021 = vmatmul.f32.gmra.mxu2 %v7064_v57 }
 0x7ca   : > { %v3216_v26 = vmax.f32 %v3214_v54, %v3215_v62  ;;  %v3106_v54 = vperm.slane %v3098_v52, 0  ;;  %v7086_v52 = vmax.f32 %v6475_v42, 0.0 }
 0x7cb   : > { %v2974_v28 = vpop.f32.mrf.mxu2 }
 0x7cc   : > { %v3217_v12 = vrot.slane %v3216_v26, 2  ;;  %v3142_v14 = vadd.f32 %v3105_v32, %v2974_v28 }
 0x7ce   : > { %v3218_v50 = vmax.f32 %v3216_v26, %v3217_v12 }
 0x7d0   : > { %v3219_v22 = vrot.slane %v3218_v50, 1  ;;  %3024 = vmatmul.f32.gmra.mxu2 %v7065_v0 }
 0x7d2   : > { %v3220_v4 = vmax.f32 %v3218_v50, %v3219_v22 }
 0x7d3   : > { %v2977_v55 = vpop.f32.mrf.mxu2 }
 0x7d4   : > { %v3288_v23 = vmax.f32 %v3220_v4, 0.0  ;;  %v3143_v19 = vadd.f32 %v3105_v32, %v2977_v55 }
 0x7d6   : > { %v3341_v60 = vsel %vm1782_vm3, %v3288_v23, %v3340_v9  ;;  %v3221_v61 = vmax.f32 %v3142_v14, %v3143_v19  ;;  %v7069_v9 = vmax.f32 %v6136_v16, 0.0  ;;  %v7076_v23 = vmax.f32 %v6121_v2, 0.0 }
 0x7d8   : > { %3027 = vmatmul.f32.gmra.mxu2 %v7066_v43 }
 0x7db   : > { %v2980_v21 = vpop.f32.mrf.mxu2 }
 0x7dc   : > { %v3144_v8 = vadd.f32 %v3105_v32, %v2980_v21 }
 0x7de   : > { %v3222_v10 = vmax.f32 %v3221_v61, %v3144_v8  ;;  %v7078_v8 = vmax.f32 %v6185_v44, 0.0 }
 0x7e0   : > { %3030 = vmatmul.f32.gmra.mxu2 %v7067_v15 }
 0x7e3   : > { %v2983_v7 = vpop.f32.mrf.mxu2 }
 0x7e4   : > { %v3145_v51 = vadd.f32 %v3105_v32, %v2983_v7  ;;  %v7079_v7 = vmax.f32 %v6416_v59, 0.0 }
 0x7e6   : > { %v3223_v30 = vmax.f32 %v3222_v10, %v3145_v51 }
 0x7e8   : > { %3033 = vmatmul.f32.gmra.mxu2 %v7068_v6 }
 0x7eb   : > { %v2986_v47 = vpop.f32.mrf.mxu2 }
 0x7ec   : > { %v3146_v45 = vadd.f32 %v3105_v32, %v2986_v47  ;;  %v7080_v47 = vld [vmem:[#allocation8_spill] sm:$0xff] }
 0x7ee   : > { %v3224_v20 = vmax.f32 %v3223_v30, %v3146_v45  ;;  %v7081_v45 = vmax.f32 %v7080_v47, 0.0 }
 0x7f0   : > { %3036 = vmatmul.f32.gmra.mxu2 %v7069_v9 }
 0x7f3   : > { %v2989_v29 = vpop.f32.mrf.mxu2 }
 0x7f4   : > { %v3147_v53 = vadd.f32 %v3105_v32, %v2989_v29  ;;  %v3099_v29 = vrot.slane %v6574_v18, 5 }
 0x7f6   : > { %v3225_v13 = vmax.f32 %v3224_v20, %v3147_v53  ;;  %v3107_v59 = vperm.slane %v3099_v29, 0 }
 0x7f8   : > { %3039 = vmatmul.f32.gmra.mxu2 %v7070_v37 }
 0x7fb   : > { %v2992_v3 = vpop.f32.mrf.mxu2 }
 0x7fc   : > { %v3148_v5 = vadd.f32 %v3105_v32, %v2992_v3 }
 0x7fe   : > { %v3226_v41 = vmax.f32 %v3225_v13, %v3148_v5  ;;  %v7082_v13 = vld [vmem:[#allocation29_spill] sm:$0xff] }
 0x7ff   : > { %v7083_v37 = vmax.f32 %v7082_v13, 0.0 }
 0x800   : > { %3042 = vmatmul.f32.gmra.mxu2 %v7071_v56 }
 0x803   : > { %v2995_v24 = vpop.f32.mrf.mxu2 }
 0x804   : > { %v3149_v39 = vadd.f32 %v3105_v32, %v2995_v24  ;;  %v7075_v32 = vmax.f32 %v6099_v17, 0.0 }
 0x806   : > { %v3227_v31 = vmax.f32 %v3226_v41, %v3149_v39 }
 0x808   : > { %v3228_v35 = vrot.slane %v3227_v31, 4  ;;  %3045 = vmatmul.f32.gmra.mxu2 %v7072_v63 }
 0x80a   : > { %v3229_v16 = vmax.f32 %v3227_v31, %v3228_v35  ;;  %v7084_v35 = vld [vmem:[#allocation31_spill] sm:$0xff] }
 0x80b   : > { %v2998_v27 = vpop.f32.mrf.mxu2  ;;  %v7085_v63 = vmax.f32 %v7084_v35, 0.0 }
 0x80c   : > { %v3230_v58 = vrot.slane %v3229_v16, 2  ;;  %v3150_v26 = vadd.f32 %v3106_v54, %v2998_v27 }
 0x80e   : > { %v3231_v34 = vmax.f32 %v3229_v16, %v3230_v58 }
 0x810   : > { %v3232_v25 = vrot.slane %v3231_v34, 1  ;;  %3048 = vmatmul.f32.gmra.mxu2 %v7073_v46 }
 0x812   : > { %v3233_v1 = vmax.f32 %v3231_v34, %v3232_v25 }
 0x813   : > { %v3001_v62 = vpop.f32.mrf.mxu2 }
 0x814   : > { %v3289_v57 = vmax.f32 %v3233_v1, 0.0  ;;  %v3151_v28 = vadd.f32 %v3106_v54, %v3001_v62 }
 0x816   : > { %v3234_v12 = vmax.f32 %v3150_v26, %v3151_v28  ;;  %v3342_v49 = vsel %vm1784_vm4, %v3289_v57, %v3341_v60  ;;  %v7077_v60 = vmax.f32 %v6162_v48, 0.0  ;;  %v7088_v26 = vmax.f32 %v6500_v33, 0.0 }
 0x818   : > { %3051 = vmatmul.f32.gmra.mxu2 %v7074_v38  ;;  %v7089_v38 = vld [vmem:[#allocation9_spill] sm:$0xff] }
 0x81b   : > { %v3004_v50 = vpop.f32.mrf.mxu2 }
 0x81c   : > { %v3152_v22 = vadd.f32 %v3106_v54, %v3004_v50  ;;  %v7090_v50 = vmax.f32 %v7089_v38, 0.0 }
 0x81e   : > { %v3235_v0 = vmax.f32 %v3234_v12, %v3152_v22 }
 0x820   : > { %3054 = vmatmul.f32.gmra.mxu2 %v7075_v32  ;;  %v7091_v32 = vld [vmem:[#allocation10_spill] sm:$0xff] }
 0x823   : > { %v3007_v11 = vpop.f32.mrf.mxu2 }
 0x824   : > { %v3153_v4 = vadd.f32 %v3106_v54, %v3007_v11  ;;  %v7092_v11 = vmax.f32 %v7091_v32, 0.0  ;;  %v3296_v32 = vld [vmem:[#allocation2 + $0x10] sm:$0xff] }
 0x826   : > { %v3236_v55 = vmax.f32 %v3235_v0, %v3153_v4 }
 0x828   : > { %3057 = vmatmul.f32.gmra.mxu2 %v7076_v23 }
 0x82b   : > { %v3010_v14 = vpop.f32.mrf.mxu2 }
 0x82c   : > { %v3154_v19 = vadd.f32 %v3106_v54, %v3010_v14 }
 0x82e   : > { %v3237_v61 = vmax.f32 %v3236_v55, %v3154_v19 }
 0x830   : > { %3060 = vmatmul.f32.gmra.mxu2 %v7077_v60 }
 0x833   : > { %v3013_v40 = vpop.f32.mrf.mxu2 }
 0x834   : > { %v3155_v43 = vadd.f32 %v3106_v54, %v3013_v40 }
 0x836   : > { %v3238_v21 = vmax.f32 %v3237_v61, %v3155_v43  ;;  %v3100_v61 = vrot.slane %v6574_v18, 6 }
 0x838   : > { %3063 = vmatmul.f32.gmra.mxu2 %v7078_v8 }
 0x83b   : > { %v3016_v17 = vpop.f32.mrf.mxu2 }
 0x83c   : > { %v3156_v10 = vadd.f32 %v3106_v54, %v3016_v17 }
 0x83e   : > { %v3239_v15 = vmax.f32 %v3238_v21, %v3156_v10  ;;  %v3108_v21 = vperm.slane %v3100_v61, 0  ;;  %v3321_v61 = vld [vmem:[#allocation2 + $0xd8] sm:$0xff] }
 0x840   : > { %3066 = vmatmul.f32.gmra.mxu2 %v7079_v7 }
 0x843   : > { %v3019_v2 = vpop.f32.mrf.mxu2 }
 0x844   : > { %v3157_v51 = vadd.f32 %v3106_v54, %v3019_v2  ;;  %v7087_v54 = vmax.f32 %v6487_v36, 0.0 }
 0x846   : > { %v3240_v30 = vmax.f32 %v3239_v15, %v3157_v51 }
 0x848   : > { %v3241_v6 = vrot.slane %v3240_v30, 4  ;;  %3069 = vmatmul.f32.gmra.mxu2 %v7081_v45 }
 0x84a   : > { %v3242_v48 = vmax.f32 %v3240_v30, %v3241_v6 }
 0x84b   : > { %v3022_v20 = vpop.f32.mrf.mxu2 }
 0x84c   : > { %v3243_v9 = vrot.slane %v3242_v48, 2  ;;  %v3158_v56 = vadd.f32 %v3107_v59, %v3022_v20 }
 0x84e   : > { %v3244_v44 = vmax.f32 %v3242_v48, %v3243_v9 }
 0x850   : > { %v3245_v53 = vrot.slane %v3244_v44, 1  ;;  %3072 = vmatmul.f32.gmra.mxu2 %v7083_v37 }
 0x852   : > { %v3246_v3 = vmax.f32 %v3244_v44, %v3245_v53 }
 0x853   : > { %v3025_v5 = vpop.f32.mrf.mxu2 }
 0x854   : > { %v3290_v41 = vmax.f32 %v3246_v3, 0.0  ;;  %v3159_v24 = vadd.f32 %v3107_v59, %v3025_v5  ;;  %v3324_v5 = vld [vmem:[#allocation2 + $0xf0] sm:$0xff] }
 0x855   : > { %3348 = vmatpush.msra.mxu0 %v3324_v5  ;;  %v3301_v5 = vld [vmem:[#allocation2 + $0x38] sm:$0xff] }
 0x856   : > { %v3247_v39 = vmax.f32 %v3158_v56, %v3159_v24  ;;  %v3343_v31 = vsel %vm1786_vm5, %v3290_v41, %v3342_v49 }
 0x858   : > { %3075 = vmatmul.f32.gmra.mxu2 %v7085_v63  ;;  %v3318_v63 = vld [vmem:[#allocation2 + $0xc0] sm:$0xff] }
 0x85b   : > { %v3028_v16 = vpop.f32.mrf.mxu2 }
 0x85c   : > { %v3160_v27 = vadd.f32 %v3107_v59, %v3028_v16 }
 0x85e   : > { %v3248_v58 = vmax.f32 %v3247_v39, %v3160_v27  ;;  %v3322_v39 = vld [vmem:[#allocation2 + $0xe0] sm:$0xff]  ;;  %v3316_v27 = vld [vmem:[#allocation2 + $0xb0] sm:$0xff] }
 0x85f   : > { %3349 = vmatpush.msra.mxu0 %v3322_v39  ;;  %v3297_v39 = vld [vmem:[#allocation2 + $0x18] sm:$0xff] }
 0x860   : > { %3078 = vmatmul.f32.gmra.mxu2 %v7086_v52 }
 0x863   : > { %v3031_v34 = vpop.f32.mrf.mxu2 }
 0x864   : > { %v3161_v25 = vadd.f32 %v3107_v59, %v3031_v34 }
 0x866   : > { %v3249_v46 = vmax.f32 %v3248_v58, %v3161_v25  ;;  %v3314_v25 = vld [vmem:[#allocation2 + $0xa0] sm:$0xff] }
 0x868   : > { %3081 = vmatmul.f32.gmra.mxu2 %v7087_v54 }
 0x86b   : > { %v3034_v1 = vpop.f32.mrf.mxu2 }
 0x86c   : > { %v3162_v62 = vadd.f32 %v3107_v59, %v3034_v1  ;;  %v3310_v1 = vld [vmem:[#allocation2 + $0x80] sm:$0xff] }
 0x86e   : > { %v3250_v57 = vmax.f32 %v3249_v46, %v3162_v62  ;;  %v3312_v46 = vld [vmem:[#allocation2 + $0x90] sm:$0xff] }
 0x870   : > { %3084 = vmatmul.f32.gmra.mxu2 %v7088_v26 }
 0x873   : > { %v3037_v28 = vpop.f32.mrf.mxu2 }
 0x874   : > { %v3163_v12 = vadd.f32 %v3107_v59, %v3037_v28 }
 0x876   : > { %v3251_v49 = vmax.f32 %v3250_v57, %v3163_v12  ;;  %v3308_v57 = vld [vmem:[#allocation2 + $0x70] sm:$0xff]  ;;  %v3306_v12 = vld [vmem:[#allocation2 + $0x60] sm:$0xff] }
 0x878   : > { %3087 = vmatmul.f32.gmra.mxu2 %v7090_v50  ;;  %v3302_v50 = vld [vmem:[#allocation2 + $0x40] sm:$0xff] }
 0x87b   : > { %v3040_v42 = vpop.f32.mrf.mxu2 }
 0x87c   : > { %v3164_v22 = vadd.f32 %v3107_v59, %v3040_v42  ;;  %v3300_v42 = vld [vmem:[#allocation2 + $0x30] sm:$0xff] }
 0x87e   : > { %v3252_v0 = vmax.f32 %v3251_v49, %v3164_v22  ;;  %v3304_v49 = vld [vmem:[#allocation2 + $0x50] sm:$0xff] }
 0x880   : > { %3090 = vmatmul.f32.gmra.mxu2 %v7092_v11  ;;  %v3294_v11 = vld [vmem:[#allocation2] sm:$0xff] }
 0x883   : > { %v3043_v36 = vpop.f32.mrf.mxu2 }
 0x884   : > { %v3165_v4 = vadd.f32 %v3107_v59, %v3043_v36  ;;  %v3325_v36 = vld [vmem:[#allocation2 + $0xf8] sm:$0xff] }
 0x886   : > { %v3253_v55 = vmax.f32 %v3252_v0, %v3165_v4  ;;  %v3298_v0 = vld [vmem:[#allocation2 + $0x20] sm:$0xff] }
 0x888   : > { %v3254_v23 = vrot.slane %v3253_v55, 4 }
 0x88a   : > { %v3255_v14 = vmax.f32 %v3253_v55, %v3254_v23  ;;  %v3323_v55 = vld [vmem:[#allocation2 + $0xe8] sm:$0xff] }
 0x88b   : > { %v3046_v19 = vpop.f32.mrf.mxu2 }
 0x88c   : > { %v3256_v33 = vrot.slane %v3255_v14, 2  ;;  %v3166_v10 = vadd.f32 %v3108_v21, %v3046_v19 }
 0x88e   : > { %v3257_v60 = vmax.f32 %v3255_v14, %v3256_v33  ;;  %v3101_v14 = vrot.slane %v6574_v18, 7  ;;  %v3311_v18 = vld [vmem:[#allocation2 + $0x88] sm:$0xff] }
 0x890   : > { %v3258_v40 = vrot.slane %v3257_v60, 1  ;;  %v3109_v33 = vperm.slane %v3101_v14, 0 }
 0x892   : > { %v3259_v43 = vmax.f32 %v3257_v60, %v3258_v40  ;;  %v3319_v60 = vld [vmem:[#allocation2 + $0xc8] sm:$0xff] }
 0x893   : > { %v3049_v8 = vpop.f32.mrf.mxu2 }
 0x894   : > { %v3291_v17 = vmax.f32 %v3259_v43, 0.0  ;;  %v3167_v15 = vadd.f32 %v3108_v21, %v3049_v8  ;;  %v3317_v43 = vld [vmem:[#allocation2 + $0xb8] sm:$0xff] }
 0x896   : > { %v3260_v7 = vmax.f32 %v3166_v10, %v3167_v15  ;;  %v3344_v2 = vsel %vm1788_vm6, %v3291_v17, %v3343_v31  ;;  %v3320_v31 = vld [vmem:[#allocation2 + $0xd0] sm:$0xff]  ;;  %v3315_v17 = vld [vmem:[#allocation2 + $0xa8] sm:$0xff] }
 0x897   : > { %3350 = vmatpush.msra.mxu0 %v3320_v31 }
 0x899   : > { %3351 = vmatpush.msra.mxu0 %v3318_v63 }
 0x89b   : > { %v3052_v51 = vpop.f32.mrf.mxu2  ;;  %3352 = vmatpush.msra.mxu0 %v3316_v27 }
 0x89c   : > { %v3168_v30 = vadd.f32 %v3108_v21, %v3052_v51 }
 0x89d   : > { %3353 = vmatpush.msra.mxu0 %v3314_v25 }
 0x89e   : > { %v3261_v6 = vmax.f32 %v3260_v7, %v3168_v30  ;;  %v3313_v7 = vld [vmem:[#allocation2 + $0x98] sm:$0xff] }
 0x89f   : > { %3354 = vmatpush.msra.mxu0 %v3312_v46 }
 0x8a1   : > { %3355 = vmatpush.msra.mxu0 %v3310_v1 }
 0x8a3   : > { %v3055_v47 = vpop.f32.mrf.mxu2  ;;  %3356 = vmatpush.msra.mxu0 %v3308_v57 }
 0x8a4   : > { %v3169_v45 = vadd.f32 %v3108_v21, %v3055_v47 }
 0x8a5   : > { %3357 = vmatpush.msra.mxu0 %v3306_v12 }
 0x8a6   : > { %v3262_v48 = vmax.f32 %v3261_v6, %v3169_v45  ;;  %v3309_v45 = vld [vmem:[#allocation2 + $0x78] sm:$0xff] }
 0x8a7   : > { %3358 = vmatpush.msra.mxu0 %v3304_v49 }
 0x8a9   : > { %3359 = vmatpush.msra.mxu0 %v3302_v50 }
 0x8ab   : > { %v3058_v20 = vpop.f32.mrf.mxu2  ;;  %3360 = vmatpush.msra.mxu0 %v3300_v42 }
 0x8ac   : > { %v3170_v9 = vadd.f32 %v3108_v21, %v3058_v20 }
 0x8ad   : > { %3361 = vmatpush.msra.mxu0 %v3298_v0 }
 0x8ae   : > { %v3263_v29 = vmax.f32 %v3262_v48, %v3170_v9  ;;  %v3307_v9 = vld [vmem:[#allocation2 + $0x68] sm:$0xff] }
 0x8af   : > { %3362 = vmatpush.msra.mxu0 %v3296_v32 }
 0x8b1   : > { %3363 = vmatpush.msra.mxu0 %v3294_v11 }
 0x8b3   : > { %v3061_v44 = vpop.f32.mrf.mxu2  ;;  %3368 = vmatpush.msrb.mxu0 %v3325_v36 }
 0x8b4   : > { %v3171_v53 = vadd.f32 %v3108_v21, %v3061_v44  ;;  %v3305_v44 = vld [vmem:[#allocation2 + $0x58] sm:$0xff] }
 0x8b5   : > { %3369 = vmatpush.msrb.mxu0 %v3323_v55 }
 0x8b6   : > { %v3264_v13 = vmax.f32 %v3263_v29, %v3171_v53 }
 0x8b7   : > { %3370 = vmatpush.msrb.mxu0 %v3321_v61 }
 0x8b9   : > { %3371 = vmatpush.msrb.mxu0 %v3319_v60 }
 0x8bb   : > { %v3064_v37 = vpop.f32.mrf.mxu2  ;;  %3372 = vmatpush.msrb.mxu0 %v3317_v43 }
 0x8bc   : > { %v3172_v3 = vadd.f32 %v3108_v21, %v3064_v37 }
 0x8bd   : > { %3373 = vmatpush.msrb.mxu0 %v3315_v17 }
 0x8be   : > { %v3265_v59 = vmax.f32 %v3264_v13, %v3172_v3  ;;  %v3303_v3 = vld [vmem:[#allocation2 + $0x48] sm:$0xff] }
 0x8bf   : > { %3374 = vmatpush.msrb.mxu0 %v3313_v7 }
 0x8c1   : > { %3375 = vmatpush.msrb.mxu0 %v3311_v18 }
 0x8c3   : > { %v3067_v41 = vpop.f32.mrf.mxu2  ;;  %3376 = vmatpush.msrb.mxu0 %v3309_v45 }
 0x8c4   : > { %v3173_v56 = vadd.f32 %v3108_v21, %v3067_v41 }
 0x8c5   : > { %3377 = vmatpush.msrb.mxu0 %v3307_v9 }
 0x8c6   : > { %v3266_v24 = vmax.f32 %v3265_v59, %v3173_v56  ;;  %v3299_v56 = vld [vmem:[#allocation2 + $0x28] sm:$0xff] }
 0x8c7   : > { %3378 = vmatpush.msrb.mxu0 %v3305_v44 }
 0x8c8   : > { %v3267_v35 = vrot.slane %v3266_v24, 4 }
 0x8c9   : > { %3379 = vmatpush.msrb.mxu0 %v3303_v3 }
 0x8ca   : > { %v3268_v16 = vmax.f32 %v3266_v24, %v3267_v35  ;;  %v3295_v35 = vld [vmem:[#allocation2 + $0x8] sm:$0xff] }
 0x8cb   : > { %v3070_v58 = vpop.f32.mrf.mxu2  ;;  %3380 = vmatpush.msrb.mxu0 %v3301_v5 }
 0x8cc   : > { %v3269_v52 = vrot.slane %v3268_v16, 2  ;;  %v3174_v21 = vadd.f32 %v3109_v33, %v3070_v58 }
 0x8cd   : > { %3381 = vmatpush.msrb.mxu0 %v3299_v56 }
 0x8ce   : > { %v3270_v34 = vmax.f32 %v3268_v16, %v3269_v52 }
 0x8cf   : > { %3382 = vmatpush.msrb.mxu0 %v3297_v39 }
 0x8d0   : > { %v3271_v54 = vrot.slane %v3270_v34, 1 }
 0x8d1   : > { %3383 = vmatpush.msrb.mxu0 %v3295_v35 }
 0x8d2   : > { %v3272_v62 = vmax.f32 %v3270_v34, %v3271_v54  ;;  %v3326_v34 = vld [vmem:[%s6699_s6] sm:$0x3] }
 0x8d3   : > { %v3073_v26 = vpop.f32.mrf.mxu2  ;;  %v3328_v25 = vperm.slane %v3326_v34, 0  ;;  %v3329_v1 = vperm.slane %v3326_v34, 1 }
 0x8d4   : > { %v3292_v28 = vmax.f32 %v3272_v62, 0.0  ;;  %v3175_v40 = vadd.f32 %v3109_v33, %v3073_v26 }
 0x8d6   : > { %v6653_v38 = vsel %vm1790_vm7, %v3292_v28, %v3344_v2  ;;  %v3273_v10 = vmax.f32 %v3174_v21, %v3175_v40 }
 0x8db   : > { %v3076_v22 = vpop.f32.mrf.mxu2 }
 0x8dc   : > { %v3176_v8 = vadd.f32 %v3109_v33, %v3076_v22 }
 0x8de   : > { %v3274_v51 = vmax.f32 %v3273_v10, %v3176_v8 }
 0x8e3   : > { %v3079_v4 = vpop.f32.mrf.mxu2 }
 0x8e4   : > { %v3177_v15 = vadd.f32 %v3109_v33, %v3079_v4 }
 0x8e6   : > { %v3275_v6 = vmax.f32 %v3274_v51, %v3177_v15 }
 0x8eb   : > { %v3082_v23 = vpop.f32.mrf.mxu2 }
 0x8ec   : > { %v3178_v30 = vadd.f32 %v3109_v33, %v3082_v23 }
 0x8ee   : > { %v3276_v48 = vmax.f32 %v3275_v6, %v3178_v30 }
 0x8f3   : > { %v3085_v19 = vpop.f32.mrf.mxu2 }
 0x8f4   : > { %v3179_v47 = vadd.f32 %v3109_v33, %v3085_v19 }
 0x8f6   : > { %v3277_v29 = vmax.f32 %v3276_v48, %v3179_v47 }
 0x8fb   : > { %v3088_v2 = vpop.f32.mrf.mxu2 }
 0x8fc   : > { %v3180_v20 = vadd.f32 %v3109_v33, %v3088_v2 }
 0x8fe   : > { %v3278_v13 = vmax.f32 %v3277_v29, %v3180_v20 }
 0x903   : > { %v3091_v53 = vpop.f32.mrf.mxu2 }
 0x904   : > { %v3181_v37 = vadd.f32 %v3109_v33, %v3091_v53 }
 0x906   : > { %v3279_v59 = vmax.f32 %v3278_v13, %v3181_v37 }
 0x908   : > { %v3280_v41 = vrot.slane %v3279_v59, 4 }
 0x90a   : > { %v3281_v24 = vmax.f32 %v3279_v59, %v3280_v41 }
 0x90c   : > { %v3282_v31 = vrot.slane %v3281_v24, 2 }
 0x90e   : > { %v3283_v63 = vmax.f32 %v3281_v24, %v3282_v31 }
 0x910   : > { %v3284_v16 = vrot.slane %v3283_v63, 1 }
 0x912   : > { %v3285_v27 = vmax.f32 %v3283_v63, %v3284_v16 }
 0x914   : > { %v3293_v58 = vmax.f32 %v3285_v27, 0.0 }
 0x916   : > { %v3346_v52 = vsel %vm1792_vm8, %v3293_v58, %v6653_v38 }
 0x917   : > { %3364 = vmatmul.f32.vlgmr.msra.gmra.mxu0 %v3346_v52 }
 0x91f   : > { %3384 = vmatmul.f32.vlgmr.msrb.gmra.mxu0 %v3346_v52 }
 0x994   : > { %v3365_v46 = vpop.f32.mrf.mxu0 }
 0x995   : > { %v3366_v54 = vadd.f32 %v3365_v46, %v3328_v25 }
 0x997   : > { %3388 = vst [vmem:[%s291_s14] sm:$0xff] %v3366_v54 }
 0x99c   : > { %v3385_v62 = vpop.f32.mrf.mxu0 }
 0x99d   : > { %v3386_v57 = vadd.f32 %v3385_v62, %v3329_v1 }
 0x99f   : > { %3389 = vst [vmem:[%s291_s14 + $0x8] sm:$0xff] %v3386_v57 }
 0x9a0   : > { %3890 = shalt.err (!%p3887_p8)
}
 0x9a1   : > { %3758 = dma.vmem_to_hbm [thread:$0]  (%p4012_p5), %s3405_s18, 256, %s3407_s19, %s3391_s20  }
 0x9a2 PF: > { %p3770_p9 = scmp.ge.s32.totalorder %s3929_s27, 2  ;;  %s3418_s23 = sand.u32 1, %s3917_s24  }
 0x9a3   : > { %s3419_s14 = scalar_lea.sflag [#allocation4], %s3418_s23 }
 0x9a4   : > { %p3765_p10 = pnand %p3770_p9, %p4016_p6 }
 0x9a6   : > { %p3766_p11 = pneg %p3765_p10 }
 0x9a8   : > { %3912 = dma.done.wait (%p3766_p11), %s3419_s14, 256  }
 0x9a9   : > { %3914 = vsyncadd (%p3766_p11), %s3419_s14, 4294967040  ;;  %p18_p12 = scmp.ge.s32.totalorder %s3999_s30, 4   ;;  %s7093_s24 = smov %s3921_s25 }
 0x9aa   : > { %s7094_s25 = smov %s3925_s26  ;;  %s7095_s26 = smov %s4010_s10 }
 0x9ab   : > { %s7096_s27 = smov %s3999_s30  ;;  %20 = sbr.rel (!%p18_p12) target bundleno = 4 (0x4), region = 91 }
 0x9b0   :  { %3425 = vsyncpa [#allocation3], 1 }
 0x9b1   :  { %3427 = vsyncpa [#allocation3 + $0x1], 1 }
 0x9b2   :  { %3428 = vsyncpa [#allocation4], 1 }
 0x9b3   :  { %3430 = vsyncpa [#allocation4 + $0x1], 1 }

</bundles_post_ra>
